<compile_context>
chip_gen: v5e
topology: v5e:2x2
jax: 0.10.0
libtpu: 0.0.40
codegen_flags: <defaults>
</compile_context>

<pallas_src>
import math

import jax
import jax.numpy as jnp
from jax.experimental import pallas as pl
from jax.experimental.pallas import tpu as pltpu


TIME_CHUNK = 8  # timesteps per grid iteration; sweep per generation (8-32).


# ----------------------------------------------------------------------------
# Pallas kernel: one LSTM layer, time chunk per grid step.
# Gate column order (after init-time permutation): [i, f, o, g].
# ----------------------------------------------------------------------------
def _lstm_layer_kernel(x_ref, bias_ref, wih_hbm, whh_hbm, out_ref,
                       h_sc, c_sc, gx_sc, wih_sc, whh_sc, dma_sems):
    """x_ref  : (Tc*B, in)  VMEM  layer input for this chunk (time-major, flat)
       bias_ref:(1, 4H)     VMEM  b_ih + b_hh (f32)
       wih_hbm: (in, 4H)    ANY   bf16 input weight, DMA'd once at chunk 0
       whh_hbm: (H, 4H)     ANY   bf16 recurrent weight, DMA'd once at chunk 0
       out_ref: (Tc, B, H)  VMEM  hidden states for this chunk
       h_sc,c_sc:(B, H)     VMEM  persistent LSTM state across chunks
       gx_sc  : (Tc*B, 4H)  VMEM  chunk gate pre-activations (f32)
       wih_sc : (in, 4H)    VMEM  resident bf16 copy of W_ih
       whh_sc : (H, 4H)     VMEM  resident bf16 copy of W_hh
    """
    chunk = pl.program_id(0)
    Tc, B, H = out_ref.shape

    @pl.when(chunk == 0)
    def _():
        # Overlap the one-shot weight DMAs with the h/c zero-init.
        cp_ih = pltpu.make_async_copy(wih_hbm, wih_sc, dma_sems.at[0])
        cp_hh = pltpu.make_async_copy(whh_hbm, whh_sc, dma_sems.at[1])
        cp_ih.start()
        cp_hh.start()
        h_sc[...] = jnp.zeros_like(h_sc)
        c_sc[...] = jnp.zeros_like(c_sc)
        cp_ih.wait()
        cp_hh.wait()

    # Fused input projection for the whole chunk: one MXU matmul with
    # M = Tc*B rows (throughput-shaped work), bias folded in, f32 accumulate.
    gx_sc[...] = (
        jnp.dot(x_ref[...], wih_sc[...].astype(jnp.float32),
                preferred_element_type=jnp.float32)
        + bias_ref[...])

    # Hoist the recurrent RHS out of the unrolled time loop: load + upcast the
    # resident bf16 W_hh ONCE per chunk (not once per step).
    whh = whh_sc[...].astype(jnp.float32)

    def step(s, carry):
        h_prev, c_prev = carry
        row = pl.multiple_of(s * B, B)
        gates = gx_sc[pl.ds(row, B), :] + jnp.dot(
            h_prev, whh, preferred_element_type=jnp.float32)
        # Permuted gate layout [i, f, o, g]: one wide sigmoid + one tanh.
        sig = jax.nn.sigmoid(gates[:, :3 * H])
        g_g = jnp.tanh(gates[:, 3 * H:])
        i_g = sig[:, 0 * H:1 * H]
        f_g = sig[:, 1 * H:2 * H]
        o_g = sig[:, 2 * H:3 * H]
        c_new = f_g * c_prev + i_g * g_g
        h_new = o_g * jnp.tanh(c_new)
        out_ref[s] = h_new.astype(out_ref.dtype)
        return h_new, c_new

    h_fin, c_fin = jax.lax.fori_loop(
        0, Tc, step, (h_sc[...], c_sc[...]), unroll=True)
    h_sc[...] = h_fin
    c_sc[...] = c_fin


def lstm_layer_forward(x_tbi, layer, nhid, time_chunk=TIME_CHUNK):
    """One LSTM layer (fused input projection + sequential recurrence).

    x_tbi : [T, B, in_dim] float32, time-major
    layer : dict with 'w_ih_t' [in,4H] bf16, 'w_hh_t' [H,4H] bf16,
            'bias' [1,4H] f32 (gate columns permuted to [i,f,o,g])
    returns [T, B, nhid] float32
    """
    T, B, in_dim = x_tbi.shape
    assert B % 8 == 0 and in_dim % 128 == 0 and nhid % 128 == 0, (
        "demo shapes must be sublane/lane aligned")

    n_chunks = pl.cdiv(T, time_chunk)
    T_pad = n_chunks * time_chunk
    if T_pad != T:
        # Padded steps compute garbage states past T; output is sliced [:T]
        # and state is not reused across layers, so this is benign.
        x_tbi = jnp.pad(x_tbi, ((0, T_pad - T), (0, 0), (0, 0)))
    x2d = x_tbi.reshape(T_pad * B, in_dim)

    # Explicit VMEM budget (double-buffered x/out blocks + resident weights +
    # gx/h/c scratch + hoisted f32 W_hh working copy), with 2x headroom.
    vmem_bytes = (
        2 * time_chunk * B * in_dim * 4          # x chunk, double-buffered
        + 2 * 4 * nhid * 4                       # bias, double-buffered
        + 2 * time_chunk * B * nhid * 4          # out chunk, double-buffered
        + time_chunk * B * 4 * nhid * 4          # gx scratch
        + in_dim * 4 * nhid * 2                  # resident W_ih (bf16)
        + nhid * 4 * nhid * 2                    # resident W_hh (bf16)
        + nhid * 4 * nhid * 4                    # hoisted f32 W_hh (may spill)
        + 2 * B * nhid * 4                       # h, c
    )
    vmem_limit = int(min(max(2 * vmem_bytes, 32 * 1024 * 1024),
                         100 * 1024 * 1024))

    cost = pl.CostEstimate(
        flops=2 * T_pad * B * (in_dim + nhid) * 4 * nhid,
        transcendentals=5 * T_pad * B * nhid,
        bytes_accessed=(4 * T_pad * B * in_dim
                        + 2 * (in_dim + nhid) * 4 * nhid
                        + 4 * T_pad * B * nhid),
    )

    out = pl.pallas_call(
        _lstm_layer_kernel,
        out_shape=jax.ShapeDtypeStruct((T_pad, B, nhid), jnp.float32),
        grid_spec=pltpu.PrefetchScalarGridSpec(
            num_scalar_prefetch=0,
            grid=(n_chunks,),
            in_specs=[
                pl.BlockSpec((time_chunk * B, in_dim), lambda c: (c, 0)),
                pl.BlockSpec((1, 4 * nhid), lambda c: (0, 0)),
                pl.BlockSpec(memory_space=pl.ANY),   # W_ih: DMA'd once
                pl.BlockSpec(memory_space=pl.ANY),   # W_hh: DMA'd once
            ],
            out_specs=pl.BlockSpec((time_chunk, B, nhid),
                                   lambda c: (c, 0, 0)),
            scratch_shapes=[
                pltpu.VMEM((B, nhid), jnp.float32),                 # h
                pltpu.VMEM((B, nhid), jnp.float32),                 # c
                pltpu.VMEM((time_chunk * B, 4 * nhid), jnp.float32),  # gx
                pltpu.VMEM((in_dim, 4 * nhid), jnp.bfloat16),       # W_ih res
                pltpu.VMEM((nhid, 4 * nhid), jnp.bfloat16),         # W_hh res
                pltpu.SemaphoreType.DMA((2,)),
            ],
        ),
        compiler_params=pltpu.CompilerParams(
            # Recurrence over time: MUST stay "arbitrary" (serial).
            dimension_semantics=("arbitrary",),
            vmem_limit_bytes=vmem_limit,
        ),
        cost_estimate=cost,
    )(x2d, layer["bias"], layer["w_ih_t"], layer["w_hh_t"])

    return out[:T]


# ----------------------------------------------------------------------------
# Parameter construction (PyTorch init ranges; gate columns permuted to
# [i, f, o, g] so the kernel can use one wide sigmoid + one tanh).
# ----------------------------------------------------------------------------
def init_params(key, ntoken, ninp, nhid, nlayers):
    keys = jax.random.split(key, 1 + 4 * nlayers)
    params = {}
    # encoder: Embedding(ntoken, ninp), uniform(-0.1, 0.1)
    params["embedding"] = jax.random.uniform(
        keys[0], (ntoken, ninp), jnp.float32, -0.1, 0.1)

    stdv = 1.0 / math.sqrt(nhid)
    # PyTorch nn.LSTM gate row order is [i, f, g, o]; permute to [i, f, o, g].
    perm = jnp.concatenate([
        jnp.arange(0, 2 * nhid),           # i, f
        jnp.arange(3 * nhid, 4 * nhid),    # o
        jnp.arange(2 * nhid, 3 * nhid),    # g
    ])

    layers = []
    for l in range(nlayers):
        in_dim = ninp if l == 0 else nhid
        k = keys[1 + 4 * l: 1 + 4 * (l + 1)]
        w_ih = jax.random.uniform(k[0], (4 * nhid, in_dim), jnp.float32, -stdv, stdv)
        w_hh = jax.random.uniform(k[1], (4 * nhid, nhid), jnp.float32, -stdv, stdv)
        b_ih = jax.random.uniform(k[2], (4 * nhid,), jnp.float32, -stdv, stdv)
        b_hh = jax.random.uniform(k[3], (4 * nhid,), jnp.float32, -stdv, stdv)
        layers.append({
            # Weights stored bf16 (MXU-native, half VMEM/DMA); bias stays f32.
            "w_ih_t": w_ih[perm].T.astype(jnp.bfloat16),   # [in_dim, 4H]
            "w_hh_t": w_hh[perm].T.astype(jnp.bfloat16),   # [nhid,   4H]
            "bias": (b_ih + b_hh)[perm][None, :].astype(jnp.float32),  # [1,4H]
        })
    params["lstm"] = layers
    return params


# ----------------------------------------------------------------------------
# Forward pass of RNNModel (eval mode: dropout = identity).
# ----------------------------------------------------------------------------
@jax.jit
def rnn_model_forward(params, token_ids):
    """token_ids: [B, T] int32  ->  output [B, T, nhid] float32."""
    emb = jnp.take(params["embedding"], token_ids, axis=0)   # [B, T, ninp]
    # dropout(emb): identity in eval mode
    x = jnp.transpose(emb, (1, 0, 2))                        # [T, B, ninp]
    for layer in params["lstm"]:
        nhid = layer["w_hh_t"].shape[0]
        x = lstm_layer_forward(x, layer, nhid)
        # TODO(synk): inter-layer LSTM dropout only applies in training mode.
    out = jnp.transpose(x, (1, 0, 2))                        # [B, T, nhid]
    # dropout(output): identity in eval mode
    return out


# ----------------------------------------------------------------------------
# Pure-JAX reference (lax.scan LSTM, same bf16-rounded weights / gate layout).
# ----------------------------------------------------------------------------
def reference_forward(params, token_ids):
    emb = jnp.take(params["embedding"], token_ids, axis=0)
    x = jnp.transpose(emb, (1, 0, 2))  # [T, B, in]
    for layer in params["lstm"]:
        w_ih_t = layer["w_ih_t"].astype(jnp.float32)
        w_hh_t = layer["w_hh_t"].astype(jnp.float32)
        bias = layer["bias"]
        nhid = w_hh_t.shape[0]
        B = x.shape[1]
        h0 = jnp.zeros((B, nhid), jnp.float32)
        c0 = jnp.zeros((B, nhid), jnp.float32)

        def step(carry, xt):
            h, c = carry
            gates = xt @ w_ih_t + h @ w_hh_t + bias
            sig = jax.nn.sigmoid(gates[:, :3 * nhid])
            g = jnp.tanh(gates[:, 3 * nhid:])
            i = sig[:, 0 * nhid:1 * nhid]
            f = sig[:, 1 * nhid:2 * nhid]
            o = sig[:, 2 * nhid:3 * nhid]
            c_new = f * c + i * g
            h_new = o * jnp.tanh(c_new)
            return (h_new, c_new), h_new

        _, ys = jax.lax.scan(step, (h0, c0), x)
        x = ys
    return jnp.transpose(x, (1, 0, 2))


if __name__ == "__main__":
    # Lane/sublane-aligned demo shapes: B multiple of 8, nhid multiple of 128
    # (each gate slice is a whole 128-lane vreg), two time chunks so state
    # persistence across grid steps is exercised.
    ntoken, ninp, nhid, nlayers = 64, 128, 128, 2
    B, T = 8, 16

    key = jax.random.PRNGKey(0)
    pkey, dkey = jax.random.split(key)
    params = init_params(pkey, ntoken, ninp, nhid, nlayers)
    token_ids = jax.random.randint(dkey, (B, T), 0, ntoken, dtype=jnp.int32)

    out = jax.block_until_ready(rnn_model_forward(params, token_ids))
    ref = jax.block_until_ready(reference_forward(params, token_ids))

    assert out.shape == (B, T, nhid)
    err = float(jnp.max(jnp.abs(out - ref)))
    # Both paths use identical bf16-rounded weights with f32 math/accumulation;
    # residual differences are matmul reduction order + EUP approximations.
    assert err < 1e-3, f"Pallas LSTM mismatch vs reference: {err}"

    print("KERNEL_OK")
</pallas_src>

<mosaic_0001>
module attributes {stable_mosaic.version = 11 : i64} {
  func.func @_lstm_layer_kernel(%arg0: i32, %arg1: memref<64x128xf32, #tpu.memory_space<vmem>>, %arg2: memref<1x512xf32, #tpu.memory_space<vmem>>, %arg3: memref<128x512xbf16, #tpu.memory_space<any>>, %arg4: memref<128x512xbf16, #tpu.memory_space<any>>, %arg5: memref<8x8x128xf32, #tpu.memory_space<vmem>>, %arg6: memref<8x128xf32, #tpu.memory_space<vmem>>, %arg7: memref<8x128xf32, #tpu.memory_space<vmem>>, %arg8: memref<64x512xf32, #tpu.memory_space<vmem>>, %arg9: memref<128x512xbf16, #tpu.memory_space<vmem>>, %arg10: memref<128x512xbf16, #tpu.memory_space<vmem>>, %arg11: memref<2x!tpu.dma_semaphore, #tpu.memory_space<semaphore_mem>>) attributes {dimension_semantics = [#tpu.dimension_semantics<arbitrary>], iteration_bounds = array<i64: 2>, scalar_prefetch = 0 : i64, scratch_operands = 6 : i64, tpu.core_type = #tpu.core_type<tc>, window_params = [{transform_indices = @transform_0, window_bounds = array<i64: 64, 128>}, {pipeline_mode = #tpu.pipeline_mode<synchronous>, transform_indices = @transform_1, window_bounds = array<i64: 1, 512>}, {}, {}, {transform_indices = @transform_4, window_bounds = array<i64: 8, 8, 128>}]} {
    %c0_i32 = arith.constant 0 : i32
    %0 = arith.cmpi eq, %arg0, %c0_i32 : i32
    %1 = arith.extui %0 : i1 to i32
    %c0_i32_0 = arith.constant 0 : i32
    %2 = arith.cmpi ne, %1, %c0_i32_0 : i32
    scf.if %2 {
      %c0_i32_67 = arith.constant 0 : i32
      %225 = tpu.memref_slice %arg11[%c0_i32_67] : memref<2x!tpu.dma_semaphore, #tpu.memory_space<semaphore_mem>> -> memref<1x!tpu.dma_semaphore, #tpu.memory_space<semaphore_mem>>
      %226 = tpu.memref_squeeze %225 : memref<1x!tpu.dma_semaphore, #tpu.memory_space<semaphore_mem>> -> memref<!tpu.dma_semaphore, #tpu.memory_space<semaphore_mem>>
      tpu.enqueue_dma source(%arg3 : memref<128x512xbf16, #tpu.memory_space<any>>) target(%arg9 : memref<128x512xbf16, #tpu.memory_space<vmem>>) target_semaphore(%226 : memref<!tpu.dma_semaphore, #tpu.memory_space<semaphore_mem>>)
      %c1_i32_68 = arith.constant 1 : i32
      %227 = tpu.memref_slice %arg11[%c1_i32_68] : memref<2x!tpu.dma_semaphore, #tpu.memory_space<semaphore_mem>> -> memref<1x!tpu.dma_semaphore, #tpu.memory_space<semaphore_mem>>
      %228 = tpu.memref_squeeze %227 : memref<1x!tpu.dma_semaphore, #tpu.memory_space<semaphore_mem>> -> memref<!tpu.dma_semaphore, #tpu.memory_space<semaphore_mem>>
      tpu.enqueue_dma source(%arg4 : memref<128x512xbf16, #tpu.memory_space<any>>) target(%arg10 : memref<128x512xbf16, #tpu.memory_space<vmem>>) target_semaphore(%228 : memref<!tpu.dma_semaphore, #tpu.memory_space<semaphore_mem>>)
      %cst_69 = arith.constant 0.000000e+00 : f32
      %229 = vector.broadcast %cst_69 : f32 to vector<8x128xf32>
      %c0_70 = arith.constant 0 : index
      %c0_71 = arith.constant 0 : index
      %230 = vector.load %arg6[%c0_70, %c0_71] : memref<8x128xf32, #tpu.memory_space<vmem>>, vector<8x128xf32>
      tpu.vector_store %arg6[%c0_70, %c0_71], %229 {strides = array<i32>} : memref<8x128xf32, #tpu.memory_space<vmem>>, vector<8x128xf32>,
      %cst_72 = arith.constant 0.000000e+00 : f32
      %231 = vector.broadcast %cst_72 : f32 to vector<8x128xf32>
      %c0_73 = arith.constant 0 : index
      %c0_74 = arith.constant 0 : index
      %232 = vector.load %arg7[%c0_73, %c0_74] : memref<8x128xf32, #tpu.memory_space<vmem>>, vector<8x128xf32>
      tpu.vector_store %arg7[%c0_73, %c0_74], %231 {strides = array<i32>} : memref<8x128xf32, #tpu.memory_space<vmem>>, vector<8x128xf32>,
      %c0_i32_75 = arith.constant 0 : i32
      %233 = tpu.memref_slice %arg11[%c0_i32_75] : memref<2x!tpu.dma_semaphore, #tpu.memory_space<semaphore_mem>> -> memref<1x!tpu.dma_semaphore, #tpu.memory_space<semaphore_mem>>
      %234 = tpu.memref_squeeze %233 : memref<1x!tpu.dma_semaphore, #tpu.memory_space<semaphore_mem>> -> memref<!tpu.dma_semaphore, #tpu.memory_space<semaphore_mem>>
      tpu.wait_dma2 semaphore(%234 : memref<!tpu.dma_semaphore, #tpu.memory_space<semaphore_mem>>) src(%arg3 : memref<128x512xbf16, #tpu.memory_space<any>>) dst(%arg9 : memref<128x512xbf16, #tpu.memory_space<vmem>>)
      %c1_i32_76 = arith.constant 1 : i32
      %235 = tpu.memref_slice %arg11[%c1_i32_76] : memref<2x!tpu.dma_semaphore, #tpu.memory_space<semaphore_mem>> -> memref<1x!tpu.dma_semaphore, #tpu.memory_space<semaphore_mem>>
      %236 = tpu.memref_squeeze %235 : memref<1x!tpu.dma_semaphore, #tpu.memory_space<semaphore_mem>> -> memref<!tpu.dma_semaphore, #tpu.memory_space<semaphore_mem>>
      tpu.wait_dma2 semaphore(%236 : memref<!tpu.dma_semaphore, #tpu.memory_space<semaphore_mem>>) src(%arg4 : memref<128x512xbf16, #tpu.memory_space<any>>) dst(%arg10 : memref<128x512xbf16, #tpu.memory_space<vmem>>)
    } else {
    }
    %c0 = arith.constant 0 : index
    %c0_1 = arith.constant 0 : index
    %3 = vector.load %arg1[%c0, %c0_1] : memref<64x128xf32, #tpu.memory_space<vmem>>, vector<64x128xf32>
    %c0_2 = arith.constant 0 : index
    %c0_3 = arith.constant 0 : index
    %4 = vector.load %arg9[%c0_2, %c0_3] : memref<128x512xbf16, #tpu.memory_space<vmem>>, vector<128x512xbf16>
    %5 = arith.extf %4 : vector<128x512xbf16> to vector<128x512xf32>
    %cst = arith.constant dense<0.000000e+00> : vector<64x512xf32>
    %6 = tpu.matmul %3, %5, %cst {dimension_numbers = #tpu.dot_dimension_numbers<[1], [0], [0], [1], [0, 0, 1, 1], [], []>} : vector<64x128xf32>, vector<128x512xf32>, vector<64x512xf32> -> vector<64x512xf32>
    %c0_4 = arith.constant 0 : index
    %c0_5 = arith.constant 0 : index
    %7 = vector.load %arg2[%c0_4, %c0_5] : memref<1x512xf32, #tpu.memory_space<vmem>>, vector<1x512xf32>
    %8 = vector.broadcast %7 : vector<1x512xf32> to vector<64x512xf32>
    %9 = arith.addf %6, %8 : vector<64x512xf32>
    %c0_6 = arith.constant 0 : index
    %c0_7 = arith.constant 0 : index
    %10 = vector.load %arg8[%c0_6, %c0_7] : memref<64x512xf32, #tpu.memory_space<vmem>>, vector<64x512xf32>
    tpu.vector_store %arg8[%c0_6, %c0_7], %9 {strides = array<i32>} : memref<64x512xf32, #tpu.memory_space<vmem>>, vector<64x512xf32>,
    %c0_8 = arith.constant 0 : index
    %c0_9 = arith.constant 0 : index
    %11 = vector.load %arg10[%c0_8, %c0_9] : memref<128x512xbf16, #tpu.memory_space<vmem>>, vector<128x512xbf16>
    %12 = arith.extf %11 : vector<128x512xbf16> to vector<128x512xf32>
    %c0_10 = arith.constant 0 : index
    %c0_11 = arith.constant 0 : index
    %13 = vector.load %arg6[%c0_10, %c0_11] : memref<8x128xf32, #tpu.memory_space<vmem>>, vector<8x128xf32>
    %c0_12 = arith.constant 0 : index
    %c0_13 = arith.constant 0 : index
    %14 = vector.load %arg7[%c0_12, %c0_13] : memref<8x128xf32, #tpu.memory_space<vmem>>, vector<8x128xf32>
    %c0_i32_14 = arith.constant 0 : i32
    %c8_i32 = arith.constant 8 : i32
    %15 = arith.muli %c0_i32_14, %c8_i32 : i32
    %16 = tpu.assume_multiple %15, 8 : i32
    %17 = arith.index_cast %16 : i32 to index
    %c0_15 = arith.constant 0 : index
    %18 = vector.load %arg8[%17, %c0_15] : memref<64x512xf32, #tpu.memory_space<vmem>>, vector<8x512xf32>
    %cst_16 = arith.constant dense<0.000000e+00> : vector<8x512xf32>
    %19 = tpu.matmul %13, %12, %cst_16 {dimension_numbers = #tpu.dot_dimension_numbers<[1], [0], [0], [1], [0, 0, 1, 1], [], []>} : vector<8x128xf32>, vector<128x512xf32>, vector<8x512xf32> -> vector<8x512xf32>
    %20 = arith.addf %18, %19 : vector<8x512xf32>
    %21 = vector.extract_strided_slice %20 {offsets = [0, 0], sizes = [8, 384], strides = [1, 1]} : vector<8x512xf32> to vector<8x384xf32>
    %22 = arith.negf %21 : vector<8x384xf32>
    %23 = math.exp %22 : vector<8x384xf32>
    %cst_17 = arith.constant 1.000000e+00 : f32
    %24 = vector.broadcast %cst_17 : f32 to vector<8x384xf32>
    %25 = arith.addf %24, %23 : vector<8x384xf32>
    %26 = arith.divf %24, %25 : vector<8x384xf32>
    %27 = vector.extract_strided_slice %20 {offsets = [0, 384], sizes = [8, 128], strides = [1, 1]} : vector<8x512xf32> to vector<8x128xf32>
    %28 = math.tanh %27 : vector<8x128xf32>
    %29 = vector.extract_strided_slice %26 {offsets = [0, 0], sizes = [8, 128], strides = [1, 1]} : vector<8x384xf32> to vector<8x128xf32>
    %30 = vector.extract_strided_slice %26 {offsets = [0, 128], sizes = [8, 128], strides = [1, 1]} : vector<8x384xf32> to vector<8x128xf32>
    %31 = vector.extract_strided_slice %26 {offsets = [0, 256], sizes = [8, 128], strides = [1, 1]} : vector<8x384xf32> to vector<8x128xf32>
    %32 = arith.mulf %30, %14 : vector<8x128xf32>
    %33 = arith.mulf %29, %28 : vector<8x128xf32>
    %34 = arith.addf %32, %33 : vector<8x128xf32>
    %35 = math.tanh %34 : vector<8x128xf32>
    %36 = arith.mulf %31, %35 : vector<8x128xf32>
    %37 = arith.index_cast %c0_i32_14 : i32 to index
    %c0_18 = arith.constant 0 : index
    %c0_19 = arith.constant 0 : index
    %38 = vector.load %arg5[%37, %c0_18, %c0_19] : memref<8x8x128xf32, #tpu.memory_space<vmem>>, vector<1x8x128xf32>
    %39 = vector.shape_cast %38 : vector<1x8x128xf32> to vector<8x128xf32>
    %40 = vector.shape_cast %36 : vector<8x128xf32> to vector<1x8x128xf32>
    tpu.vector_store %arg5[%37, %c0_18, %c0_19], %40 {strides = array<i32>} : memref<8x8x128xf32, #tpu.memory_space<vmem>>, vector<1x8x128xf32>,
    %c1_i32 = arith.constant 1 : i32
    %c8_i32_20 = arith.constant 8 : i32
    %41 = arith.muli %c1_i32, %c8_i32_20 : i32
    %42 = tpu.assume_multiple %41, 8 : i32
    %43 = arith.index_cast %42 : i32 to index
    %c0_21 = arith.constant 0 : index
    %44 = vector.load %arg8[%43, %c0_21] : memref<64x512xf32, #tpu.memory_space<vmem>>, vector<8x512xf32>
    %cst_22 = arith.constant dense<0.000000e+00> : vector<8x512xf32>
    %45 = tpu.matmul %36, %12, %cst_22 {dimension_numbers = #tpu.dot_dimension_numbers<[1], [0], [0], [1], [0, 0, 1, 1], [], []>} : vector<8x128xf32>, vector<128x512xf32>, vector<8x512xf32> -> vector<8x512xf32>
    %46 = arith.addf %44, %45 : vector<8x512xf32>
    %47 = vector.extract_strided_slice %46 {offsets = [0, 0], sizes = [8, 384], strides = [1, 1]} : vector<8x512xf32> to vector<8x384xf32>
    %48 = arith.negf %47 : vector<8x384xf32>
    %49 = math.exp %48 : vector<8x384xf32>
    %cst_23 = arith.constant 1.000000e+00 : f32
    %50 = vector.broadcast %cst_23 : f32 to vector<8x384xf32>
    %51 = arith.addf %50, %49 : vector<8x384xf32>
    %52 = arith.divf %50, %51 : vector<8x384xf32>
    %53 = vector.extract_strided_slice %46 {offsets = [0, 384], sizes = [8, 128], strides = [1, 1]} : vector<8x512xf32> to vector<8x128xf32>
    %54 = math.tanh %53 : vector<8x128xf32>
    %55 = vector.extract_strided_slice %52 {offsets = [0, 0], sizes = [8, 128], strides = [1, 1]} : vector<8x384xf32> to vector<8x128xf32>
    %56 = vector.extract_strided_slice %52 {offsets = [0, 128], sizes = [8, 128], strides = [1, 1]} : vector<8x384xf32> to vector<8x128xf32>
    %57 = vector.extract_strided_slice %52 {offsets = [0, 256], sizes = [8, 128], strides = [1, 1]} : vector<8x384xf32> to vector<8x128xf32>
    %58 = arith.mulf %56, %34 : vector<8x128xf32>
    %59 = arith.mulf %55, %54 : vector<8x128xf32>
    %60 = arith.addf %58, %59 : vector<8x128xf32>
    %61 = math.tanh %60 : vector<8x128xf32>
    %62 = arith.mulf %57, %61 : vector<8x128xf32>
    %63 = arith.index_cast %c1_i32 : i32 to index
    %c0_24 = arith.constant 0 : index
    %c0_25 = arith.constant 0 : index
    %64 = vector.load %arg5[%63, %c0_24, %c0_25] : memref<8x8x128xf32, #tpu.memory_space<vmem>>, vector<1x8x128xf32>
    %65 = vector.shape_cast %64 : vector<1x8x128xf32> to vector<8x128xf32>
    %66 = vector.shape_cast %62 : vector<8x128xf32> to vector<1x8x128xf32>
    tpu.vector_store %arg5[%63, %c0_24, %c0_25], %66 {strides = array<i32>} : memref<8x8x128xf32, #tpu.memory_space<vmem>>, vector<1x8x128xf32>,
    %c2_i32 = arith.constant 2 : i32
    %c8_i32_26 = arith.constant 8 : i32
    %67 = arith.muli %c2_i32, %c8_i32_26 : i32
    %68 = tpu.assume_multiple %67, 8 : i32
    %69 = arith.index_cast %68 : i32 to index
    %c0_27 = arith.constant 0 : index
    %70 = vector.load %arg8[%69, %c0_27] : memref<64x512xf32, #tpu.memory_space<vmem>>, vector<8x512xf32>
    %cst_28 = arith.constant dense<0.000000e+00> : vector<8x512xf32>
    %71 = tpu.matmul %62, %12, %cst_28 {dimension_numbers = #tpu.dot_dimension_numbers<[1], [0], [0], [1], [0, 0, 1, 1], [], []>} : vector<8x128xf32>, vector<128x512xf32>, vector<8x512xf32> -> vector<8x512xf32>
    %72 = arith.addf %70, %71 : vector<8x512xf32>
    %73 = vector.extract_strided_slice %72 {offsets = [0, 0], sizes = [8, 384], strides = [1, 1]} : vector<8x512xf32> to vector<8x384xf32>
    %74 = arith.negf %73 : vector<8x384xf32>
    %75 = math.exp %74 : vector<8x384xf32>
    %cst_29 = arith.constant 1.000000e+00 : f32
    %76 = vector.broadcast %cst_29 : f32 to vector<8x384xf32>
    %77 = arith.addf %76, %75 : vector<8x384xf32>
    %78 = arith.divf %76, %77 : vector<8x384xf32>
    %79 = vector.extract_strided_slice %72 {offsets = [0, 384], sizes = [8, 128], strides = [1, 1]} : vector<8x512xf32> to vector<8x128xf32>
    %80 = math.tanh %79 : vector<8x128xf32>
    %81 = vector.extract_strided_slice %78 {offsets = [0, 0], sizes = [8, 128], strides = [1, 1]} : vector<8x384xf32> to vector<8x128xf32>
    %82 = vector.extract_strided_slice %78 {offsets = [0, 128], sizes = [8, 128], strides = [1, 1]} : vector<8x384xf32> to vector<8x128xf32>
    %83 = vector.extract_strided_slice %78 {offsets = [0, 256], sizes = [8, 128], strides = [1, 1]} : vector<8x384xf32> to vector<8x128xf32>
    %84 = arith.mulf %82, %60 : vector<8x128xf32>
    %85 = arith.mulf %81, %80 : vector<8x128xf32>
    %86 = arith.addf %84, %85 : vector<8x128xf32>
    %87 = math.tanh %86 : vector<8x128xf32>
    %88 = arith.mulf %83, %87 : vector<8x128xf32>
    %89 = arith.index_cast %c2_i32 : i32 to index
    %c0_30 = arith.constant 0 : index
    %c0_31 = arith.constant 0 : index
    %90 = vector.load %arg5[%89, %c0_30, %c0_31] : memref<8x8x128xf32, #tpu.memory_space<vmem>>, vector<1x8x128xf32>
    %91 = vector.shape_cast %90 : vector<1x8x128xf32> to vector<8x128xf32>
    %92 = vector.shape_cast %88 : vector<8x128xf32> to vector<1x8x128xf32>
    tpu.vector_store %arg5[%89, %c0_30, %c0_31], %92 {strides = array<i32>} : memref<8x8x128xf32, #tpu.memory_space<vmem>>, vector<1x8x128xf32>,
    %c3_i32 = arith.constant 3 : i32
    %c8_i32_32 = arith.constant 8 : i32
    %93 = arith.muli %c3_i32, %c8_i32_32 : i32
    %94 = tpu.assume_multiple %93, 8 : i32
    %95 = arith.index_cast %94 : i32 to index
    %c0_33 = arith.constant 0 : index
    %96 = vector.load %arg8[%95, %c0_33] : memref<64x512xf32, #tpu.memory_space<vmem>>, vector<8x512xf32>
    %cst_34 = arith.constant dense<0.000000e+00> : vector<8x512xf32>
    %97 = tpu.matmul %88, %12, %cst_34 {dimension_numbers = #tpu.dot_dimension_numbers<[1], [0], [0], [1], [0, 0, 1, 1], [], []>} : vector<8x128xf32>, vector<128x512xf32>, vector<8x512xf32> -> vector<8x512xf32>
    %98 = arith.addf %96, %97 : vector<8x512xf32>
    %99 = vector.extract_strided_slice %98 {offsets = [0, 0], sizes = [8, 384], strides = [1, 1]} : vector<8x512xf32> to vector<8x384xf32>
    %100 = arith.negf %99 : vector<8x384xf32>
    %101 = math.exp %100 : vector<8x384xf32>
    %cst_35 = arith.constant 1.000000e+00 : f32
    %102 = vector.broadcast %cst_35 : f32 to vector<8x384xf32>
    %103 = arith.addf %102, %101 : vector<8x384xf32>
    %104 = arith.divf %102, %103 : vector<8x384xf32>
    %105 = vector.extract_strided_slice %98 {offsets = [0, 384], sizes = [8, 128], strides = [1, 1]} : vector<8x512xf32> to vector<8x128xf32>
    %106 = math.tanh %105 : vector<8x128xf32>
    %107 = vector.extract_strided_slice %104 {offsets = [0, 0], sizes = [8, 128], strides = [1, 1]} : vector<8x384xf32> to vector<8x128xf32>
    %108 = vector.extract_strided_slice %104 {offsets = [0, 128], sizes = [8, 128], strides = [1, 1]} : vector<8x384xf32> to vector<8x128xf32>
    %109 = vector.extract_strided_slice %104 {offsets = [0, 256], sizes = [8, 128], strides = [1, 1]} : vector<8x384xf32> to vector<8x128xf32>
    %110 = arith.mulf %108, %86 : vector<8x128xf32>
    %111 = arith.mulf %107, %106 : vector<8x128xf32>
    %112 = arith.addf %110, %111 : vector<8x128xf32>
    %113 = math.tanh %112 : vector<8x128xf32>
    %114 = arith.mulf %109, %113 : vector<8x128xf32>
    %115 = arith.index_cast %c3_i32 : i32 to index
    %c0_36 = arith.constant 0 : index
    %c0_37 = arith.constant 0 : index
    %116 = vector.load %arg5[%115, %c0_36, %c0_37] : memref<8x8x128xf32, #tpu.memory_space<vmem>>, vector<1x8x128xf32>
    %117 = vector.shape_cast %116 : vector<1x8x128xf32> to vector<8x128xf32>
    %118 = vector.shape_cast %114 : vector<8x128xf32> to vector<1x8x128xf32>
    tpu.vector_store %arg5[%115, %c0_36, %c0_37], %118 {strides = array<i32>} : memref<8x8x128xf32, #tpu.memory_space<vmem>>, vector<1x8x128xf32>,
    %c4_i32 = arith.constant 4 : i32
    %c8_i32_38 = arith.constant 8 : i32
    %119 = arith.muli %c4_i32, %c8_i32_38 : i32
    %120 = tpu.assume_multiple %119, 8 : i32
    %121 = arith.index_cast %120 : i32 to index
    %c0_39 = arith.constant 0 : index
    %122 = vector.load %arg8[%121, %c0_39] : memref<64x512xf32, #tpu.memory_space<vmem>>, vector<8x512xf32>
    %cst_40 = arith.constant dense<0.000000e+00> : vector<8x512xf32>
    %123 = tpu.matmul %114, %12, %cst_40 {dimension_numbers = #tpu.dot_dimension_numbers<[1], [0], [0], [1], [0, 0, 1, 1], [], []>} : vector<8x128xf32>, vector<128x512xf32>, vector<8x512xf32> -> vector<8x512xf32>
    %124 = arith.addf %122, %123 : vector<8x512xf32>
    %125 = vector.extract_strided_slice %124 {offsets = [0, 0], sizes = [8, 384], strides = [1, 1]} : vector<8x512xf32> to vector<8x384xf32>
    %126 = arith.negf %125 : vector<8x384xf32>
    %127 = math.exp %126 : vector<8x384xf32>
    %cst_41 = arith.constant 1.000000e+00 : f32
    %128 = vector.broadcast %cst_41 : f32 to vector<8x384xf32>
    %129 = arith.addf %128, %127 : vector<8x384xf32>
    %130 = arith.divf %128, %129 : vector<8x384xf32>
    %131 = vector.extract_strided_slice %124 {offsets = [0, 384], sizes = [8, 128], strides = [1, 1]} : vector<8x512xf32> to vector<8x128xf32>
    %132 = math.tanh %131 : vector<8x128xf32>
    %133 = vector.extract_strided_slice %130 {offsets = [0, 0], sizes = [8, 128], strides = [1, 1]} : vector<8x384xf32> to vector<8x128xf32>
    %134 = vector.extract_strided_slice %130 {offsets = [0, 128], sizes = [8, 128], strides = [1, 1]} : vector<8x384xf32> to vector<8x128xf32>
    %135 = vector.extract_strided_slice %130 {offsets = [0, 256], sizes = [8, 128], strides = [1, 1]} : vector<8x384xf32> to vector<8x128xf32>
    %136 = arith.mulf %134, %112 : vector<8x128xf32>
    %137 = arith.mulf %133, %132 : vector<8x128xf32>
    %138 = arith.addf %136, %137 : vector<8x128xf32>
    %139 = math.tanh %138 : vector<8x128xf32>
    %140 = arith.mulf %135, %139 : vector<8x128xf32>
    %141 = arith.index_cast %c4_i32 : i32 to index
    %c0_42 = arith.constant 0 : index
    %c0_43 = arith.constant 0 : index
    %142 = vector.load %arg5[%141, %c0_42, %c0_43] : memref<8x8x128xf32, #tpu.memory_space<vmem>>, vector<1x8x128xf32>
    %143 = vector.shape_cast %142 : vector<1x8x128xf32> to vector<8x128xf32>
    %144 = vector.shape_cast %140 : vector<8x128xf32> to vector<1x8x128xf32>
    tpu.vector_store %arg5[%141, %c0_42, %c0_43], %144 {strides = array<i32>} : memref<8x8x128xf32, #tpu.memory_space<vmem>>, vector<1x8x128xf32>,
    %c5_i32 = arith.constant 5 : i32
    %c8_i32_44 = arith.constant 8 : i32
    %145 = arith.muli %c5_i32, %c8_i32_44 : i32
    %146 = tpu.assume_multiple %145, 8 : i32
    %147 = arith.index_cast %146 : i32 to index
    %c0_45 = arith.constant 0 : index
    %148 = vector.load %arg8[%147, %c0_45] : memref<64x512xf32, #tpu.memory_space<vmem>>, vector<8x512xf32>
    %cst_46 = arith.constant dense<0.000000e+00> : vector<8x512xf32>
    %149 = tpu.matmul %140, %12, %cst_46 {dimension_numbers = #tpu.dot_dimension_numbers<[1], [0], [0], [1], [0, 0, 1, 1], [], []>} : vector<8x128xf32>, vector<128x512xf32>, vector<8x512xf32> -> vector<8x512xf32>
    %150 = arith.addf %148, %149 : vector<8x512xf32>
    %151 = vector.extract_strided_slice %150 {offsets = [0, 0], sizes = [8, 384], strides = [1, 1]} : vector<8x512xf32> to vector<8x384xf32>
    %152 = arith.negf %151 : vector<8x384xf32>
    %153 = math.exp %152 : vector<8x384xf32>
    %cst_47 = arith.constant 1.000000e+00 : f32
    %154 = vector.broadcast %cst_47 : f32 to vector<8x384xf32>
    %155 = arith.addf %154, %153 : vector<8x384xf32>
    %156 = arith.divf %154, %155 : vector<8x384xf32>
    %157 = vector.extract_strided_slice %150 {offsets = [0, 384], sizes = [8, 128], strides = [1, 1]} : vector<8x512xf32> to vector<8x128xf32>
    %158 = math.tanh %157 : vector<8x128xf32>
    %159 = vector.extract_strided_slice %156 {offsets = [0, 0], sizes = [8, 128], strides = [1, 1]} : vector<8x384xf32> to vector<8x128xf32>
    %160 = vector.extract_strided_slice %156 {offsets = [0, 128], sizes = [8, 128], strides = [1, 1]} : vector<8x384xf32> to vector<8x128xf32>
    %161 = vector.extract_strided_slice %156 {offsets = [0, 256], sizes = [8, 128], strides = [1, 1]} : vector<8x384xf32> to vector<8x128xf32>
    %162 = arith.mulf %160, %138 : vector<8x128xf32>
    %163 = arith.mulf %159, %158 : vector<8x128xf32>
    %164 = arith.addf %162, %163 : vector<8x128xf32>
    %165 = math.tanh %164 : vector<8x128xf32>
    %166 = arith.mulf %161, %165 : vector<8x128xf32>
    %167 = arith.index_cast %c5_i32 : i32 to index
    %c0_48 = arith.constant 0 : index
    %c0_49 = arith.constant 0 : index
    %168 = vector.load %arg5[%167, %c0_48, %c0_49] : memref<8x8x128xf32, #tpu.memory_space<vmem>>, vector<1x8x128xf32>
    %169 = vector.shape_cast %168 : vector<1x8x128xf32> to vector<8x128xf32>
    %170 = vector.shape_cast %166 : vector<8x128xf32> to vector<1x8x128xf32>
    tpu.vector_store %arg5[%167, %c0_48, %c0_49], %170 {strides = array<i32>} : memref<8x8x128xf32, #tpu.memory_space<vmem>>, vector<1x8x128xf32>,
    %c6_i32 = arith.constant 6 : i32
    %c8_i32_50 = arith.constant 8 : i32
    %171 = arith.muli %c6_i32, %c8_i32_50 : i32
    %172 = tpu.assume_multiple %171, 8 : i32
    %173 = arith.index_cast %172 : i32 to index
    %c0_51 = arith.constant 0 : index
    %174 = vector.load %arg8[%173, %c0_51] : memref<64x512xf32, #tpu.memory_space<vmem>>, vector<8x512xf32>
    %cst_52 = arith.constant dense<0.000000e+00> : vector<8x512xf32>
    %175 = tpu.matmul %166, %12, %cst_52 {dimension_numbers = #tpu.dot_dimension_numbers<[1], [0], [0], [1], [0, 0, 1, 1], [], []>} : vector<8x128xf32>, vector<128x512xf32>, vector<8x512xf32> -> vector<8x512xf32>
    %176 = arith.addf %174, %175 : vector<8x512xf32>
    %177 = vector.extract_strided_slice %176 {offsets = [0, 0], sizes = [8, 384], strides = [1, 1]} : vector<8x512xf32> to vector<8x384xf32>
    %178 = arith.negf %177 : vector<8x384xf32>
    %179 = math.exp %178 : vector<8x384xf32>
    %cst_53 = arith.constant 1.000000e+00 : f32
    %180 = vector.broadcast %cst_53 : f32 to vector<8x384xf32>
    %181 = arith.addf %180, %179 : vector<8x384xf32>
    %182 = arith.divf %180, %181 : vector<8x384xf32>
    %183 = vector.extract_strided_slice %176 {offsets = [0, 384], sizes = [8, 128], strides = [1, 1]} : vector<8x512xf32> to vector<8x128xf32>
    %184 = math.tanh %183 : vector<8x128xf32>
    %185 = vector.extract_strided_slice %182 {offsets = [0, 0], sizes = [8, 128], strides = [1, 1]} : vector<8x384xf32> to vector<8x128xf32>
    %186 = vector.extract_strided_slice %182 {offsets = [0, 128], sizes = [8, 128], strides = [1, 1]} : vector<8x384xf32> to vector<8x128xf32>
    %187 = vector.extract_strided_slice %182 {offsets = [0, 256], sizes = [8, 128], strides = [1, 1]} : vector<8x384xf32> to vector<8x128xf32>
    %188 = arith.mulf %186, %164 : vector<8x128xf32>
    %189 = arith.mulf %185, %184 : vector<8x128xf32>
    %190 = arith.addf %188, %189 : vector<8x128xf32>
    %191 = math.tanh %190 : vector<8x128xf32>
    %192 = arith.mulf %187, %191 : vector<8x128xf32>
    %193 = arith.index_cast %c6_i32 : i32 to index
    %c0_54 = arith.constant 0 : index
    %c0_55 = arith.constant 0 : index
    %194 = vector.load %arg5[%193, %c0_54, %c0_55] : memref<8x8x128xf32, #tpu.memory_space<vmem>>, vector<1x8x128xf32>
    %195 = vector.shape_cast %194 : vector<1x8x128xf32> to vector<8x128xf32>
    %196 = vector.shape_cast %192 : vector<8x128xf32> to vector<1x8x128xf32>
    tpu.vector_store %arg5[%193, %c0_54, %c0_55], %196 {strides = array<i32>} : memref<8x8x128xf32, #tpu.memory_space<vmem>>, vector<1x8x128xf32>,
    %c7_i32 = arith.constant 7 : i32
    %c8_i32_56 = arith.constant 8 : i32
    %197 = arith.muli %c7_i32, %c8_i32_56 : i32
    %198 = tpu.assume_multiple %197, 8 : i32
    %199 = arith.index_cast %198 : i32 to index
    %c0_57 = arith.constant 0 : index
    %200 = vector.load %arg8[%199, %c0_57] : memref<64x512xf32, #tpu.memory_space<vmem>>, vector<8x512xf32>
    %cst_58 = arith.constant dense<0.000000e+00> : vector<8x512xf32>
    %201 = tpu.matmul %192, %12, %cst_58 {dimension_numbers = #tpu.dot_dimension_numbers<[1], [0], [0], [1], [0, 0, 1, 1], [], []>} : vector<8x128xf32>, vector<128x512xf32>, vector<8x512xf32> -> vector<8x512xf32>
    %202 = arith.addf %200, %201 : vector<8x512xf32>
    %203 = vector.extract_strided_slice %202 {offsets = [0, 0], sizes = [8, 384], strides = [1, 1]} : vector<8x512xf32> to vector<8x384xf32>
    %204 = arith.negf %203 : vector<8x384xf32>
    %205 = math.exp %204 : vector<8x384xf32>
    %cst_59 = arith.constant 1.000000e+00 : f32
    %206 = vector.broadcast %cst_59 : f32 to vector<8x384xf32>
    %207 = arith.addf %206, %205 : vector<8x384xf32>
    %208 = arith.divf %206, %207 : vector<8x384xf32>
    %209 = vector.extract_strided_slice %202 {offsets = [0, 384], sizes = [8, 128], strides = [1, 1]} : vector<8x512xf32> to vector<8x128xf32>
    %210 = math.tanh %209 : vector<8x128xf32>
    %211 = vector.extract_strided_slice %208 {offsets = [0, 0], sizes = [8, 128], strides = [1, 1]} : vector<8x384xf32> to vector<8x128xf32>
    %212 = vector.extract_strided_slice %208 {offsets = [0, 128], sizes = [8, 128], strides = [1, 1]} : vector<8x384xf32> to vector<8x128xf32>
    %213 = vector.extract_strided_slice %208 {offsets = [0, 256], sizes = [8, 128], strides = [1, 1]} : vector<8x384xf32> to vector<8x128xf32>
    %214 = arith.mulf %212, %190 : vector<8x128xf32>
    %215 = arith.mulf %211, %210 : vector<8x128xf32>
    %216 = arith.addf %214, %215 : vector<8x128xf32>
    %217 = math.tanh %216 : vector<8x128xf32>
    %218 = arith.mulf %213, %217 : vector<8x128xf32>
    %219 = arith.index_cast %c7_i32 : i32 to index
    %c0_60 = arith.constant 0 : index
    %c0_61 = arith.constant 0 : index
    %220 = vector.load %arg5[%219, %c0_60, %c0_61] : memref<8x8x128xf32, #tpu.memory_space<vmem>>, vector<1x8x128xf32>
    %221 = vector.shape_cast %220 : vector<1x8x128xf32> to vector<8x128xf32>
    %222 = vector.shape_cast %218 : vector<8x128xf32> to vector<1x8x128xf32>
    tpu.vector_store %arg5[%219, %c0_60, %c0_61], %222 {strides = array<i32>} : memref<8x8x128xf32, #tpu.memory_space<vmem>>, vector<1x8x128xf32>,
    %c8_i32_62 = arith.constant 8 : i32
    %c0_63 = arith.constant 0 : index
    %c0_64 = arith.constant 0 : index
    %223 = vector.load %arg6[%c0_63, %c0_64] : memref<8x128xf32, #tpu.memory_space<vmem>>, vector<8x128xf32>
    tpu.vector_store %arg6[%c0_63, %c0_64], %218 {strides = array<i32>} : memref<8x128xf32, #tpu.memory_space<vmem>>, vector<8x128xf32>,
    %c0_65 = arith.constant 0 : index
    %c0_66 = arith.constant 0 : index
    %224 = vector.load %arg7[%c0_65, %c0_66] : memref<8x128xf32, #tpu.memory_space<vmem>>, vector<8x128xf32>
    tpu.vector_store %arg7[%c0_65, %c0_66], %216 {strides = array<i32>} : memref<8x128xf32, #tpu.memory_space<vmem>>, vector<8x128xf32>,
    return
  }
  func.func @transform_0(%arg0: i32) -> (i32, i32) {
    %c0_i32 = arith.constant 0 : i32
    %c0_i32_0 = arith.constant 0 : i32
    return %arg0, %c0_i32 : i32, i32
  }
  func.func @transform_1(%arg0: i32) -> (i32, i32) {
    %c0_i32 = arith.constant 0 : i32
    %c0_i32_0 = arith.constant 0 : i32
    %c0_i32_1 = arith.constant 0 : i32
    return %c0_i32, %c0_i32_0 : i32, i32
  }
  func.func @transform_4(%arg0: i32) -> (i32, i32, i32) {
    %c0_i32 = arith.constant 0 : i32
    %c0_i32_0 = arith.constant 0 : i32
    %c0_i32_1 = arith.constant 0 : i32
    return %arg0, %c0_i32, %c0_i32_0 : i32, i32, i32
  }
}

</mosaic_0001>

<bundles_post_ra>
// kernel: rnn_model_forward.2
= control target key start
LH: loop header
LB: loop body
LE: loop exit
PB: predicated region body
PF: predicated region fallthrough
CT: control target
= control target key end

     0   :  { %s2283_s15 = smov 0   ;;  %s3293_s0 = inlined_call_operand.vmem [shape: f32[128,128], index: 0, kind: input, shape index: {}]   ;;  %s3294_s1 = inlined_call_operand.vmem [shape: f32[1,512], index: 1, kind: input, shape index: {}]   ;;  %s3295_s2 = inlined_call_operand.vmem [shape: bf16[128,512], index: 2, kind: input, shape index: {}]   ;;  %s3296_s3 = inlined_call_operand.vmem [shape: bf16[128,512], index: 3, kind: input, shape index: {}]   ;;  %s3297_s4 = inlined_call_operand.vmem [shape: f32[16,8,128], index: 4, kind: output, shape index: {}]  }
   0x1 LB: > { %s2063_s16 = sadd.s32 4294967295, %s2255_s15   ;;  %p2067_p0 = scmp.ge.s32.totalorder %s2255_s15, 1  ;;  %s2255_s15 = sphi %s2283_s15, %s14_s15  }
   0x2   : > { %p115_p1 = scmp.lt.s32.totalorder %s2255_s15, 3 }
   0x4   : > { %p116_p2 = pnand %p2067_p0, %p115_p1 }
   0x6   : > { %119 = sbr.rel (%p116_p2) target bundleno = 1552 (0x610), region = 28 }
   0xb   : > { %s2068_s17 = sshll.u32 %s2063_s16, 3  ;;  %p2072_p4 = scmp.ne.s32.totalorder %s2063_s16, 0 }
   0xc   : > { %p138_p3 = scmp.lt.s32.totalorder %s2068_s17, 15 }
   0xd   : > { %152 = sbr.rel (%p2072_p4) target bundleno = 91 (0x5b), region = 32 }
   0xe   : > { %s3569_s17 = smov (!%p138_p3, %s2068_s17), 15 }
   0xf   : > { %s2069_s18 = sshll.u32 %s3569_s17, 3 }
  0x10   : > { %s2294_s21 = scalar_lea.vmem %s3293_s0, %s2069_s18  ;;  %s2299_s24 = scalar_lea.vmem %s3297_s4, %s2069_s18 }
  0x12   : > { %v163_v0 = vld [vmem:[%s3295_s2] sm:$0xff]  ;;  %v165_v1 = vld [vmem:[%s3295_s2 + $0x8] sm:$0xff]  ;;  %v167_v2 = vld [vmem:[%s3295_s2 + $0x10] sm:$0xff] }
  0x13   : > { %164 = vst [vmem:[#allocation5 + $0xb0] sm:$0xff] %v163_v0  ;;  %v169_v3 = vld [vmem:[%s3295_s2 + $0x18] sm:$0xff]  ;;  %v171_v4 = vld [vmem:[%s3295_s2 + $0x20] sm:$0xff]  ;;  %v173_v5 = vld [vmem:[%s3295_s2 + $0x28] sm:$0xff] }
  0x14   : > { %166 = vst [vmem:[#allocation5] sm:$0xff] %v165_v1  ;;  %v175_v6 = vld [vmem:[%s3295_s2 + $0x30] sm:$0xff]  ;;  %v177_v7 = vld [vmem:[%s3295_s2 + $0x38] sm:$0xff]  ;;  %v179_v8 = vld [vmem:[%s3295_s2 + $0x40] sm:$0xff] }
  0x15   : > { %168 = vst [vmem:[#allocation5 + $0xd8] sm:$0xff] %v167_v2  ;;  %v181_v9 = vld [vmem:[%s3295_s2 + $0x48] sm:$0xff]  ;;  %v183_v10 = vld [vmem:[%s3295_s2 + $0x50] sm:$0xff]  ;;  %v185_v11 = vld [vmem:[%s3295_s2 + $0x58] sm:$0xff] }
  0x16   : > { %170 = vst [vmem:[#allocation5 + $0x18] sm:$0xff] %v169_v3  ;;  %v187_v12 = vld [vmem:[%s3295_s2 + $0x60] sm:$0xff]  ;;  %v189_v13 = vld [vmem:[%s3295_s2 + $0x68] sm:$0xff]  ;;  %v191_v14 = vld [vmem:[%s3295_s2 + $0x70] sm:$0xff] }
  0x17   : > { %172 = vst [vmem:[#allocation5 + $0x50] sm:$0xff] %v171_v4  ;;  %v193_v15 = vld [vmem:[%s3295_s2 + $0x78] sm:$0xff]  ;;  %v195_v16 = vld [vmem:[%s3295_s2 + $0x80] sm:$0xff]  ;;  %v197_v17 = vld [vmem:[%s3295_s2 + $0x88] sm:$0xff] }
  0x18   : > { %174 = vst [vmem:[#allocation5 + $0x68] sm:$0xff] %v173_v5  ;;  %v199_v18 = vld [vmem:[%s3295_s2 + $0x90] sm:$0xff]  ;;  %v201_v19 = vld [vmem:[%s3295_s2 + $0x98] sm:$0xff]  ;;  %v203_v20 = vld [vmem:[%s3295_s2 + $0xa0] sm:$0xff] }
  0x19   : > { %176 = vst [vmem:[#allocation5 + $0x30] sm:$0xff] %v175_v6  ;;  %v205_v21 = vld [vmem:[%s3295_s2 + $0xa8] sm:$0xff]  ;;  %v207_v22 = vld [vmem:[%s3295_s2 + $0xb0] sm:$0xff]  ;;  %v209_v23 = vld [vmem:[%s3295_s2 + $0xb8] sm:$0xff] }
  0x1a   : > { %178 = vst [vmem:[#allocation5 + $0x48] sm:$0xff] %v177_v7  ;;  %v211_v24 = vld [vmem:[%s3295_s2 + $0xc0] sm:$0xff]  ;;  %v213_v25 = vld [vmem:[%s3295_s2 + $0xc8] sm:$0xff]  ;;  %v215_v26 = vld [vmem:[%s3295_s2 + $0xd0] sm:$0xff] }
  0x1b   : > { %180 = vst [vmem:[#allocation5 + $0x80] sm:$0xff] %v179_v8  ;;  %v217_v27 = vld [vmem:[%s3295_s2 + $0xd8] sm:$0xff]  ;;  %v219_v28 = vld [vmem:[%s3295_s2 + $0xe0] sm:$0xff]  ;;  %v221_v29 = vld [vmem:[%s3295_s2 + $0xe8] sm:$0xff] }
  0x1c   : > { %182 = vst [vmem:[#allocation5 + $0x88] sm:$0xff] %v181_v9  ;;  %v223_v30 = vld [vmem:[%s3295_s2 + $0xf0] sm:$0xff]  ;;  %v225_v31 = vld [vmem:[%s3295_s2 + $0xf8] sm:$0xff] }
  0x1d   : > { %184 = vst [vmem:[#allocation5 + $0xe8] sm:$0xff] %v183_v10 }
  0x1e   : > { %186 = vst [vmem:[#allocation5 + $0xb8] sm:$0xff] %v185_v11 }
  0x1f   : > { %188 = vst [vmem:[#allocation5 + $0x60] sm:$0xff] %v187_v12 }
  0x20   : > { %190 = vst [vmem:[#allocation5 + $0xf0] sm:$0xff] %v189_v13 }
  0x21   : > { %192 = vst [vmem:[#allocation5 + $0x8] sm:$0xff] %v191_v14 }
  0x22   : > { %194 = vst [vmem:[#allocation5 + $0x78] sm:$0xff] %v193_v15 }
  0x23   : > { %196 = vst [vmem:[#allocation5 + $0x38] sm:$0xff] %v195_v16 }
  0x24   : > { %198 = vst [vmem:[#allocation5 + $0x58] sm:$0xff] %v197_v17 }
  0x25   : > { %200 = vst [vmem:[#allocation5 + $0x40] sm:$0xff] %v199_v18 }
  0x26   : > { %202 = vst [vmem:[#allocation5 + $0xc8] sm:$0xff] %v201_v19 }
  0x27   : > { %204 = vst [vmem:[#allocation5 + $0xe0] sm:$0xff] %v203_v20 }
  0x28   : > { %206 = vst [vmem:[#allocation5 + $0x90] sm:$0xff] %v205_v21 }
  0x29   : > { %208 = vst [vmem:[#allocation5 + $0x70] sm:$0xff] %v207_v22 }
  0x2a   : > { %210 = vst [vmem:[#allocation5 + $0xc0] sm:$0xff] %v209_v23 }
  0x2b   : > { %212 = vst [vmem:[#allocation5 + $0xa8] sm:$0xff] %v211_v24 }
  0x2c   : > { %214 = vst [vmem:[#allocation5 + $0xd0] sm:$0xff] %v213_v25 }
  0x2d   : > { %216 = vst [vmem:[#allocation5 + $0x10] sm:$0xff] %v215_v26 }
  0x2e   : > { %218 = vst [vmem:[#allocation5 + $0x28] sm:$0xff] %v217_v27 }
  0x2f   : > { %220 = vst [vmem:[#allocation5 + $0xa0] sm:$0xff] %v219_v28 }
  0x30   : > { %222 = vst [vmem:[#allocation5 + $0xf8] sm:$0xff] %v221_v29 }
  0x31   : > { %224 = vst [vmem:[#allocation5 + $0x20] sm:$0xff] %v223_v30 }
  0x32   : > { %226 = vst [vmem:[#allocation5 + $0x98] sm:$0xff] %v225_v31 }
  0x33   : > { %232 = vsyncadd [#allocation7], 4096  ;;  %v244_v32 = vld [vmem:[%s3296_s3] sm:$0xff]  ;;  %v246_v33 = vld [vmem:[%s3296_s3 + $0x8] sm:$0xff] }
  0x34   : > { %245 = vst [vmem:[#allocation6 + $0x80] sm:$0xff] %v244_v32  ;;  %v248_v34 = vld [vmem:[%s3296_s3 + $0x10] sm:$0xff]  ;;  %v250_v35 = vld [vmem:[%s3296_s3 + $0x18] sm:$0xff]  ;;  %v252_v36 = vld [vmem:[%s3296_s3 + $0x20] sm:$0xff] }
  0x35   : > { %247 = vst [vmem:[#allocation6 + $0xc8] sm:$0xff] %v246_v33  ;;  %v254_v37 = vld [vmem:[%s3296_s3 + $0x28] sm:$0xff]  ;;  %v256_v38 = vld [vmem:[%s3296_s3 + $0x30] sm:$0xff]  ;;  %v258_v39 = vld [vmem:[%s3296_s3 + $0x38] sm:$0xff] }
  0x36   : > { %249 = vst [vmem:[#allocation6 + $0xe8] sm:$0xff] %v248_v34  ;;  %v260_v40 = vld [vmem:[%s3296_s3 + $0x40] sm:$0xff]  ;;  %v262_v41 = vld [vmem:[%s3296_s3 + $0x48] sm:$0xff]  ;;  %v264_v42 = vld [vmem:[%s3296_s3 + $0x50] sm:$0xff] }
  0x37   : > { %251 = vst [vmem:[#allocation6 + $0x78] sm:$0xff] %v250_v35  ;;  %v266_v43 = vld [vmem:[%s3296_s3 + $0x58] sm:$0xff]  ;;  %v268_v44 = vld [vmem:[%s3296_s3 + $0x60] sm:$0xff]  ;;  %v270_v45 = vld [vmem:[%s3296_s3 + $0x68] sm:$0xff] }
  0x38   : > { %253 = vst [vmem:[#allocation6 + $0x8] sm:$0xff] %v252_v36  ;;  %v272_v46 = vld [vmem:[%s3296_s3 + $0x70] sm:$0xff]  ;;  %v274_v47 = vld [vmem:[%s3296_s3 + $0x78] sm:$0xff]  ;;  %v276_v48 = vld [vmem:[%s3296_s3 + $0x80] sm:$0xff] }
  0x39   : > { %255 = vst [vmem:[#allocation6 + $0x90] sm:$0xff] %v254_v37  ;;  %v278_v49 = vld [vmem:[%s3296_s3 + $0x88] sm:$0xff]  ;;  %v280_v50 = vld [vmem:[%s3296_s3 + $0x90] sm:$0xff]  ;;  %v282_v51 = vld [vmem:[%s3296_s3 + $0x98] sm:$0xff] }
  0x3a   : > { %257 = vst [vmem:[#allocation6 + $0x58] sm:$0xff] %v256_v38  ;;  %v284_v52 = vld [vmem:[%s3296_s3 + $0xa0] sm:$0xff]  ;;  %v286_v53 = vld [vmem:[%s3296_s3 + $0xa8] sm:$0xff]  ;;  %v288_v54 = vld [vmem:[%s3296_s3 + $0xb0] sm:$0xff] }
  0x3b   : > { %259 = vst [vmem:[#allocation6 + $0xa8] sm:$0xff] %v258_v39  ;;  %v290_v55 = vld [vmem:[%s3296_s3 + $0xb8] sm:$0xff]  ;;  %v292_v56 = vld [vmem:[%s3296_s3 + $0xc0] sm:$0xff]  ;;  %v294_v57 = vld [vmem:[%s3296_s3 + $0xc8] sm:$0xff] }
  0x3c   : > { %261 = vst [vmem:[#allocation6 + $0xd0] sm:$0xff] %v260_v40  ;;  %v296_v58 = vld [vmem:[%s3296_s3 + $0xd0] sm:$0xff]  ;;  %v298_v59 = vld [vmem:[%s3296_s3 + $0xd8] sm:$0xff]  ;;  %v300_v60 = vld [vmem:[%s3296_s3 + $0xe0] sm:$0xff] }
  0x3d   : > { %263 = vst [vmem:[#allocation6 + $0xb0] sm:$0xff] %v262_v41  ;;  %v302_v61 = vld [vmem:[%s3296_s3 + $0xe8] sm:$0xff]  ;;  %v304_v62 = vld [vmem:[%s3296_s3 + $0xf0] sm:$0xff]  ;;  %v306_v63 = vld [vmem:[%s3296_s3 + $0xf8] sm:$0xff] }
  0x3e   : > { %265 = vst [vmem:[#allocation6 + $0x38] sm:$0xff] %v264_v42 }
  0x3f   : > { %267 = vst [vmem:[#allocation6 + $0x40] sm:$0xff] %v266_v43 }
  0x40   : > { %269 = vst [vmem:[#allocation6 + $0xe0] sm:$0xff] %v268_v44 }
  0x41   : > { %271 = vst [vmem:[#allocation6 + $0x60] sm:$0xff] %v270_v45 }
  0x42   : > { %273 = vst [vmem:[#allocation6 + $0x18] sm:$0xff] %v272_v46 }
  0x43   : > { %275 = vst [vmem:[#allocation6 + $0x68] sm:$0xff] %v274_v47 }
  0x44   : > { %277 = vst [vmem:[#allocation6 + $0x10] sm:$0xff] %v276_v48 }
  0x45   : > { %279 = vst [vmem:[#allocation6 + $0x70] sm:$0xff] %v278_v49 }
  0x46   : > { %281 = vst [vmem:[#allocation6 + $0x50] sm:$0xff] %v280_v50 }
  0x47   : > { %283 = vst [vmem:[#allocation6 + $0xa0] sm:$0xff] %v282_v51 }
  0x48   : > { %285 = vst [vmem:[#allocation6 + $0xd8] sm:$0xff] %v284_v52 }
  0x49   : > { %287 = vst [vmem:[#allocation6 + $0x30] sm:$0xff] %v286_v53 }
  0x4a   : > { %289 = vst [vmem:[#allocation6 + $0x20] sm:$0xff] %v288_v54 }
  0x4b   : > { %291 = vst [vmem:[#allocation6 + $0xf0] sm:$0xff] %v290_v55 }
  0x4c   : > { %293 = vst [vmem:[#allocation6 + $0x88] sm:$0xff] %v292_v56 }
  0x4d   : > { %295 = vst [vmem:[#allocation6 + $0x48] sm:$0xff] %v294_v57 }
  0x4e   : > { %297 = vst [vmem:[#allocation6 + $0xf8] sm:$0xff] %v296_v58 }
  0x4f   : > { %299 = vst [vmem:[#allocation6 + $0xc0] sm:$0xff] %v298_v59 }
  0x50   : > { %301 = vst [vmem:[#allocation6 + $0xb8] sm:$0xff] %v300_v60 }
  0x51   : > { %303 = vst [vmem:[#allocation6] sm:$0xff] %v302_v61 }
  0x52   : > { %305 = vst [vmem:[#allocation6 + $0x28] sm:$0xff] %v304_v62 }
  0x53   : > { %307 = vst [vmem:[#allocation6 + $0x98] sm:$0xff] %v306_v63 }
  0x54   : > { %313 = vsyncadd [#allocation7 + $0x1], 4096  ;;  %v2257_v0 = vmov 0.0  }
  0x55   : > { %314 = vst [vmem:[#allocation2] sm:$0xff] %v2257_v0 }
  0x56   : > { %315 = vst [vmem:[#allocation3] sm:$0xff] %v2257_v0 }
  0x57   : > { %2249 = dma.done.wait [#allocation7], 4096 }
  0x58   : > { %2250 = vsyncadd [#allocation7], 4294963200 }
  0x59   : > { %2251 = dma.done.wait [#allocation7 + $0x1], 4096 }
  0x5a   : > { %2252 = vsyncadd [#allocation7 + $0x1], 4294963200 }
  0x5b PF: > { %v360_v1 = vld [vmem:[#allocation5 + $0x20] sm:$0xff]  ;;  %v361_v2 = vld [vmem:[#allocation5 + $0x98] sm:$0xff]  ;;  %v356_v9 = vld [vmem:[#allocation5 + $0x10] sm:$0xff] }
  0x5c   : > { %v358_v3 = vld [vmem:[#allocation5 + $0xa0] sm:$0xff]  ;;  %v422_v4 = vunpack.c.l.bf16 %v360_v1  ;;  %v423_v5 = vunpack.c.h.bf16 %v360_v1  ;;  %v424_v6 = vunpack.c.l.bf16 %v361_v2  ;;  %v425_v7 = vunpack.c.h.bf16 %v361_v2  ;;  %v359_v8 = vld [vmem:[#allocation5 + $0xf8] sm:$0xff]  ;;  %v357_v10 = vld [vmem:[#allocation5 + $0x28] sm:$0xff] }
  0x5d   : > { %v418_v11 = vunpack.c.l.bf16 %v358_v3  ;;  %v419_v12 = vunpack.c.h.bf16 %v358_v3  ;;  %v420_v13 = vunpack.c.l.bf16 %v359_v8  ;;  %v421_v14 = vunpack.c.h.bf16 %v359_v8  ;;  %v354_v15 = vld [vmem:[#allocation5 + $0xa8] sm:$0xff]  ;;  %v355_v18 = vld [vmem:[#allocation5 + $0xd0] sm:$0xff]  ;;  %v353_v24 = vld [vmem:[#allocation5 + $0xc0] sm:$0xff] }
  0x5e   : > { %436 = vmatpush.msra.mxu0 %v422_v4  ;;  %477 = vmatpush.msra.mxu1 %v423_v5  ;;  %v414_v16 = vunpack.c.l.bf16 %v356_v9  ;;  %v415_v17 = vunpack.c.h.bf16 %v356_v9  ;;  %v416_v19 = vunpack.c.l.bf16 %v357_v10  ;;  %v417_v20 = vunpack.c.h.bf16 %v357_v10  ;;  %v352_v21 = vld [vmem:[#allocation5 + $0x70] sm:$0xff]  ;;  %v350_v27 = vld [vmem:[#allocation5 + $0xe0] sm:$0xff]  ;;  %v349_v36 = vld [vmem:[#allocation5 + $0xc8] sm:$0xff] }
  0x5f   : > { %518 = vmatpush.msra.mxu2 %v424_v6  ;;  %559 = vmatpush.msra.mxu3 %v425_v7  ;;  %v410_v22 = vunpack.c.l.bf16 %v354_v15  ;;  %v411_v23 = vunpack.c.h.bf16 %v354_v15  ;;  %v412_v25 = vunpack.c.l.bf16 %v355_v18  ;;  %v413_v26 = vunpack.c.h.bf16 %v355_v18  ;;  %v351_v30 = vld [vmem:[#allocation5 + $0x90] sm:$0xff]  ;;  %v348_v33 = vld [vmem:[#allocation5 + $0x40] sm:$0xff]  ;;  %v346_v39 = vld [vmem:[#allocation5 + $0x38] sm:$0xff] }
  0x60   : > { %437 = vmatpush.msra.mxu0 %v418_v11  ;;  %478 = vmatpush.msra.mxu1 %v419_v12  ;;  %v406_v28 = vunpack.c.l.bf16 %v352_v21  ;;  %v407_v29 = vunpack.c.h.bf16 %v352_v21  ;;  %v408_v31 = vunpack.c.l.bf16 %v353_v24  ;;  %v409_v32 = vunpack.c.h.bf16 %v353_v24  ;;  %v347_v42 = vld [vmem:[#allocation5 + $0x58] sm:$0xff]  ;;  %v344_v45 = vld [vmem:[#allocation5 + $0x8] sm:$0xff]  ;;  %v342_v51 = vld [vmem:[#allocation5 + $0x60] sm:$0xff] }
  0x61   : > { %519 = vmatpush.msra.mxu2 %v420_v13  ;;  %560 = vmatpush.msra.mxu3 %v421_v14  ;;  %v402_v34 = vunpack.c.l.bf16 %v350_v27  ;;  %v403_v35 = vunpack.c.h.bf16 %v350_v27  ;;  %v404_v37 = vunpack.c.l.bf16 %v351_v30  ;;  %v405_v38 = vunpack.c.h.bf16 %v351_v30  ;;  %v345_v48 = vld [vmem:[#allocation5 + $0x78] sm:$0xff]  ;;  %v343_v54 = vld [vmem:[#allocation5 + $0xf0] sm:$0xff]  ;;  %v340_v57 = vld [vmem:[#allocation5 + $0xe8] sm:$0xff] }
  0x62   : > { %438 = vmatpush.msra.mxu0 %v414_v16  ;;  %479 = vmatpush.msra.mxu1 %v415_v17  ;;  %v398_v40 = vunpack.c.l.bf16 %v348_v33  ;;  %v399_v41 = vunpack.c.h.bf16 %v348_v33  ;;  %v400_v43 = vunpack.c.l.bf16 %v349_v36  ;;  %v401_v44 = vunpack.c.h.bf16 %v349_v36  ;;  %v341_v60 = vld [vmem:[#allocation5 + $0xb8] sm:$0xff]  ;;  %v338_v63 = vld [vmem:[#allocation5 + $0x80] sm:$0xff]  ;;  %v339_v2 = vld [vmem:[#allocation5 + $0x88] sm:$0xff] }
  0x63   : > { %520 = vmatpush.msra.mxu2 %v416_v19  ;;  %561 = vmatpush.msra.mxu3 %v417_v20  ;;  %v394_v46 = vunpack.c.l.bf16 %v346_v39  ;;  %v395_v47 = vunpack.c.h.bf16 %v346_v39  ;;  %v396_v49 = vunpack.c.l.bf16 %v347_v42  ;;  %v397_v50 = vunpack.c.h.bf16 %v347_v42  ;;  %v336_v5 = vld [vmem:[#allocation5 + $0x30] sm:$0xff]  ;;  %v337_v8 = vld [vmem:[#allocation5 + $0x48] sm:$0xff]  ;;  %v332_v17 = vld [vmem:[#allocation5 + $0xd8] sm:$0xff] }
  0x64   : > { %439 = vmatpush.msra.mxu0 %v410_v22  ;;  %480 = vmatpush.msra.mxu1 %v411_v23  ;;  %v390_v52 = vunpack.c.l.bf16 %v344_v45  ;;  %v391_v53 = vunpack.c.h.bf16 %v344_v45  ;;  %v392_v55 = vunpack.c.l.bf16 %v345_v48  ;;  %v393_v56 = vunpack.c.h.bf16 %v345_v48  ;;  %v334_v11 = vld [vmem:[#allocation5 + $0x50] sm:$0xff]  ;;  %v335_v14 = vld [vmem:[#allocation5 + $0x68] sm:$0xff]  ;;  %v333_v20 = vld [vmem:[#allocation5 + $0x18] sm:$0xff] }
  0x65   : > { %521 = vmatpush.msra.mxu2 %v412_v25  ;;  %562 = vmatpush.msra.mxu3 %v413_v26  ;;  %v386_v58 = vunpack.c.l.bf16 %v342_v51  ;;  %v387_v59 = vunpack.c.h.bf16 %v342_v51  ;;  %v388_v61 = vunpack.c.l.bf16 %v343_v54  ;;  %v389_v62 = vunpack.c.h.bf16 %v343_v54  ;;  %v330_v23 = vld [vmem:[#allocation5 + $0xb0] sm:$0xff]  ;;  %v331_v26 = vld [vmem:[#allocation5] sm:$0xff]  ;;  %v662_v33 = vld [vmem:[#allocation6 + $0x28] sm:$0xff] }
  0x66   : > { %440 = vmatpush.msra.mxu0 %v406_v28  ;;  %481 = vmatpush.msra.mxu1 %v407_v29  ;;  %v382_v0 = vunpack.c.l.bf16 %v340_v57  ;;  %v383_v1 = vunpack.c.h.bf16 %v340_v57  ;;  %v384_v3 = vunpack.c.l.bf16 %v341_v60  ;;  %v385_v4 = vunpack.c.h.bf16 %v341_v60  ;;  %v660_v36 = vld [vmem:[#allocation6 + $0xb8] sm:$0xff]  ;;  %v661_v39 = vld [vmem:[#allocation6] sm:$0xff] }
  0x67   : > { %522 = vmatpush.msra.mxu2 %v408_v31  ;;  %563 = vmatpush.msra.mxu3 %v409_v32  ;;  %v378_v6 = vunpack.c.l.bf16 %v338_v63  ;;  %v379_v7 = vunpack.c.h.bf16 %v338_v63  ;;  %v380_v9 = vunpack.c.l.bf16 %v339_v2  ;;  %v381_v10 = vunpack.c.h.bf16 %v339_v2  ;;  %v659_v45 = vld [vmem:[#allocation6 + $0xc0] sm:$0xff]  ;;  %v323_v54 = vld [vmem:[%s2294_s21 + $0x8] sm:$0xff] }
  0x68   : > { %441 = vmatpush.msra.mxu0 %v402_v34  ;;  %482 = vmatpush.msra.mxu1 %v403_v35  ;;  %v374_v12 = vunpack.c.l.bf16 %v336_v5  ;;  %v375_v13 = vunpack.c.h.bf16 %v336_v5  ;;  %v376_v15 = vunpack.c.l.bf16 %v337_v8  ;;  %v377_v16 = vunpack.c.h.bf16 %v337_v8  ;;  %v663_v34 = vld [vmem:[#allocation6 + $0x98] sm:$0xff]  ;;  %v322_v35 = vld [vmem:[%s2294_s21] sm:$0xff]  ;;  %v651_v8 = vld [vmem:[#allocation6 + $0xa0] sm:$0xff] }
  0x69   : > { %523 = vmatpush.msra.mxu2 %v404_v37  ;;  %564 = vmatpush.msra.mxu3 %v405_v38  ;;  %v370_v18 = vunpack.c.l.bf16 %v334_v11  ;;  %v371_v19 = vunpack.c.h.bf16 %v334_v11  ;;  %v372_v21 = vunpack.c.l.bf16 %v335_v14  ;;  %v373_v22 = vunpack.c.h.bf16 %v335_v14  ;;  %v652_v60 = vld [vmem:[#allocation6 + $0xd8] sm:$0xff]  ;;  %v650_v5 = vld [vmem:[#allocation6 + $0x50] sm:$0xff] }
  0x6a   : > { %442 = vmatpush.msra.mxu0 %v398_v40  ;;  %483 = vmatpush.msra.mxu1 %v399_v41  ;;  %v366_v24 = vunpack.c.l.bf16 %v332_v17  ;;  %v367_v25 = vunpack.c.h.bf16 %v332_v17  ;;  %v368_v27 = vunpack.c.l.bf16 %v333_v20  ;;  %v369_v28 = vunpack.c.h.bf16 %v333_v20  ;;  %v658_v41 = vld [vmem:[#allocation6 + $0xf8] sm:$0xff] }
  0x6b   : > { %524 = vmatpush.msra.mxu2 %v400_v43  ;;  %565 = vmatpush.msra.mxu3 %v401_v44  ;;  %v362_v29 = vunpack.c.l.bf16 %v330_v23  ;;  %v363_v30 = vunpack.c.h.bf16 %v330_v23  ;;  %v364_v31 = vunpack.c.l.bf16 %v331_v26  ;;  %v365_v32 = vunpack.c.h.bf16 %v331_v26 }
  0x6c   : > { %443 = vmatpush.msra.mxu0 %v394_v46  ;;  %484 = vmatpush.msra.mxu1 %v395_v47  ;;  %v2494_v37 = vunpack.c.l.bf16 %v662_v33  ;;  %v2496_v38 = vunpack.c.h.bf16 %v662_v33  ;;  %v2498_v40 = vunpack.c.l.bf16 %v663_v34  ;;  %v2500_v42 = vunpack.c.h.bf16 %v663_v34  ;;  %v640_v34 = vld [vmem:[#allocation6 + $0xd0] sm:$0xff] }
  0x6d   : > { %525 = vmatpush.msra.mxu2 %v396_v49  ;;  %566 = vmatpush.msra.mxu3 %v397_v50  ;;  %v2502_v43 = vunpack.c.l.bf16 %v660_v36  ;;  %v2504_v44 = vunpack.c.h.bf16 %v660_v36  ;;  %v2506_v46 = vunpack.c.l.bf16 %v661_v39  ;;  %v2508_v47 = vunpack.c.h.bf16 %v661_v39  ;;  %v656_v50 = vld [vmem:[#allocation6 + $0x88] sm:$0xff] }
  0x6e   : > { %444 = vmatpush.msra.mxu0 %v390_v52  ;;  %485 = vmatpush.msra.mxu1 %v391_v53  ;;  %v2512_v48 = vunpack.c.l.bf16 %v658_v41  ;;  %v2514_v49 = vunpack.c.h.bf16 %v658_v41  ;;  %v2517_v51 = vunpack.c.l.bf16 %v659_v45  ;;  %v2520_v52 = vunpack.c.h.bf16 %v659_v45  ;;  %v657_v53 = vld [vmem:[#allocation6 + $0x48] sm:$0xff]  ;;  %v641_v41 = vld [vmem:[#allocation6 + $0xb0] sm:$0xff] }
  0x6f   : > { %526 = vmatpush.msra.mxu2 %v392_v55  ;;  %567 = vmatpush.msra.mxu3 %v393_v56  ;;  %v654_v55 = vld [vmem:[#allocation6 + $0x20] sm:$0xff]  ;;  %v2529_v56 = vunpack.c.l.bf16 %v656_v50  ;;  %v2531_v57 = vunpack.c.h.bf16 %v656_v50  ;;  %v2566_v11 = vunpack.c.l.bf16 %v650_v5  ;;  %v2571_v14 = vunpack.c.l.bf16 %v651_v8 }
  0x70   : > { %445 = vmatpush.msra.mxu0 %v386_v58  ;;  %486 = vmatpush.msra.mxu1 %v387_v59  ;;  %v655_v58 = vld [vmem:[#allocation6 + $0xf0] sm:$0xff]  ;;  %v2534_v59 = vunpack.c.l.bf16 %v657_v53  ;;  %v2541_v63 = vunpack.c.h.bf16 %v654_v55 }
  0x71   : > { %527 = vmatpush.msra.mxu2 %v388_v61  ;;  %568 = vmatpush.msra.mxu3 %v389_v62  ;;  %v2537_v61 = vunpack.c.h.bf16 %v657_v53  ;;  %v2539_v62 = vunpack.c.l.bf16 %v654_v55  ;;  %v2545_v2 = vunpack.c.h.bf16 %v655_v58  ;;  %v2623_v53 = vunpack.c.l.bf16 %v640_v34  ;;  %v638_v55 = vld [vmem:[#allocation6 + $0x58] sm:$0xff] }
  0x72   : > { %446 = vmatpush.msra.mxu0 %v382_v0  ;;  %487 = vmatpush.msra.mxu1 %v383_v1  ;;  %v653_v0 = vld [vmem:[#allocation6 + $0x30] sm:$0xff]  ;;  %v2543_v1 = vunpack.c.l.bf16 %v655_v58  ;;  %v2628_v58 = vunpack.c.l.bf16 %v641_v41 }
  0x73   : > { %528 = vmatpush.msra.mxu2 %v384_v3  ;;  %569 = vmatpush.msra.mxu3 %v385_v4  ;;  %v2549_v3 = vunpack.c.l.bf16 %v652_v60  ;;  %v2551_v4 = vunpack.c.h.bf16 %v652_v60  ;;  %3359 = vst [vmem:[#allocation18_spill] sm:$0xff] %v2623_v53  ;;  %v2631_v60 = vunpack.c.h.bf16 %v641_v41 }
  0x74   : > { %447 = vmatpush.msra.mxu0 %v378_v6  ;;  %488 = vmatpush.msra.mxu1 %v379_v7  ;;  %v2554_v6 = vunpack.c.l.bf16 %v653_v0  ;;  %v2557_v7 = vunpack.c.h.bf16 %v653_v0  ;;  %3361 = vst [vmem:[#allocation20_spill] sm:$0xff] %v2628_v58  ;;  %v639_v0 = vld [vmem:[#allocation6 + $0xa8] sm:$0xff] }
  0x75   : > { %529 = vmatpush.msra.mxu2 %v380_v9  ;;  %570 = vmatpush.msra.mxu3 %v381_v10  ;;  %v324_v9 = vld [vmem:[%s2294_s21 + $0x10] sm:$0xff]  ;;  %v648_v10 = vld [vmem:[#allocation6 + $0x10] sm:$0xff]  ;;  %3362 = vst [vmem:[#allocation21_spill] sm:$0xff] %v2631_v60 }
  0x76   : > { %448 = vmatpush.msra.mxu0 %v374_v12  ;;  %489 = vmatpush.msra.mxu1 %v375_v13  ;;  %v2568_v12 = vunpack.c.h.bf16 %v650_v5  ;;  %v649_v13 = vld [vmem:[#allocation6 + $0x70] sm:$0xff]  ;;  %v2576_v17 = vunpack.c.l.bf16 %v648_v10 }
  0x77   : > { %530 = vmatpush.msra.mxu2 %v376_v15  ;;  %571 = vmatpush.msra.mxu3 %v377_v16  ;;  %v646_v15 = vld [vmem:[#allocation6 + $0x18] sm:$0xff]  ;;  %v2574_v16 = vunpack.c.h.bf16 %v651_v8  ;;  %v2580_v20 = vunpack.c.l.bf16 %v649_v13  ;;  %v326_v5 = vld [vmem:[%s2294_s21 + $0x20] sm:$0xff]  ;;  %v636_v8 = vld [vmem:[#allocation6 + $0x8] sm:$0xff] }
  0x78   : > { %449 = vmatpush.msra.mxu0 %v370_v18  ;;  %490 = vmatpush.msra.mxu1 %v371_v19  ;;  %v2578_v18 = vunpack.c.h.bf16 %v648_v10  ;;  %v647_v19 = vld [vmem:[#allocation6 + $0x68] sm:$0xff]  ;;  %v2588_v23 = vunpack.c.h.bf16 %v646_v15  ;;  %v2642_v10 = vunpack.c.h.bf16 %v638_v55 }
  0x79   : > { %531 = vmatpush.msra.mxu2 %v372_v21  ;;  %572 = vmatpush.msra.mxu3 %v373_v22  ;;  %v2582_v21 = vunpack.c.h.bf16 %v649_v13  ;;  %v2586_v22 = vunpack.c.l.bf16 %v646_v15  ;;  %v2594_v26 = vunpack.c.h.bf16 %v647_v19  ;;  %v637_v13 = vld [vmem:[#allocation6 + $0x90] sm:$0xff]  ;;  %v2645_v15 = vunpack.c.l.bf16 %v639_v0 }
  0x7a   : > { %450 = vmatpush.msra.mxu0 %v366_v24  ;;  %491 = vmatpush.msra.mxu1 %v367_v25  ;;  %v644_v24 = vld [vmem:[#allocation6 + $0xe0] sm:$0xff]  ;;  %v2591_v25 = vunpack.c.l.bf16 %v647_v19  ;;  %3364 = vst [vmem:[#allocation23_spill] sm:$0xff] %v2642_v10  ;;  %v634_v19 = vld [vmem:[#allocation6 + $0xe8] sm:$0xff] }
  0x7b   : > { %532 = vmatpush.msra.mxu2 %v368_v27  ;;  %573 = vmatpush.msra.mxu3 %v369_v28  ;;  %v645_v27 = vld [vmem:[#allocation6 + $0x60] sm:$0xff]  ;;  %v325_v28 = vld [vmem:[%s2294_s21 + $0x18] sm:$0xff]  ;;  %3365 = vst [vmem:[#allocation24_spill] sm:$0xff] %v2645_v15  ;;  %v2660_v41 = vunpack.c.l.bf16 %v634_v19 }
  0x7c   : > { %451 = vmatpush.msra.mxu0 %v362_v29  ;;  %492 = vmatpush.msra.mxu1 %v363_v30  ;;  %v642_v29 = vld [vmem:[#allocation6 + $0x38] sm:$0xff]  ;;  %v2603_v30 = vunpack.c.l.bf16 %v644_v24  ;;  %v2608_v33 = vunpack.c.l.bf16 %v645_v27 }
  0x7d   : > { %533 = vmatpush.msra.mxu2 %v364_v31  ;;  %574 = vmatpush.msra.mxu3 %v365_v32  ;;  %v2605_v31 = vunpack.c.h.bf16 %v644_v24  ;;  %v643_v32 = vld [vmem:[#allocation6 + $0x40] sm:$0xff]  ;;  %v2613_v36 = vunpack.c.l.bf16 %v642_v29  ;;  %v2615_v39 = vunpack.c.h.bf16 %v642_v29  ;;  %v2648_v24 = vunpack.c.h.bf16 %v639_v0  ;;  %v635_v29 = vld [vmem:[#allocation6 + $0x78] sm:$0xff]  ;;  %3371 = vst [vmem:[#allocation30_spill] sm:$0xff] %v2660_v41 }
  0x7e   : > { %452 = vmatmul.f32.vlgmr.msra.gmra.mxu0 %v322_v35  ;;  %493 = vmatmul.f32.vlgmr.msra.gmra.mxu1 %v322_v35  ;;  %3353 = vst [vmem:[#allocation12_spill] sm:$0xff] %v2608_v33  ;;  %v2617_v45 = vunpack.c.l.bf16 %v643_v32  ;;  %v2619_v50 = vunpack.c.h.bf16 %v643_v32  ;;  %v2654_v32 = vunpack.c.l.bf16 %v637_v13  ;;  %v632_v0 = vld [vmem:[#allocation6 + $0x80] sm:$0xff] }
  0x7f   : > { %534 = vmatmul.f32.vlgmr.msra.gmra.mxu2 %v322_v35  ;;  %575 = vmatmul.f32.vlgmr.msra.gmra.mxu3 %v322_v35  ;;  %v2611_v35 = vunpack.c.h.bf16 %v645_v27  ;;  %3355 = vst [vmem:[#allocation14_spill] sm:$0xff] %v2613_v36  ;;  %v2650_v27 = vunpack.c.l.bf16 %v636_v8 }
  0x80   : > { %737 = vmatpush.msrb.mxu0 %v2494_v37  ;;  %757 = vmatpush.msrb.mxu1 %v2496_v38  ;;  %3356 = vst [vmem:[#allocation15_spill] sm:$0xff] %v2615_v39 }
  0x81   : > { %777 = vmatpush.msrb.mxu2 %v2498_v40  ;;  %797 = vmatpush.msrb.mxu3 %v2500_v42  ;;  %3354 = vst [vmem:[#allocation13_spill] sm:$0xff] %v2611_v35 }
  0x82   : > { %738 = vmatpush.msrb.mxu0 %v2502_v43  ;;  %758 = vmatpush.msrb.mxu1 %v2504_v44  ;;  %3357 = vst [vmem:[#allocation16_spill] sm:$0xff] %v2617_v45 }
  0x83   : > { %778 = vmatpush.msrb.mxu2 %v2506_v46  ;;  %798 = vmatpush.msrb.mxu3 %v2508_v47  ;;  %3358 = vst [vmem:[#allocation17_spill] sm:$0xff] %v2619_v50 }
  0x84   : > { %739 = vmatpush.msrb.mxu0 %v2512_v48  ;;  %759 = vmatpush.msrb.mxu1 %v2514_v49  ;;  %3366 = vst [vmem:[#allocation25_spill] sm:$0xff] %v2648_v24 }
  0x85   : > { %779 = vmatpush.msrb.mxu2 %v2517_v51  ;;  %799 = vmatpush.msrb.mxu3 %v2520_v52  ;;  %3367 = vst [vmem:[#allocation26_spill] sm:$0xff] %v2650_v27 }
  0x86   : > { %455 = vmatmul.f32.gmra.mxu0 %v323_v54  ;;  %496 = vmatmul.f32.gmra.mxu1 %v323_v54  ;;  %3369 = vst [vmem:[#allocation28_spill] sm:$0xff] %v2654_v32 }
  0x87   : > { %537 = vmatmul.f32.gmra.mxu2 %v323_v54  ;;  %578 = vmatmul.f32.gmra.mxu3 %v323_v54  ;;  %v2625_v54 = vunpack.c.h.bf16 %v640_v34  ;;  %v2656_v34 = vunpack.c.h.bf16 %v637_v13  ;;  %v633_v13 = vld [vmem:[#allocation6 + $0xc8] sm:$0xff] }
  0x88   : > { %740 = vmatpush.msrb.mxu0 %v2529_v56  ;;  %760 = vmatpush.msrb.mxu1 %v2531_v57 }
  0x89   : > { %780 = vmatpush.msrb.mxu2 %v2534_v59  ;;  %800 = vmatpush.msrb.mxu3 %v2537_v61  ;;  %3360 = vst [vmem:[#allocation19_spill] sm:$0xff] %v2625_v54 }
  0x8a   : > { %741 = vmatpush.msrb.mxu0 %v2539_v62  ;;  %761 = vmatpush.msrb.mxu1 %v2541_v63  ;;  %3370 = vst [vmem:[#allocation29_spill] sm:$0xff] %v2656_v34 }
  0x8b   : > { %781 = vmatpush.msrb.mxu2 %v2543_v1  ;;  %801 = vmatpush.msrb.mxu3 %v2545_v2 }
  0x8c   : > { %742 = vmatpush.msrb.mxu0 %v2549_v3  ;;  %762 = vmatpush.msrb.mxu1 %v2551_v4 }
  0x8d   : > { %782 = vmatpush.msrb.mxu2 %v2554_v6  ;;  %802 = vmatpush.msrb.mxu3 %v2557_v7 }
  0x8e   : > { %458 = vmatmul.f32.gmra.mxu0 %v324_v9  ;;  %499 = vmatmul.f32.gmra.mxu1 %v324_v9 }
  0x8f   : > { %540 = vmatmul.f32.gmra.mxu2 %v324_v9  ;;  %581 = vmatmul.f32.gmra.mxu3 %v324_v9  ;;  %v2640_v9 = vunpack.c.l.bf16 %v638_v55  ;;  %v2662_v55 = vunpack.c.h.bf16 %v634_v19  ;;  %v2677_v19 = vunpack.c.l.bf16 %v632_v0 }
  0x90   : > { %743 = vmatpush.msrb.mxu0 %v2566_v11  ;;  %763 = vmatpush.msrb.mxu1 %v2568_v12 }
  0x91   : > { %783 = vmatpush.msrb.mxu2 %v2571_v14  ;;  %803 = vmatpush.msrb.mxu3 %v2574_v16  ;;  %3363 = vst [vmem:[#allocation22_spill] sm:$0xff] %v2640_v9 }
  0x92   : > { %744 = vmatpush.msrb.mxu0 %v2576_v17  ;;  %764 = vmatpush.msrb.mxu1 %v2578_v18  ;;  %3372 = vst [vmem:[#allocation31_spill] sm:$0xff] %v2662_v55 }
  0x93   : > { %784 = vmatpush.msrb.mxu2 %v2580_v20  ;;  %804 = vmatpush.msrb.mxu3 %v2582_v21  ;;  %3375 = vst [vmem:[#allocation34_spill] sm:$0xff] %v2677_v19 }
  0x94   : > { %745 = vmatpush.msrb.mxu0 %v2586_v22  ;;  %765 = vmatpush.msrb.mxu1 %v2588_v23 }
  0x95   : > { %785 = vmatpush.msrb.mxu2 %v2591_v25  ;;  %805 = vmatpush.msrb.mxu3 %v2594_v26 }
  0x96   : > { %461 = vmatmul.f32.gmra.mxu0 %v325_v28  ;;  %502 = vmatmul.f32.gmra.mxu1 %v325_v28 }
  0x97   : > { %543 = vmatmul.f32.gmra.mxu2 %v325_v28  ;;  %584 = vmatmul.f32.gmra.mxu3 %v325_v28  ;;  %v2652_v28 = vunpack.c.h.bf16 %v636_v8  ;;  %v2666_v8 = vunpack.c.l.bf16 %v635_v29 }
  0x98   : > { %746 = vmatpush.msrb.mxu0 %v2603_v30  ;;  %766 = vmatpush.msrb.mxu1 %v2605_v31 }
  0x99   : > { %786 = vmatpush.msrb.mxu2 %v2608_v33  ;;  %806 = vmatpush.msrb.mxu3 %v2611_v35  ;;  %3368 = vst [vmem:[#allocation27_spill] sm:$0xff] %v2652_v28 }
  0x9a   : > { %747 = vmatpush.msrb.mxu0 %v2613_v36  ;;  %767 = vmatpush.msrb.mxu1 %v2615_v39  ;;  %3373 = vst [vmem:[#allocation32_spill] sm:$0xff] %v2666_v8 }
  0x9b   : > { %787 = vmatpush.msrb.mxu2 %v2617_v45  ;;  %807 = vmatpush.msrb.mxu3 %v2619_v50 }
  0x9c   : > { %748 = vmatpush.msrb.mxu0 %v2623_v53  ;;  %768 = vmatpush.msrb.mxu1 %v2625_v54 }
  0x9d   : > { %788 = vmatpush.msrb.mxu2 %v2628_v58  ;;  %808 = vmatpush.msrb.mxu3 %v2631_v60 }
  0x9e   : > { %464 = vmatmul.f32.gmra.mxu0 %v326_v5  ;;  %505 = vmatmul.f32.gmra.mxu1 %v326_v5 }
  0x9f   : > { %546 = vmatmul.f32.gmra.mxu2 %v326_v5  ;;  %587 = vmatmul.f32.gmra.mxu3 %v326_v5  ;;  %v2668_v5 = vunpack.c.h.bf16 %v635_v29  ;;  %v2683_v29 = vunpack.c.l.bf16 %v633_v13 }
  0xa0   : > { %749 = vmatpush.msrb.mxu0 %v2640_v9  ;;  %769 = vmatpush.msrb.mxu1 %v2642_v10  ;;  %v327_v9 = vld [vmem:[%s2294_s21 + $0x28] sm:$0xff] }
  0xa1   : > { %789 = vmatpush.msrb.mxu2 %v2645_v15  ;;  %809 = vmatpush.msrb.mxu3 %v2648_v24  ;;  %3374 = vst [vmem:[#allocation33_spill] sm:$0xff] %v2668_v5  ;;  %v2679_v24 = vunpack.c.h.bf16 %v632_v0  ;;  %v328_v0 = vld [vmem:[%s2294_s21 + $0x30] sm:$0xff] }
  0xa2   : > { %750 = vmatpush.msrb.mxu0 %v2650_v27  ;;  %770 = vmatpush.msrb.mxu1 %v2652_v28  ;;  %3377 = vst [vmem:[#allocation36_spill] sm:$0xff] %v2683_v29  ;;  %v2685_v28 = vunpack.c.h.bf16 %v633_v13  ;;  %v728_v13 = vld [vmem:[#allocation2] sm:$0xff] }
  0xa3   : > { %790 = vmatpush.msrb.mxu2 %v2654_v32  ;;  %810 = vmatpush.msrb.mxu3 %v2656_v34  ;;  %3376 = vst [vmem:[#allocation35_spill] sm:$0xff] %v2679_v24 }
  0xa4   : > { %751 = vmatpush.msrb.mxu0 %v2660_v41  ;;  %771 = vmatpush.msrb.mxu1 %v2662_v55  ;;  %3378 = vst [vmem:[#allocation37_spill] sm:$0xff] %v2685_v28 }
  0xa5   : > { %791 = vmatpush.msrb.mxu2 %v2666_v8  ;;  %811 = vmatpush.msrb.mxu3 %v2668_v5 }
  0xa6   : > { %467 = vmatmul.f32.gmra.mxu0 %v327_v9  ;;  %508 = vmatmul.f32.gmra.mxu1 %v327_v9 }
  0xa7   : > { %549 = vmatmul.f32.gmra.mxu2 %v327_v9  ;;  %590 = vmatmul.f32.gmra.mxu3 %v327_v9  ;;  %v329_v9 = vld [vmem:[%s2294_s21 + $0x38] sm:$0xff] }
  0xa8   : > { %752 = vmatpush.msrb.mxu0 %v2677_v19  ;;  %772 = vmatpush.msrb.mxu1 %v2679_v24 }
  0xa9   : > { %792 = vmatpush.msrb.mxu2 %v2683_v29  ;;  %812 = vmatpush.msrb.mxu3 %v2685_v28 }
  0xaa   : > { %892 = vmatpush.msra.mxu0 %v2494_v37  ;;  %912 = vmatpush.msra.mxu1 %v2496_v38 }
  0xab   : > { %932 = vmatpush.msra.mxu2 %v2498_v40  ;;  %952 = vmatpush.msra.mxu3 %v2500_v42 }
  0xac   : > { %893 = vmatpush.msra.mxu0 %v2502_v43  ;;  %913 = vmatpush.msra.mxu1 %v2504_v44 }
  0xad   : > { %933 = vmatpush.msra.mxu2 %v2506_v46  ;;  %953 = vmatpush.msra.mxu3 %v2508_v47 }
  0xae   : > { %470 = vmatmul.f32.gmra.mxu0 %v328_v0  ;;  %511 = vmatmul.f32.gmra.mxu1 %v328_v0 }
  0xaf   : > { %552 = vmatmul.f32.gmra.mxu2 %v328_v0  ;;  %593 = vmatmul.f32.gmra.mxu3 %v328_v0  ;;  %v3379_v0 = vld [vmem:[#allocation22_spill] sm:$0xff] }
  0xb0   : > { %894 = vmatpush.msra.mxu0 %v2512_v48  ;;  %914 = vmatpush.msra.mxu1 %v2514_v49 }
  0xb1   : > { %934 = vmatpush.msra.mxu2 %v2517_v51  ;;  %954 = vmatpush.msra.mxu3 %v2520_v52 }
  0xb2   : > { %895 = vmatpush.msra.mxu0 %v2529_v56  ;;  %915 = vmatpush.msra.mxu1 %v2531_v57 }
  0xb3   : > { %935 = vmatpush.msra.mxu2 %v2534_v59  ;;  %955 = vmatpush.msra.mxu3 %v2537_v61 }
  0xb4   : > { %896 = vmatpush.msra.mxu0 %v2539_v62  ;;  %916 = vmatpush.msra.mxu1 %v2541_v63 }
  0xb5   : > { %936 = vmatpush.msra.mxu2 %v2543_v1  ;;  %956 = vmatpush.msra.mxu3 %v2545_v2 }
  0xb6   : > { %473 = vmatmul.f32.gmra.mxu0 %v329_v9  ;;  %514 = vmatmul.f32.gmra.mxu1 %v329_v9 }
  0xb7   : > { %555 = vmatmul.f32.gmra.mxu2 %v329_v9  ;;  %596 = vmatmul.f32.gmra.mxu3 %v329_v9  ;;  %v3380_v9 = vld [vmem:[#allocation25_spill] sm:$0xff] }
  0xb8   : > { %897 = vmatpush.msra.mxu0 %v2549_v3  ;;  %917 = vmatpush.msra.mxu1 %v2551_v4 }
  0xb9   : > { %937 = vmatpush.msra.mxu2 %v2554_v6  ;;  %957 = vmatpush.msra.mxu3 %v2557_v7 }
  0xba   : > { %898 = vmatpush.msra.mxu0 %v2566_v11  ;;  %918 = vmatpush.msra.mxu1 %v2568_v12 }
  0xbb   : > { %938 = vmatpush.msra.mxu2 %v2571_v14  ;;  %958 = vmatpush.msra.mxu3 %v2574_v16 }
  0xbc   : > { %899 = vmatpush.msra.mxu0 %v2576_v17  ;;  %919 = vmatpush.msra.mxu1 %v2578_v18 }
  0xbd   : > { %939 = vmatpush.msra.mxu2 %v2580_v20  ;;  %959 = vmatpush.msra.mxu3 %v2582_v21 }
  0xbe   : > { %753 = vmatmul.f32.vlgmr.msrb.gmra.mxu0 %v728_v13  ;;  %773 = vmatmul.f32.vlgmr.msrb.gmra.mxu1 %v728_v13 }
  0xbf   : > { %793 = vmatmul.f32.vlgmr.msrb.gmra.mxu2 %v728_v13  ;;  %813 = vmatmul.f32.vlgmr.msrb.gmra.mxu3 %v728_v13  ;;  %v3381_v13 = vld [vmem:[#allocation27_spill] sm:$0xff] }
  0xc0   : > { %900 = vmatpush.msra.mxu0 %v2586_v22  ;;  %920 = vmatpush.msra.mxu1 %v2588_v23 }
  0xc1   : > { %940 = vmatpush.msra.mxu2 %v2591_v25  ;;  %960 = vmatpush.msra.mxu3 %v2594_v26 }
  0xc2   : > { %901 = vmatpush.msra.mxu0 %v2603_v30  ;;  %921 = vmatpush.msra.mxu1 %v2605_v31 }
  0xc3   : > { %941 = vmatpush.msra.mxu2 %v2608_v33  ;;  %961 = vmatpush.msra.mxu3 %v2611_v35 }
  0xc4   : > { %902 = vmatpush.msra.mxu0 %v2613_v36  ;;  %922 = vmatpush.msra.mxu1 %v2615_v39 }
  0xc5   : > { %942 = vmatpush.msra.mxu2 %v2617_v45  ;;  %962 = vmatpush.msra.mxu3 %v2619_v50 }
  0xc6   : > { %903 = vmatpush.msra.mxu0 %v2623_v53  ;;  %923 = vmatpush.msra.mxu1 %v2625_v54 }
  0xc7   : > { %943 = vmatpush.msra.mxu2 %v2628_v58  ;;  %963 = vmatpush.msra.mxu3 %v2631_v60 }
  0xc8   : > { %904 = vmatpush.msra.mxu0 %v3379_v0  ;;  %924 = vmatpush.msra.mxu1 %v2642_v10 }
  0xc9   : > { %944 = vmatpush.msra.mxu2 %v2645_v15  ;;  %964 = vmatpush.msra.mxu3 %v3380_v9 }
  0xca   : > { %905 = vmatpush.msra.mxu0 %v2650_v27  ;;  %925 = vmatpush.msra.mxu1 %v3381_v13 }
  0xcb   : > { %945 = vmatpush.msra.mxu2 %v2654_v32  ;;  %965 = vmatpush.msra.mxu3 %v2656_v34 }
  0xcc   : > { %906 = vmatpush.msra.mxu0 %v2660_v41  ;;  %926 = vmatpush.msra.mxu1 %v2662_v55 }
  0xcd   : > { %946 = vmatpush.msra.mxu2 %v2666_v8  ;;  %966 = vmatpush.msra.mxu3 %v2668_v5 }
  0xce   : > { %907 = vmatpush.msra.mxu0 %v2677_v19  ;;  %927 = vmatpush.msra.mxu1 %v2679_v24 }
  0xcf   : > { %947 = vmatpush.msra.mxu2 %v2683_v29  ;;  %967 = vmatpush.msra.mxu3 %v2685_v28 }
  0xd0   : > { %1048 = vmatpush.msrb.mxu0 %v2494_v37  ;;  %1068 = vmatpush.msrb.mxu1 %v2496_v38 }
  0xd1   : > { %1088 = vmatpush.msrb.mxu2 %v2498_v40  ;;  %1108 = vmatpush.msrb.mxu3 %v2500_v42 }
  0xd2   : > { %1049 = vmatpush.msrb.mxu0 %v2502_v43  ;;  %1069 = vmatpush.msrb.mxu1 %v2504_v44 }
  0xd3   : > { %1089 = vmatpush.msrb.mxu2 %v2506_v46  ;;  %1109 = vmatpush.msrb.mxu3 %v2508_v47 }
  0xd4   : > { %1050 = vmatpush.msrb.mxu0 %v2512_v48  ;;  %1070 = vmatpush.msrb.mxu1 %v2514_v49 }
  0xd5   : > { %1090 = vmatpush.msrb.mxu2 %v2517_v51  ;;  %1110 = vmatpush.msrb.mxu3 %v2520_v52 }
  0xd6   : > { %1051 = vmatpush.msrb.mxu0 %v2529_v56  ;;  %1071 = vmatpush.msrb.mxu1 %v2531_v57 }
  0xd7   : > { %1091 = vmatpush.msrb.mxu2 %v2534_v59  ;;  %1111 = vmatpush.msrb.mxu3 %v2537_v61 }
  0xd8   : > { %1052 = vmatpush.msrb.mxu0 %v2539_v62  ;;  %1072 = vmatpush.msrb.mxu1 %v2541_v63 }
  0xd9   : > { %1092 = vmatpush.msrb.mxu2 %v2543_v1  ;;  %1112 = vmatpush.msrb.mxu3 %v2545_v2 }
  0xda   : > { %1053 = vmatpush.msrb.mxu0 %v2549_v3  ;;  %1073 = vmatpush.msrb.mxu1 %v2551_v4 }
  0xdb   : > { %1093 = vmatpush.msrb.mxu2 %v2554_v6  ;;  %1113 = vmatpush.msrb.mxu3 %v2557_v7 }
  0xdc   : > { %1054 = vmatpush.msrb.mxu0 %v2566_v11  ;;  %1074 = vmatpush.msrb.mxu1 %v2568_v12 }
  0xdd   : > { %1094 = vmatpush.msrb.mxu2 %v2571_v14  ;;  %1114 = vmatpush.msrb.mxu3 %v2574_v16 }
  0xde   : > { %1055 = vmatpush.msrb.mxu0 %v2576_v17  ;;  %1075 = vmatpush.msrb.mxu1 %v2578_v18 }
  0xdf   : > { %1095 = vmatpush.msrb.mxu2 %v2580_v20  ;;  %1115 = vmatpush.msrb.mxu3 %v2582_v21 }
  0xe0   : > { %1056 = vmatpush.msrb.mxu0 %v2586_v22  ;;  %1076 = vmatpush.msrb.mxu1 %v2588_v23 }
  0xe1   : > { %1096 = vmatpush.msrb.mxu2 %v2591_v25  ;;  %1116 = vmatpush.msrb.mxu3 %v2594_v26 }
  0xe2   : > { %1057 = vmatpush.msrb.mxu0 %v2603_v30  ;;  %1077 = vmatpush.msrb.mxu1 %v2605_v31 }
  0xe3   : > { %1097 = vmatpush.msrb.mxu2 %v2608_v33  ;;  %1117 = vmatpush.msrb.mxu3 %v2611_v35 }
  0xe4   : > { %1058 = vmatpush.msrb.mxu0 %v2613_v36  ;;  %1078 = vmatpush.msrb.mxu1 %v2615_v39 }
  0xe5   : > { %1098 = vmatpush.msrb.mxu2 %v2617_v45  ;;  %1118 = vmatpush.msrb.mxu3 %v2619_v50 }
  0xe6   : > { %1059 = vmatpush.msrb.mxu0 %v2623_v53  ;;  %1079 = vmatpush.msrb.mxu1 %v2625_v54 }
  0xe7   : > { %1099 = vmatpush.msrb.mxu2 %v2628_v58  ;;  %1119 = vmatpush.msrb.mxu3 %v2631_v60 }
  0xe8   : > { %1060 = vmatpush.msrb.mxu0 %v3379_v0  ;;  %1080 = vmatpush.msrb.mxu1 %v2642_v10 }
  0xe9   : > { %1100 = vmatpush.msrb.mxu2 %v2645_v15  ;;  %1120 = vmatpush.msrb.mxu3 %v3380_v9 }
  0xea   : > { %1061 = vmatpush.msrb.mxu0 %v2650_v27  ;;  %1081 = vmatpush.msrb.mxu1 %v3381_v13 }
  0xeb   : > { %1101 = vmatpush.msrb.mxu2 %v2654_v32  ;;  %1121 = vmatpush.msrb.mxu3 %v2656_v34 }
  0xec   : > { %1062 = vmatpush.msrb.mxu0 %v2660_v41  ;;  %1082 = vmatpush.msrb.mxu1 %v2662_v55  ;;  %v426_v41 = vld [vmem:[%s3294_s1] sm:$0xf] }
  0xed   : > { %1102 = vmatpush.msrb.mxu2 %v2666_v8  ;;  %1122 = vmatpush.msrb.mxu3 %v2668_v5  ;;  %v428_v34 = vperm.slane %v426_v41, 0  ;;  %v429_v55 = vperm.slane %v426_v41, 1 }
  0xee   : > { %1063 = vmatpush.msrb.mxu0 %v2677_v19  ;;  %1083 = vmatpush.msrb.mxu1 %v2679_v24 }
  0xef   : > { %1103 = vmatpush.msrb.mxu2 %v2683_v29  ;;  %1123 = vmatpush.msrb.mxu3 %v2685_v28  ;;  %v2832_v29 = vperm.slane %v426_v41, 2  ;;  %v2834_v28 = vperm.slane %v426_v41, 3 }
  0xfb   : > { %v453_v13 = vpop.f32.mrf.mxu0  ;;  %v494_v32 = vpop.f32.mrf.mxu1 }
 0x102   : > { %v2824_v27 = vpop.f32.mrf.mxu2  ;;  %v2826_v8 = vpop.f32.mrf.mxu3 }
 0x103   : > { %v456_v5 = vpop.f32.mrf.mxu0  ;;  %v497_v19 = vpop.f32.mrf.mxu1 }
 0x104   : > { %v2828_v9 = vadd.f32 %v456_v5, %v428_v34  ;;  %v2830_v24 = vadd.f32 %v497_v19, %v429_v55 }
 0x106   : > { %3382 = vst [vmem:[#allocation38_spill] sm:$0xff] %v2828_v9 }
 0x107   : > { %3383 = vst [vmem:[#allocation39_spill] sm:$0xff] %v2830_v24 }
 0x10a   : > { %v538_v15 = vpop.f32.mrf.mxu2  ;;  %v579_v10 = vpop.f32.mrf.mxu3 }
 0x10b   : > { %v2837_v0 = vadd.f32 %v538_v15, %v2832_v29  ;;  %v2840_v60 = vadd.f32 %v579_v10, %v2834_v28  ;;  %v459_v58 = vpop.f32.mrf.mxu0  ;;  %v500_v54 = vpop.f32.mrf.mxu1 }
 0x10c   : > { %v2842_v53 = vadd.f32 %v459_v58, %v428_v34  ;;  %v2844_v5 = vadd.f32 %v500_v54, %v429_v55 }
 0x10d   : > { %3384 = vst [vmem:[#allocation40_spill] sm:$0xff] %v2837_v0 }
 0x10e   : > { %3385 = vst [vmem:[#allocation41_spill] sm:$0xff] %v2840_v60 }
 0x10f   : > { %3386 = vst [vmem:[#allocation42_spill] sm:$0xff] %v2842_v53 }
 0x110   : > { %3387 = vst [vmem:[#allocation43_spill] sm:$0xff] %v2844_v5 }
 0x112   : > { %v541_v19 = vpop.f32.mrf.mxu2  ;;  %v582_v24 = vpop.f32.mrf.mxu3 }
 0x113   : > { %v2847_v9 = vadd.f32 %v541_v19, %v2832_v29  ;;  %v2850_v41 = vadd.f32 %v582_v24, %v2834_v28  ;;  %v462_v50 = vpop.f32.mrf.mxu0  ;;  %v503_v15 = vpop.f32.mrf.mxu1 }
 0x114   : > { %v2852_v0 = vadd.f32 %v462_v50, %v428_v34  ;;  %v2854_v10 = vadd.f32 %v503_v15, %v429_v55 }
 0x115   : > { %3388 = vst [vmem:[#allocation44_spill] sm:$0xff] %v2847_v9 }
 0x116   : > { %3389 = vst [vmem:[#allocation45_spill] sm:$0xff] %v2850_v41 }
 0x117   : > { %3390 = vst [vmem:[#allocation46_spill] sm:$0xff] %v2852_v0 }
 0x118   : > { %3391 = vst [vmem:[#allocation47_spill] sm:$0xff] %v2854_v10 }
 0x11a   : > { %v544_v60 = vpop.f32.mrf.mxu2  ;;  %v585_v45 = vpop.f32.mrf.mxu3 }
 0x11b   : > { %v2857_v58 = vadd.f32 %v544_v60, %v2832_v29  ;;  %v2860_v54 = vadd.f32 %v585_v45, %v2834_v28  ;;  %v465_v5 = vpop.f32.mrf.mxu0  ;;  %v506_v19 = vpop.f32.mrf.mxu1 }
 0x11c   : > { %v2862_v9 = vadd.f32 %v465_v5, %v428_v34  ;;  %v2864_v24 = vadd.f32 %v506_v19, %v429_v55 }
 0x11d   : > { %3392 = vst [vmem:[#allocation48_spill] sm:$0xff] %v2857_v58 }
 0x11e   : > { %3393 = vst [vmem:[#allocation49_spill] sm:$0xff] %v2860_v54 }
 0x11f   : > { %3394 = vst [vmem:[#allocation50_spill] sm:$0xff] %v2862_v9 }
 0x120   : > { %3395 = vst [vmem:[#allocation51_spill] sm:$0xff] %v2864_v24 }
 0x122   : > { %v547_v41 = vpop.f32.mrf.mxu2  ;;  %v588_v53 = vpop.f32.mrf.mxu3 }
 0x123   : > { %v2867_v50 = vadd.f32 %v547_v41, %v2832_v29  ;;  %v2870_v15 = vadd.f32 %v588_v53, %v2834_v28  ;;  %v468_v10 = vpop.f32.mrf.mxu0  ;;  %v509_v60 = vpop.f32.mrf.mxu1 }
 0x124   : > { %v2872_v58 = vadd.f32 %v468_v10, %v428_v34  ;;  %v2874_v45 = vadd.f32 %v509_v60, %v429_v55 }
 0x125   : > { %3396 = vst [vmem:[#allocation52_spill] sm:$0xff] %v2867_v50 }
 0x126   : > { %3397 = vst [vmem:[#allocation53_spill] sm:$0xff] %v2870_v15 }
 0x127   : > { %3398 = vst [vmem:[#allocation54_spill] sm:$0xff] %v2872_v58  ;;  %v495_v58 = vadd.f32 %v494_v32, %v429_v55 }
 0x128   : > { %3399 = vst [vmem:[#allocation55_spill] sm:$0xff] %v2874_v45 }
 0x12a   : > { %v550_v54 = vpop.f32.mrf.mxu2  ;;  %v591_v0 = vpop.f32.mrf.mxu3 }
 0x12b   : > { %v2877_v5 = vadd.f32 %v550_v54, %v2832_v29  ;;  %v2880_v19 = vadd.f32 %v591_v0, %v2834_v28  ;;  %v471_v24 = vpop.f32.mrf.mxu0  ;;  %v512_v41 = vpop.f32.mrf.mxu1 }
 0x12c   : > { %v2882_v50 = vadd.f32 %v471_v24, %v428_v34  ;;  %v2884_v53 = vadd.f32 %v512_v41, %v429_v55 }
 0x12d   : > { %3400 = vst [vmem:[#allocation56_spill] sm:$0xff] %v2877_v5 }
 0x12e   : > { %3401 = vst [vmem:[#allocation57_spill] sm:$0xff] %v2880_v19  ;;  %v454_v19 = vadd.f32 %v453_v13, %v428_v34 }
 0x12f   : > { %3402 = vst [vmem:[#allocation58_spill] sm:$0xff] %v2882_v50 }
 0x130   : > { %3403 = vst [vmem:[#allocation59_spill] sm:$0xff] %v2884_v53 }
 0x132   : > { %v553_v15 = vpop.f32.mrf.mxu2  ;;  %v594_v9 = vpop.f32.mrf.mxu3 }
 0x133   : > { %v2887_v10 = vadd.f32 %v553_v15, %v2832_v29  ;;  %v2890_v60 = vadd.f32 %v594_v9, %v2834_v28  ;;  %v474_v45 = vpop.f32.mrf.mxu0  ;;  %v515_v54 = vpop.f32.mrf.mxu1 }
 0x134   : > { %v2892_v5 = vadd.f32 %v474_v45, %v428_v34  ;;  %v2894_v0 = vadd.f32 %v515_v54, %v429_v55  ;;  %v536_v45 = vadd.f32 %v2824_v27, %v2832_v29 }
 0x135   : > { %3404 = vst [vmem:[#allocation60_spill] sm:$0xff] %v2887_v10 }
 0x136   : > { %3405 = vst [vmem:[#allocation61_spill] sm:$0xff] %v2890_v60 }
 0x137   : > { %3406 = vst [vmem:[#allocation62_spill] sm:$0xff] %v2892_v5 }
 0x138   : > { %3407 = vst [vmem:[#allocation63_spill] sm:$0xff] %v2894_v0 }
 0x13a   : > { %v556_v24 = vpop.f32.mrf.mxu2  ;;  %v597_v50 = vpop.f32.mrf.mxu3 }
 0x13b   : > { %v2897_v41 = vadd.f32 %v556_v24, %v2832_v29  ;;  %v2900_v53 = vadd.f32 %v597_v50, %v2834_v28  ;;  %v754_v15 = vpop.f32.mrf.mxu0  ;;  %v774_v10 = vpop.f32.mrf.mxu1 }
 0x13c   : > { %v817_v9 = vadd.f32 %v754_v15, %v454_v19  ;;  %v818_v60 = vadd.f32 %v774_v10, %v495_v58  ;;  %v577_v58 = vadd.f32 %v2826_v8, %v2834_v28 }
 0x13d   : > { %3408 = vst [vmem:[#allocation64_spill] sm:$0xff] %v2897_v41 }
 0x13e   : > { %3409 = vst [vmem:[#allocation65_spill] sm:$0xff] %v2900_v53  ;;  %v2073_v39 = vmul.f32 -1.442695, %v817_v9  ;;  %v2074_v36 = vmul.f32 -1.442695, %v818_v60 }
 0x140   : > { %2117 = vpow2.f32 %v2073_v39 }
 0x141   : > { %2119 = vpow2.f32 %v2074_v36 }
 0x142   : > { %v794_v32 = vpop.f32.mrf.mxu2  ;;  %v814_v53 = vpop.f32.mrf.mxu3 }
 0x143   : > { %v819_v34 = vadd.f32 %v794_v32, %v536_v45  ;;  %v820_v60 = vadd.f32 %v814_v53, %v577_v58 }
 0x145   : > { %v2075_v55 = vmul.f32 -1.442695, %v819_v34 }
 0x146   : > { %v2118_v13 = vpop.eup %2117 }
 0x147   : > { %v2120_v54 = vpop.eup %2119  ;;  %v830_v24 = vadd.f32 1.0, %v2118_v13  ;;  %2121 = vpow2.f32 %v2075_v55 }
 0x148   : > { %v831_v50 = vadd.f32 1.0, %v2120_v54 }
 0x149   : > { %2123 = vrcp.f32 %v830_v24  ;;  %v844_v45 = vand.u32 2147483648, %v830_v24  ;;  %v842_v55 = vand.u32 2147483647, %v830_v24  ;;  %vm838_vm2 = vweird.f32 %v830_v24 }
 0x14a   : > { %2125 = vrcp.f32 %v831_v50  ;;  %v859_v32 = vand.u32 2147483648, %v831_v50  ;;  %v857_v54 = vand.u32 2147483647, %v831_v50  ;;  %vm853_vm3 = vweird.f32 %v831_v50 }
 0x14b   : > { %v845_v53 = vor.u32 1.1754944e-38, %v844_v45  ;;  %vm843_vm6 = vcmp.eq.f32.partialorder %v842_v55, 8.507059e+37 }
 0x14c   : > { %v860_v58 = vor.u32 1.1754944e-38, %v859_v32  ;;  %vm858_vm7 = vcmp.eq.f32.partialorder %v857_v54, 8.507059e+37  ;;  %v3415_v54 = vld [vmem:[#allocation17_spill] sm:$0xff] }
 0x14d   : > { %v2122_v19 = vpop.eup %2121 }
 0x14e   : > { %v832_v39 = vadd.f32 1.0, %v2122_v19 }
 0x14f   : > { %v2124_v10 = vpop.eup %2123 }
 0x150   : > { %v2126_v27 = vpop.eup %2125  ;;  %v834_v36 = vmul.f32 %v2124_v10, %v830_v24  ;;  %2127 = vrcp.f32 %v832_v39  ;;  %vm839_vm0 = vweird.f32 %v2124_v10  ;;  %vm868_vm9 = vweird.f32 %v832_v39 }
 0x151   : > { %v849_v29 = vmul.f32 %v2126_v27, %v831_v50  ;;  %2129 = vtanh.f32 %v820_v60  ;;  %vm854_vm1 = vweird.f32 %v2126_v27  ;;  %vm840_vm4 = vmor %vm838_vm2, %vm839_vm0 }
 0x152   : > { %v835_v15 = vsub.f32 1.0, %v834_v36  ;;  %vm855_vm5 = vmor %vm853_vm3, %vm854_vm1  ;;  %v729_v36 = vld [vmem:[#allocation3] sm:$0xff] }
 0x153   : > { %v850_v9 = vsub.f32 1.0, %v849_v29 }
 0x154   : > { %v836_v34 = vmul.f32 %v2124_v10, %v835_v15 }
 0x155   : > { %v851_v13 = vmul.f32 %v2126_v27, %v850_v9 }
 0x156   : > { %v2128_v41 = vpop.eup %2127  ;;  %v837_v28 = vadd.f32 %v2124_v10, %v836_v34  ;;  %v874_v34 = vand.u32 2147483648, %v832_v39 }
 0x157   : > { %v864_v8 = vmul.f32 %v2128_v41, %v832_v39  ;;  %v852_v19 = vadd.f32 %v2126_v27, %v851_v13  ;;  %v2130_v60 = vpop.eup %2129  ;;  %vm869_vm8 = vweird.f32 %v2128_v41 }
 0x158   : > { %v841_v29 = vsel %vm840_vm4, %v2124_v10, %v837_v28  ;;  %v872_v10 = vand.u32 2147483647, %v832_v39  ;;  %vm870_vm10 = vmor %vm868_vm9, %vm869_vm8  ;;  %v875_v55 = vor.u32 1.1754944e-38, %v874_v34  ;;  %v3414_v39 = vld [vmem:[#allocation16_spill] sm:$0xff]  ;;  %v3416_v28 = vld [vmem:[#allocation18_spill] sm:$0xff] }
 0x159   : > { %v865_v15 = vsub.f32 1.0, %v864_v8  ;;  %v846_v0 = vsel %vm843_vm6, %v845_v53, %v841_v29  ;;  %v856_v5 = vsel %vm855_vm5, %v2126_v27, %v852_v19  ;;  %v3417_v8 = vld [vmem:[#allocation19_spill] sm:$0xff]  ;;  %v3418_v53 = vld [vmem:[#allocation20_spill] sm:$0xff]  ;;  %v3419_v19 = vld [vmem:[#allocation21_spill] sm:$0xff] }
 0x15a   : > { %v861_v9 = vsel %vm858_vm7, %v860_v58, %v856_v5  ;;  %v880_v35 = vmul.f32 %v2130_v60, %v846_v0  ;;  %vm873_vm11 = vcmp.eq.f32.partialorder %v872_v10, 8.507059e+37  ;;  %v3412_v0 = vld [vmem:[#allocation14_spill] sm:$0xff]  ;;  %v3422_v29 = vld [vmem:[#allocation24_spill] sm:$0xff]  ;;  %v3423_v60 = vld [vmem:[#allocation25_spill] sm:$0xff] }
 0x15b   : > { %v866_v33 = vmul.f32 %v2128_v41, %v865_v15  ;;  %v879_v24 = vmul.f32 %v861_v9, %v729_v36  ;;  %v3420_v58 = vld [vmem:[#allocation22_spill] sm:$0xff]  ;;  %v3421_v36 = vld [vmem:[#allocation23_spill] sm:$0xff] }
 0x15c   : > { %v3424_v15 = vld [vmem:[#allocation26_spill] sm:$0xff]  ;;  %v3425_v9 = vld [vmem:[#allocation27_spill] sm:$0xff] }
 0x15d   : > { %v2906_v50 = vadd.f32 %v880_v35, %v879_v24  ;;  %v867_v45 = vadd.f32 %v2128_v41, %v866_v33  ;;  %v3410_v33 = vld [vmem:[#allocation12_spill] sm:$0xff]  ;;  %v3411_v35 = vld [vmem:[#allocation13_spill] sm:$0xff]  ;;  %v3428_v34 = vld [vmem:[#allocation30_spill] sm:$0xff] }
 0x15e   : > { %v3426_v24 = vld [vmem:[#allocation28_spill] sm:$0xff]  ;;  %v3429_v10 = vld [vmem:[#allocation31_spill] sm:$0xff] }
 0x15f   : > { %2131 = vtanh.f32 %v2906_v50  ;;  %v871_v32 = vsel %vm870_vm10, %v2128_v41, %v867_v45  ;;  %v3413_v41 = vld [vmem:[#allocation15_spill] sm:$0xff]  ;;  %v3427_v45 = vld [vmem:[#allocation29_spill] sm:$0xff] }
 0x160   : > { %v876_v13 = vsel %vm873_vm11, %v875_v55, %v871_v32  ;;  %v3430_v32 = vld [vmem:[#allocation32_spill] sm:$0xff]  ;;  %v3431_v55 = vld [vmem:[#allocation33_spill] sm:$0xff] }
 0x165   : > { %v2132_v27 = vpop.eup %2131 }
 0x166   : > { %v883_v5 = vmul.f32 %v2132_v27, %v876_v13  ;;  %v3432_v27 = vld [vmem:[#allocation34_spill] sm:$0xff]  ;;  %v3433_v13 = vld [vmem:[#allocation35_spill] sm:$0xff] }
 0x168   : > { %884 = vst [vmem:[%s2299_s24] sm:$0xff] %v883_v5  ;;  %908 = vmatmul.f32.vlgmr.msra.gmra.mxu0 %v883_v5  ;;  %928 = vmatmul.f32.vlgmr.msra.gmra.mxu1 %v883_v5 }
 0x169   : > { %948 = vmatmul.f32.vlgmr.msra.gmra.mxu2 %v883_v5  ;;  %968 = vmatmul.f32.vlgmr.msra.gmra.mxu3 %v883_v5  ;;  %v3434_v5 = vld [vmem:[#allocation36_spill] sm:$0xff] }
 0x16a   : > { %1204 = vmatpush.msra.mxu0 %v2494_v37  ;;  %1224 = vmatpush.msra.mxu1 %v2496_v38 }
 0x16b   : > { %1244 = vmatpush.msra.mxu2 %v2498_v40  ;;  %1264 = vmatpush.msra.mxu3 %v2500_v42 }
 0x16c   : > { %1205 = vmatpush.msra.mxu0 %v2502_v43  ;;  %1225 = vmatpush.msra.mxu1 %v2504_v44 }
 0x16d   : > { %1245 = vmatpush.msra.mxu2 %v2506_v46  ;;  %1265 = vmatpush.msra.mxu3 %v2508_v47 }
 0x16e   : > { %1206 = vmatpush.msra.mxu0 %v2512_v48  ;;  %1226 = vmatpush.msra.mxu1 %v2514_v49 }
 0x16f   : > { %1246 = vmatpush.msra.mxu2 %v2517_v51  ;;  %1266 = vmatpush.msra.mxu3 %v2520_v52 }
 0x170   : > { %1207 = vmatpush.msra.mxu0 %v2529_v56  ;;  %1227 = vmatpush.msra.mxu1 %v2531_v57 }
 0x171   : > { %1247 = vmatpush.msra.mxu2 %v2534_v59  ;;  %1267 = vmatpush.msra.mxu3 %v2537_v61 }
 0x172   : > { %1208 = vmatpush.msra.mxu0 %v2539_v62  ;;  %1228 = vmatpush.msra.mxu1 %v2541_v63 }
 0x173   : > { %1248 = vmatpush.msra.mxu2 %v2543_v1  ;;  %1268 = vmatpush.msra.mxu3 %v2545_v2 }
 0x174   : > { %1209 = vmatpush.msra.mxu0 %v2549_v3  ;;  %1229 = vmatpush.msra.mxu1 %v2551_v4 }
 0x175   : > { %1249 = vmatpush.msra.mxu2 %v2554_v6  ;;  %1269 = vmatpush.msra.mxu3 %v2557_v7 }
 0x176   : > { %1210 = vmatpush.msra.mxu0 %v2566_v11  ;;  %1230 = vmatpush.msra.mxu1 %v2568_v12 }
 0x177   : > { %1250 = vmatpush.msra.mxu2 %v2571_v14  ;;  %1270 = vmatpush.msra.mxu3 %v2574_v16 }
 0x178   : > { %1211 = vmatpush.msra.mxu0 %v2576_v17  ;;  %1231 = vmatpush.msra.mxu1 %v2578_v18 }
 0x179   : > { %1251 = vmatpush.msra.mxu2 %v2580_v20  ;;  %1271 = vmatpush.msra.mxu3 %v2582_v21 }
 0x17a   : > { %1212 = vmatpush.msra.mxu0 %v2586_v22  ;;  %1232 = vmatpush.msra.mxu1 %v2588_v23 }
 0x17b   : > { %1252 = vmatpush.msra.mxu2 %v2591_v25  ;;  %1272 = vmatpush.msra.mxu3 %v2594_v26 }
 0x17c   : > { %1213 = vmatpush.msra.mxu0 %v2603_v30  ;;  %1233 = vmatpush.msra.mxu1 %v2605_v31 }
 0x17d   : > { %1253 = vmatpush.msra.mxu2 %v3410_v33  ;;  %1273 = vmatpush.msra.mxu3 %v3411_v35 }
 0x17e   : > { %1214 = vmatpush.msra.mxu0 %v3412_v0  ;;  %1234 = vmatpush.msra.mxu1 %v3413_v41 }
 0x17f   : > { %1254 = vmatpush.msra.mxu2 %v3414_v39  ;;  %1274 = vmatpush.msra.mxu3 %v3415_v54 }
 0x180   : > { %1215 = vmatpush.msra.mxu0 %v3416_v28  ;;  %1235 = vmatpush.msra.mxu1 %v3417_v8 }
 0x181   : > { %1255 = vmatpush.msra.mxu2 %v3418_v53  ;;  %1275 = vmatpush.msra.mxu3 %v3419_v19 }
 0x182   : > { %1216 = vmatpush.msra.mxu0 %v3420_v58  ;;  %1236 = vmatpush.msra.mxu1 %v3421_v36 }
 0x183   : > { %1256 = vmatpush.msra.mxu2 %v3422_v29  ;;  %1276 = vmatpush.msra.mxu3 %v3423_v60  ;;  %v3436_v60 = vld [vmem:[#allocation38_spill] sm:$0xff]  ;;  %v3437_v29 = vld [vmem:[#allocation39_spill] sm:$0xff] }
 0x184   : > { %1217 = vmatpush.msra.mxu0 %v3424_v15  ;;  %1237 = vmatpush.msra.mxu1 %v3425_v9  ;;  %v3435_v15 = vld [vmem:[#allocation37_spill] sm:$0xff] }
 0x185   : > { %1257 = vmatpush.msra.mxu2 %v3426_v24  ;;  %1277 = vmatpush.msra.mxu3 %v3427_v45 }
 0x186   : > { %1218 = vmatpush.msra.mxu0 %v3428_v34  ;;  %1238 = vmatpush.msra.mxu1 %v3429_v10 }
 0x187   : > { %1258 = vmatpush.msra.mxu2 %v3430_v32  ;;  %1278 = vmatpush.msra.mxu3 %v3431_v55  ;;  %v3438_v55 = vld [vmem:[#allocation40_spill] sm:$0xff] }
 0x188   : > { %1219 = vmatpush.msra.mxu0 %v3432_v27  ;;  %1239 = vmatpush.msra.mxu1 %v3433_v13 }
 0x189   : > { %1259 = vmatpush.msra.mxu2 %v3434_v5  ;;  %1279 = vmatpush.msra.mxu3 %v3435_v15 }
 0x1e5   : > { %v909_v9 = vpop.f32.mrf.mxu0  ;;  %v929_v24 = vpop.f32.mrf.mxu1 }
 0x1e6   : > { %v972_v45 = vadd.f32 %v909_v9, %v3436_v60  ;;  %v973_v34 = vadd.f32 %v929_v24, %v3437_v29  ;;  %v3439_v29 = vld [vmem:[#allocation41_spill] sm:$0xff] }
 0x1e8   : > { %v2076_v36 = vmul.f32 -1.442695, %v972_v45  ;;  %v2077_v10 = vmul.f32 -1.442695, %v973_v34 }
 0x1ea   : > { %2133 = vpow2.f32 %v2076_v36 }
 0x1eb   : > { %2135 = vpow2.f32 %v2077_v10 }
 0x1ec   : > { %v949_v32 = vpop.f32.mrf.mxu2  ;;  %v969_v15 = vpop.f32.mrf.mxu3 }
 0x1ed   : > { %v974_v58 = vadd.f32 %v949_v32, %v3438_v55  ;;  %v975_v24 = vadd.f32 %v969_v15, %v3439_v29 }
 0x1ef   : > { %v2078_v27 = vmul.f32 -1.442695, %v974_v58 }
 0x1f0   : > { %v2134_v19 = vpop.eup %2133 }
 0x1f1   : > { %v2136_v13 = vpop.eup %2135  ;;  %v985_v53 = vadd.f32 1.0, %v2134_v19  ;;  %2137 = vpow2.f32 %v2078_v27 }
 0x1f2   : > { %v986_v5 = vadd.f32 1.0, %v2136_v13 }
 0x1f3   : > { %2139 = vrcp.f32 %v985_v53  ;;  %v999_v58 = vand.u32 2147483648, %v985_v53  ;;  %v997_v27 = vand.u32 2147483647, %v985_v53  ;;  %vm993_vm14 = vweird.f32 %v985_v53 }
 0x1f4   : > { %2141 = vrcp.f32 %v986_v5  ;;  %v1014_v55 = vand.u32 2147483648, %v986_v5  ;;  %v1012_v28 = vand.u32 2147483647, %v986_v5  ;;  %vm1008_vm15 = vweird.f32 %v986_v5 }
 0x1f5   : > { %v1000_v29 = vor.u32 1.1754944e-38, %v999_v58  ;;  %vm998_vm2 = vcmp.eq.f32.partialorder %v997_v27, 8.507059e+37 }
 0x1f6   : > { %vm1013_vm3 = vcmp.eq.f32.partialorder %v1012_v28, 8.507059e+37 }
 0x1f7   : > { %v2138_v8 = vpop.eup %2137 }
 0x1f8   : > { %v987_v60 = vadd.f32 1.0, %v2138_v8 }
 0x1f9   : > { %v2140_v9 = vpop.eup %2139 }
 0x1fa   : > { %v2142_v45 = vpop.eup %2141  ;;  %v989_v36 = vmul.f32 %v2140_v9, %v985_v53  ;;  %2143 = vrcp.f32 %v987_v60  ;;  %vm994_vm12 = vweird.f32 %v2140_v9  ;;  %vm1023_vm5 = vweird.f32 %v987_v60 }
 0x1fb   : > { %v1004_v34 = vmul.f32 %v2142_v45, %v986_v5  ;;  %2145 = vtanh.f32 %v975_v24  ;;  %vm1009_vm13 = vweird.f32 %v2142_v45  ;;  %vm995_vm0 = vmor %vm993_vm14, %vm994_vm12 }
 0x1fc   : > { %v990_v10 = vsub.f32 1.0, %v989_v36  ;;  %vm1010_vm1 = vmor %vm1008_vm15, %vm1009_vm13  ;;  %v1015_v36 = vor.u32 1.1754944e-38, %v1014_v55 }
 0x1fd   : > { %v1005_v32 = vsub.f32 1.0, %v1004_v34 }
 0x1fe   : > { %v991_v19 = vmul.f32 %v2140_v9, %v990_v10 }
 0x1ff   : > { %v1006_v13 = vmul.f32 %v2142_v45, %v1005_v32 }
 0x200   : > { %v2144_v54 = vpop.eup %2143  ;;  %v992_v8 = vadd.f32 %v2140_v9, %v991_v19  ;;  %v1029_v19 = vand.u32 2147483648, %v987_v60 }
 0x201   : > { %v1019_v15 = vmul.f32 %v2144_v54, %v987_v60  ;;  %v1007_v39 = vadd.f32 %v2142_v45, %v1006_v13  ;;  %v2146_v24 = vpop.eup %2145  ;;  %vm1024_vm4 = vweird.f32 %v2144_v54  ;;  %v3447_v13 = vld [vmem:[#allocation19_spill] sm:$0xff] }
 0x202   : > { %v996_v34 = vsel %vm995_vm0, %v2140_v9, %v992_v8  ;;  %v1027_v9 = vand.u32 2147483647, %v987_v60  ;;  %vm1025_vm6 = vmor %vm1023_vm5, %vm1024_vm4  ;;  %v1030_v27 = vor.u32 1.1754944e-38, %v1029_v19  ;;  %v3445_v60 = vld [vmem:[#allocation17_spill] sm:$0xff]  ;;  %v3448_v8 = vld [vmem:[#allocation20_spill] sm:$0xff] }
 0x203   : > { %v1020_v41 = vsub.f32 1.0, %v1019_v15  ;;  %v1001_v10 = vsel %vm998_vm2, %v1000_v29, %v996_v34  ;;  %v1011_v0 = vsel %vm1010_vm1, %v2142_v45, %v1007_v39  ;;  %v3446_v45 = vld [vmem:[#allocation18_spill] sm:$0xff]  ;;  %v3449_v15 = vld [vmem:[#allocation21_spill] sm:$0xff]  ;;  %v3452_v34 = vld [vmem:[#allocation24_spill] sm:$0xff] }
 0x204   : > { %v1016_v32 = vsel %vm1013_vm3, %v1015_v36, %v1011_v0  ;;  %v1035_v35 = vmul.f32 %v2146_v24, %v1001_v10  ;;  %vm1028_vm7 = vcmp.eq.f32.partialorder %v1027_v9, 8.507059e+37  ;;  %v3450_v29 = vld [vmem:[#allocation22_spill] sm:$0xff]  ;;  %v3451_v36 = vld [vmem:[#allocation23_spill] sm:$0xff]  ;;  %v3453_v24 = vld [vmem:[#allocation25_spill] sm:$0xff] }
 0x205   : > { %v1021_v33 = vmul.f32 %v2144_v54, %v1020_v41  ;;  %v1034_v53 = vmul.f32 %v1016_v32, %v2906_v50  ;;  %v3440_v50 = vld [vmem:[#allocation12_spill] sm:$0xff]  ;;  %v3443_v41 = vld [vmem:[#allocation15_spill] sm:$0xff]  ;;  %v3454_v10 = vld [vmem:[#allocation26_spill] sm:$0xff] }
 0x206   : > { %v3455_v32 = vld [vmem:[#allocation27_spill] sm:$0xff]  ;;  %v3458_v19 = vld [vmem:[#allocation30_spill] sm:$0xff] }
 0x207   : > { %v2979_v5 = vadd.f32 %v1035_v35, %v1034_v53  ;;  %v1022_v58 = vadd.f32 %v2144_v54, %v1021_v33  ;;  %v3441_v33 = vld [vmem:[#allocation13_spill] sm:$0xff]  ;;  %v3442_v35 = vld [vmem:[#allocation14_spill] sm:$0xff]  ;;  %v3456_v53 = vld [vmem:[#allocation28_spill] sm:$0xff] }
 0x208   : > { %v3459_v9 = vld [vmem:[#allocation31_spill] sm:$0xff] }
 0x209   : > { %2147 = vtanh.f32 %v2979_v5  ;;  %v1026_v55 = vsel %vm1025_vm6, %v2144_v54, %v1022_v58  ;;  %v3444_v54 = vld [vmem:[#allocation16_spill] sm:$0xff]  ;;  %v3457_v58 = vld [vmem:[#allocation29_spill] sm:$0xff] }
 0x20a   : > { %v1031_v0 = vsel %vm1028_vm7, %v1030_v27, %v1026_v55  ;;  %v3460_v55 = vld [vmem:[#allocation32_spill] sm:$0xff]  ;;  %v3461_v27 = vld [vmem:[#allocation33_spill] sm:$0xff] }
 0x20f   : > { %v2148_v39 = vpop.eup %2147 }
 0x210   : > { %v1038_v28 = vmul.f32 %v2148_v39, %v1031_v0  ;;  %v3462_v39 = vld [vmem:[#allocation34_spill] sm:$0xff]  ;;  %v3463_v0 = vld [vmem:[#allocation35_spill] sm:$0xff] }
 0x212   : > { %2079 = vst [vmem:[%s2299_s24 + $0x8] sm:$0xff] %v1038_v28  ;;  %1064 = vmatmul.f32.vlgmr.msrb.gmra.mxu0 %v1038_v28  ;;  %1084 = vmatmul.f32.vlgmr.msrb.gmra.mxu1 %v1038_v28 }
 0x213   : > { %1104 = vmatmul.f32.vlgmr.msrb.gmra.mxu2 %v1038_v28  ;;  %1124 = vmatmul.f32.vlgmr.msrb.gmra.mxu3 %v1038_v28  ;;  %v3464_v28 = vld [vmem:[#allocation36_spill] sm:$0xff] }
 0x214   : > { %1360 = vmatpush.msrb.mxu0 %v2494_v37  ;;  %1380 = vmatpush.msrb.mxu1 %v2496_v38 }
 0x215   : > { %1400 = vmatpush.msrb.mxu2 %v2498_v40  ;;  %1420 = vmatpush.msrb.mxu3 %v2500_v42 }
 0x216   : > { %1361 = vmatpush.msrb.mxu0 %v2502_v43  ;;  %1381 = vmatpush.msrb.mxu1 %v2504_v44 }
 0x217   : > { %1401 = vmatpush.msrb.mxu2 %v2506_v46  ;;  %1421 = vmatpush.msrb.mxu3 %v2508_v47 }
 0x218   : > { %1362 = vmatpush.msrb.mxu0 %v2512_v48  ;;  %1382 = vmatpush.msrb.mxu1 %v2514_v49 }
 0x219   : > { %1402 = vmatpush.msrb.mxu2 %v2517_v51  ;;  %1422 = vmatpush.msrb.mxu3 %v2520_v52 }
 0x21a   : > { %1363 = vmatpush.msrb.mxu0 %v2529_v56  ;;  %1383 = vmatpush.msrb.mxu1 %v2531_v57 }
 0x21b   : > { %1403 = vmatpush.msrb.mxu2 %v2534_v59  ;;  %1423 = vmatpush.msrb.mxu3 %v2537_v61 }
 0x21c   : > { %1364 = vmatpush.msrb.mxu0 %v2539_v62  ;;  %1384 = vmatpush.msrb.mxu1 %v2541_v63 }
 0x21d   : > { %1404 = vmatpush.msrb.mxu2 %v2543_v1  ;;  %1424 = vmatpush.msrb.mxu3 %v2545_v2 }
 0x21e   : > { %1365 = vmatpush.msrb.mxu0 %v2549_v3  ;;  %1385 = vmatpush.msrb.mxu1 %v2551_v4 }
 0x21f   : > { %1405 = vmatpush.msrb.mxu2 %v2554_v6  ;;  %1425 = vmatpush.msrb.mxu3 %v2557_v7 }
 0x220   : > { %1366 = vmatpush.msrb.mxu0 %v2566_v11  ;;  %1386 = vmatpush.msrb.mxu1 %v2568_v12 }
 0x221   : > { %1406 = vmatpush.msrb.mxu2 %v2571_v14  ;;  %1426 = vmatpush.msrb.mxu3 %v2574_v16 }
 0x222   : > { %1367 = vmatpush.msrb.mxu0 %v2576_v17  ;;  %1387 = vmatpush.msrb.mxu1 %v2578_v18 }
 0x223   : > { %1407 = vmatpush.msrb.mxu2 %v2580_v20  ;;  %1427 = vmatpush.msrb.mxu3 %v2582_v21 }
 0x224   : > { %1368 = vmatpush.msrb.mxu0 %v2586_v22  ;;  %1388 = vmatpush.msrb.mxu1 %v2588_v23 }
 0x225   : > { %1408 = vmatpush.msrb.mxu2 %v2591_v25  ;;  %1428 = vmatpush.msrb.mxu3 %v2594_v26 }
 0x226   : > { %1369 = vmatpush.msrb.mxu0 %v2603_v30  ;;  %1389 = vmatpush.msrb.mxu1 %v2605_v31 }
 0x227   : > { %1409 = vmatpush.msrb.mxu2 %v3440_v50  ;;  %1429 = vmatpush.msrb.mxu3 %v3441_v33 }
 0x228   : > { %1370 = vmatpush.msrb.mxu0 %v3442_v35  ;;  %1390 = vmatpush.msrb.mxu1 %v3443_v41 }
 0x229   : > { %1410 = vmatpush.msrb.mxu2 %v3444_v54  ;;  %1430 = vmatpush.msrb.mxu3 %v3445_v60 }
 0x22a   : > { %1371 = vmatpush.msrb.mxu0 %v3446_v45  ;;  %1391 = vmatpush.msrb.mxu1 %v3447_v13 }
 0x22b   : > { %1411 = vmatpush.msrb.mxu2 %v3448_v8  ;;  %1431 = vmatpush.msrb.mxu3 %v3449_v15 }
 0x22c   : > { %1372 = vmatpush.msrb.mxu0 %v3450_v29  ;;  %1392 = vmatpush.msrb.mxu1 %v3451_v36 }
 0x22d   : > { %1412 = vmatpush.msrb.mxu2 %v3452_v34  ;;  %1432 = vmatpush.msrb.mxu3 %v3453_v24  ;;  %v3466_v24 = vld [vmem:[#allocation42_spill] sm:$0xff]  ;;  %v3467_v34 = vld [vmem:[#allocation43_spill] sm:$0xff] }
 0x22e   : > { %1373 = vmatpush.msrb.mxu0 %v3454_v10  ;;  %1393 = vmatpush.msrb.mxu1 %v3455_v32  ;;  %v3465_v10 = vld [vmem:[#allocation37_spill] sm:$0xff] }
 0x22f   : > { %1413 = vmatpush.msrb.mxu2 %v3456_v53  ;;  %1433 = vmatpush.msrb.mxu3 %v3457_v58 }
 0x230   : > { %1374 = vmatpush.msrb.mxu0 %v3458_v19  ;;  %1394 = vmatpush.msrb.mxu1 %v3459_v9 }
 0x231   : > { %1414 = vmatpush.msrb.mxu2 %v3460_v55  ;;  %1434 = vmatpush.msrb.mxu3 %v3461_v27  ;;  %v3468_v27 = vld [vmem:[#allocation44_spill] sm:$0xff] }
 0x232   : > { %1375 = vmatpush.msrb.mxu0 %v3462_v39  ;;  %1395 = vmatpush.msrb.mxu1 %v3463_v0 }
 0x233   : > { %1415 = vmatpush.msrb.mxu2 %v3464_v28  ;;  %1435 = vmatpush.msrb.mxu3 %v3465_v10 }
 0x28f   : > { %v1065_v32 = vpop.f32.mrf.mxu0  ;;  %v1085_v53 = vpop.f32.mrf.mxu1 }
 0x290   : > { %v1128_v58 = vadd.f32 %v1065_v32, %v3466_v24  ;;  %v1129_v19 = vadd.f32 %v1085_v53, %v3467_v34  ;;  %v3469_v34 = vld [vmem:[#allocation45_spill] sm:$0xff] }
 0x292   : > { %v2080_v36 = vmul.f32 -1.442695, %v1128_v58  ;;  %v2081_v9 = vmul.f32 -1.442695, %v1129_v19 }
 0x294   : > { %2149 = vpow2.f32 %v2080_v36 }
 0x295   : > { %2151 = vpow2.f32 %v2081_v9 }
 0x296   : > { %v1105_v55 = vpop.f32.mrf.mxu2  ;;  %v1125_v10 = vpop.f32.mrf.mxu3 }
 0x297   : > { %v1130_v29 = vadd.f32 %v1105_v55, %v3468_v27  ;;  %v1131_v53 = vadd.f32 %v1125_v10, %v3469_v34 }
 0x299   : > { %v2082_v39 = vmul.f32 -1.442695, %v1130_v29 }
 0x29a   : > { %v2150_v15 = vpop.eup %2149 }
 0x29b   : > { %v2152_v0 = vpop.eup %2151  ;;  %v1141_v8 = vadd.f32 1.0, %v2150_v15  ;;  %2153 = vpow2.f32 %v2082_v39 }
 0x29c   : > { %v1142_v28 = vadd.f32 1.0, %v2152_v0 }
 0x29d   : > { %2155 = vrcp.f32 %v1141_v8  ;;  %v1155_v29 = vand.u32 2147483648, %v1141_v8  ;;  %v1153_v39 = vand.u32 2147483647, %v1141_v8  ;;  %vm1149_vm10 = vweird.f32 %v1141_v8 }
 0x29e   : > { %2157 = vrcp.f32 %v1142_v28  ;;  %v1170_v27 = vand.u32 2147483648, %v1142_v28  ;;  %v1168_v45 = vand.u32 2147483647, %v1142_v28  ;;  %vm1164_vm11 = vweird.f32 %v1142_v28 }
 0x29f   : > { %v1156_v34 = vor.u32 1.1754944e-38, %v1155_v29  ;;  %vm1154_vm14 = vcmp.eq.f32.partialorder %v1153_v39, 8.507059e+37 }
 0x2a0   : > { %vm1169_vm15 = vcmp.eq.f32.partialorder %v1168_v45, 8.507059e+37 }
 0x2a1   : > { %v2154_v13 = vpop.eup %2153 }
 0x2a2   : > { %v1143_v24 = vadd.f32 1.0, %v2154_v13 }
 0x2a3   : > { %v2156_v32 = vpop.eup %2155 }
 0x2a4   : > { %v2158_v58 = vpop.eup %2157  ;;  %v1145_v36 = vmul.f32 %v2156_v32, %v1141_v8  ;;  %2159 = vrcp.f32 %v1143_v24  ;;  %vm1150_vm8 = vweird.f32 %v2156_v32  ;;  %vm1179_vm1 = vweird.f32 %v1143_v24 }
 0x2a5   : > { %v1160_v19 = vmul.f32 %v2158_v58, %v1142_v28  ;;  %2161 = vtanh.f32 %v1131_v53  ;;  %vm1165_vm9 = vweird.f32 %v2158_v58  ;;  %vm1151_vm12 = vmor %vm1149_vm10, %vm1150_vm8 }
 0x2a6   : > { %v1146_v9 = vsub.f32 1.0, %v1145_v36  ;;  %vm1166_vm13 = vmor %vm1164_vm11, %vm1165_vm9  ;;  %v1171_v36 = vor.u32 1.1754944e-38, %v1170_v27 }
 0x2a7   : > { %v1161_v55 = vsub.f32 1.0, %v1160_v19 }
 0x2a8   : > { %v1147_v15 = vmul.f32 %v2156_v32, %v1146_v9 }
 0x2a9   : > { %v1162_v0 = vmul.f32 %v2158_v58, %v1161_v55 }
 0x2aa   : > { %v2160_v60 = vpop.eup %2159  ;;  %v1148_v13 = vadd.f32 %v2156_v32, %v1147_v15  ;;  %v1185_v15 = vand.u32 2147483648, %v1143_v24 }
 0x2ab   : > { %v1175_v10 = vmul.f32 %v2160_v60, %v1143_v24  ;;  %v1163_v54 = vadd.f32 %v2158_v58, %v1162_v0  ;;  %v2162_v53 = vpop.eup %2161  ;;  %vm1180_vm0 = vweird.f32 %v2160_v60  ;;  %v3477_v0 = vld [vmem:[#allocation19_spill] sm:$0xff] }
 0x2ac   : > { %v1152_v19 = vsel %vm1151_vm12, %v2156_v32, %v1148_v13  ;;  %v1183_v32 = vand.u32 2147483647, %v1143_v24  ;;  %vm1181_vm2 = vmor %vm1179_vm1, %vm1180_vm0  ;;  %v1186_v39 = vor.u32 1.1754944e-38, %v1185_v15  ;;  %v3475_v24 = vld [vmem:[#allocation17_spill] sm:$0xff]  ;;  %v3478_v13 = vld [vmem:[#allocation20_spill] sm:$0xff] }
 0x2ad   : > { %v1176_v41 = vsub.f32 1.0, %v1175_v10  ;;  %v1157_v9 = vsel %vm1154_vm14, %v1156_v34, %v1152_v19  ;;  %v1167_v35 = vsel %vm1166_vm13, %v2158_v58, %v1163_v54  ;;  %v3476_v58 = vld [vmem:[#allocation18_spill] sm:$0xff]  ;;  %v3479_v10 = vld [vmem:[#allocation21_spill] sm:$0xff]  ;;  %v3482_v19 = vld [vmem:[#allocation24_spill] sm:$0xff] }
 0x2ae   : > { %v1172_v55 = vsel %vm1169_vm15, %v1171_v36, %v1167_v35  ;;  %v1191_v33 = vmul.f32 %v2162_v53, %v1157_v9  ;;  %vm1184_vm3 = vcmp.eq.f32.partialorder %v1183_v32, 8.507059e+37  ;;  %v3480_v34 = vld [vmem:[#allocation22_spill] sm:$0xff]  ;;  %v3481_v36 = vld [vmem:[#allocation23_spill] sm:$0xff]  ;;  %v3483_v53 = vld [vmem:[#allocation25_spill] sm:$0xff] }
 0x2af   : > { %v1177_v50 = vmul.f32 %v2160_v60, %v1176_v41  ;;  %v1190_v8 = vmul.f32 %v1172_v55, %v2979_v5  ;;  %v3470_v5 = vld [vmem:[#allocation12_spill] sm:$0xff]  ;;  %v3473_v41 = vld [vmem:[#allocation15_spill] sm:$0xff]  ;;  %v3484_v9 = vld [vmem:[#allocation26_spill] sm:$0xff] }
 0x2b0   : > { %v3485_v55 = vld [vmem:[#allocation27_spill] sm:$0xff]  ;;  %v3488_v15 = vld [vmem:[#allocation30_spill] sm:$0xff] }
 0x2b1   : > { %v3052_v28 = vadd.f32 %v1191_v33, %v1190_v8  ;;  %v1178_v29 = vadd.f32 %v2160_v60, %v1177_v50  ;;  %v3471_v50 = vld [vmem:[#allocation13_spill] sm:$0xff]  ;;  %v3472_v33 = vld [vmem:[#allocation14_spill] sm:$0xff]  ;;  %v3486_v8 = vld [vmem:[#allocation28_spill] sm:$0xff] }
 0x2b2   : > { %v3489_v32 = vld [vmem:[#allocation31_spill] sm:$0xff] }
 0x2b3   : > { %2163 = vtanh.f32 %v3052_v28  ;;  %v1182_v27 = vsel %vm1181_vm2, %v2160_v60, %v1178_v29  ;;  %v3474_v60 = vld [vmem:[#allocation16_spill] sm:$0xff]  ;;  %v3487_v29 = vld [vmem:[#allocation29_spill] sm:$0xff] }
 0x2b4   : > { %v1187_v35 = vsel %vm1184_vm3, %v1186_v39, %v1182_v27  ;;  %v3490_v27 = vld [vmem:[#allocation32_spill] sm:$0xff]  ;;  %v3491_v39 = vld [vmem:[#allocation33_spill] sm:$0xff] }
 0x2b9   : > { %v2164_v54 = vpop.eup %2163 }
 0x2ba   : > { %v1194_v45 = vmul.f32 %v2164_v54, %v1187_v35  ;;  %v3492_v54 = vld [vmem:[#allocation34_spill] sm:$0xff]  ;;  %v3493_v35 = vld [vmem:[#allocation35_spill] sm:$0xff] }
 0x2bc   : > { %2083 = vst [vmem:[%s2299_s24 + $0x10] sm:$0xff] %v1194_v45  ;;  %1220 = vmatmul.f32.vlgmr.msra.gmra.mxu0 %v1194_v45  ;;  %1240 = vmatmul.f32.vlgmr.msra.gmra.mxu1 %v1194_v45 }
 0x2bd   : > { %1260 = vmatmul.f32.vlgmr.msra.gmra.mxu2 %v1194_v45  ;;  %1280 = vmatmul.f32.vlgmr.msra.gmra.mxu3 %v1194_v45  ;;  %v3494_v45 = vld [vmem:[#allocation36_spill] sm:$0xff] }
 0x2be   : > { %1516 = vmatpush.msra.mxu0 %v2494_v37  ;;  %1536 = vmatpush.msra.mxu1 %v2496_v38 }
 0x2bf   : > { %1556 = vmatpush.msra.mxu2 %v2498_v40  ;;  %1576 = vmatpush.msra.mxu3 %v2500_v42 }
 0x2c0   : > { %1517 = vmatpush.msra.mxu0 %v2502_v43  ;;  %1537 = vmatpush.msra.mxu1 %v2504_v44 }
 0x2c1   : > { %1557 = vmatpush.msra.mxu2 %v2506_v46  ;;  %1577 = vmatpush.msra.mxu3 %v2508_v47 }
 0x2c2   : > { %1518 = vmatpush.msra.mxu0 %v2512_v48  ;;  %1538 = vmatpush.msra.mxu1 %v2514_v49 }
 0x2c3   : > { %1558 = vmatpush.msra.mxu2 %v2517_v51  ;;  %1578 = vmatpush.msra.mxu3 %v2520_v52 }
 0x2c4   : > { %1519 = vmatpush.msra.mxu0 %v2529_v56  ;;  %1539 = vmatpush.msra.mxu1 %v2531_v57 }
 0x2c5   : > { %1559 = vmatpush.msra.mxu2 %v2534_v59  ;;  %1579 = vmatpush.msra.mxu3 %v2537_v61 }
 0x2c6   : > { %1520 = vmatpush.msra.mxu0 %v2539_v62  ;;  %1540 = vmatpush.msra.mxu1 %v2541_v63 }
 0x2c7   : > { %1560 = vmatpush.msra.mxu2 %v2543_v1  ;;  %1580 = vmatpush.msra.mxu3 %v2545_v2 }
 0x2c8   : > { %1521 = vmatpush.msra.mxu0 %v2549_v3  ;;  %1541 = vmatpush.msra.mxu1 %v2551_v4 }
 0x2c9   : > { %1561 = vmatpush.msra.mxu2 %v2554_v6  ;;  %1581 = vmatpush.msra.mxu3 %v2557_v7 }
 0x2ca   : > { %1522 = vmatpush.msra.mxu0 %v2566_v11  ;;  %1542 = vmatpush.msra.mxu1 %v2568_v12 }
 0x2cb   : > { %1562 = vmatpush.msra.mxu2 %v2571_v14  ;;  %1582 = vmatpush.msra.mxu3 %v2574_v16 }
 0x2cc   : > { %1523 = vmatpush.msra.mxu0 %v2576_v17  ;;  %1543 = vmatpush.msra.mxu1 %v2578_v18 }
 0x2cd   : > { %1563 = vmatpush.msra.mxu2 %v2580_v20  ;;  %1583 = vmatpush.msra.mxu3 %v2582_v21 }
 0x2ce   : > { %1524 = vmatpush.msra.mxu0 %v2586_v22  ;;  %1544 = vmatpush.msra.mxu1 %v2588_v23 }
 0x2cf   : > { %1564 = vmatpush.msra.mxu2 %v2591_v25  ;;  %1584 = vmatpush.msra.mxu3 %v2594_v26 }
 0x2d0   : > { %1525 = vmatpush.msra.mxu0 %v2603_v30  ;;  %1545 = vmatpush.msra.mxu1 %v2605_v31 }
 0x2d1   : > { %1565 = vmatpush.msra.mxu2 %v3470_v5  ;;  %1585 = vmatpush.msra.mxu3 %v3471_v50 }
 0x2d2   : > { %1526 = vmatpush.msra.mxu0 %v3472_v33  ;;  %1546 = vmatpush.msra.mxu1 %v3473_v41 }
 0x2d3   : > { %1566 = vmatpush.msra.mxu2 %v3474_v60  ;;  %1586 = vmatpush.msra.mxu3 %v3475_v24 }
 0x2d4   : > { %1527 = vmatpush.msra.mxu0 %v3476_v58  ;;  %1547 = vmatpush.msra.mxu1 %v3477_v0 }
 0x2d5   : > { %1567 = vmatpush.msra.mxu2 %v3478_v13  ;;  %1587 = vmatpush.msra.mxu3 %v3479_v10 }
 0x2d6   : > { %1528 = vmatpush.msra.mxu0 %v3480_v34  ;;  %1548 = vmatpush.msra.mxu1 %v3481_v36 }
 0x2d7   : > { %1568 = vmatpush.msra.mxu2 %v3482_v19  ;;  %1588 = vmatpush.msra.mxu3 %v3483_v53  ;;  %v3496_v53 = vld [vmem:[#allocation46_spill] sm:$0xff]  ;;  %v3497_v19 = vld [vmem:[#allocation47_spill] sm:$0xff] }
 0x2d8   : > { %1529 = vmatpush.msra.mxu0 %v3484_v9  ;;  %1549 = vmatpush.msra.mxu1 %v3485_v55  ;;  %v3495_v9 = vld [vmem:[#allocation37_spill] sm:$0xff] }
 0x2d9   : > { %1569 = vmatpush.msra.mxu2 %v3486_v8  ;;  %1589 = vmatpush.msra.mxu3 %v3487_v29 }
 0x2da   : > { %1530 = vmatpush.msra.mxu0 %v3488_v15  ;;  %1550 = vmatpush.msra.mxu1 %v3489_v32 }
 0x2db   : > { %1570 = vmatpush.msra.mxu2 %v3490_v27  ;;  %1590 = vmatpush.msra.mxu3 %v3491_v39  ;;  %v3498_v39 = vld [vmem:[#allocation48_spill] sm:$0xff] }
 0x2dc   : > { %1531 = vmatpush.msra.mxu0 %v3492_v54  ;;  %1551 = vmatpush.msra.mxu1 %v3493_v35 }
 0x2dd   : > { %1571 = vmatpush.msra.mxu2 %v3494_v45  ;;  %1591 = vmatpush.msra.mxu3 %v3495_v9 }
 0x339   : > { %v1221_v55 = vpop.f32.mrf.mxu0  ;;  %v1241_v8 = vpop.f32.mrf.mxu1 }
 0x33a   : > { %v1284_v29 = vadd.f32 %v1221_v55, %v3496_v53  ;;  %v1285_v15 = vadd.f32 %v1241_v8, %v3497_v19  ;;  %v3499_v19 = vld [vmem:[#allocation49_spill] sm:$0xff] }
 0x33c   : > { %v2084_v36 = vmul.f32 -1.442695, %v1284_v29  ;;  %v2085_v32 = vmul.f32 -1.442695, %v1285_v15 }
 0x33e   : > { %2165 = vpow2.f32 %v2084_v36 }
 0x33f   : > { %2167 = vpow2.f32 %v2085_v32 }
 0x340   : > { %v1261_v27 = vpop.f32.mrf.mxu2  ;;  %v1281_v9 = vpop.f32.mrf.mxu3 }
 0x341   : > { %v1286_v34 = vadd.f32 %v1261_v27, %v3498_v39  ;;  %v1287_v8 = vadd.f32 %v1281_v9, %v3499_v19 }
 0x343   : > { %v2086_v54 = vmul.f32 -1.442695, %v1286_v34 }
 0x344   : > { %v2166_v10 = vpop.eup %2165 }
 0x345   : > { %v2168_v35 = vpop.eup %2167  ;;  %v1297_v13 = vadd.f32 1.0, %v2166_v10  ;;  %2169 = vpow2.f32 %v2086_v54 }
 0x346   : > { %v1298_v45 = vadd.f32 1.0, %v2168_v35 }
 0x347   : > { %2171 = vrcp.f32 %v1297_v13  ;;  %v1311_v34 = vand.u32 2147483648, %v1297_v13  ;;  %v1309_v54 = vand.u32 2147483647, %v1297_v13  ;;  %vm1305_vm6 = vweird.f32 %v1297_v13 }
 0x348   : > { %2173 = vrcp.f32 %v1298_v45  ;;  %v1326_v39 = vand.u32 2147483648, %v1298_v45  ;;  %v1324_v58 = vand.u32 2147483647, %v1298_v45  ;;  %vm1320_vm7 = vweird.f32 %v1298_v45 }
 0x349   : > { %v1312_v19 = vor.u32 1.1754944e-38, %v1311_v34  ;;  %vm1310_vm10 = vcmp.eq.f32.partialorder %v1309_v54, 8.507059e+37 }
 0x34a   : > { %vm1325_vm11 = vcmp.eq.f32.partialorder %v1324_v58, 8.507059e+37 }
 0x34b   : > { %v2170_v0 = vpop.eup %2169 }
 0x34c   : > { %v1299_v53 = vadd.f32 1.0, %v2170_v0 }
 0x34d   : > { %v2172_v55 = vpop.eup %2171 }
 0x34e   : > { %v2174_v29 = vpop.eup %2173  ;;  %v1301_v36 = vmul.f32 %v2172_v55, %v1297_v13  ;;  %2175 = vrcp.f32 %v1299_v53  ;;  %vm1306_vm4 = vweird.f32 %v2172_v55  ;;  %vm1335_vm13 = vweird.f32 %v1299_v53 }
 0x34f   : > { %v1316_v15 = vmul.f32 %v2174_v29, %v1298_v45  ;;  %2177 = vtanh.f32 %v1287_v8  ;;  %vm1321_vm5 = vweird.f32 %v2174_v29  ;;  %vm1307_vm8 = vmor %vm1305_vm6, %vm1306_vm4 }
 0x350   : > { %v1302_v32 = vsub.f32 1.0, %v1301_v36  ;;  %vm1322_vm9 = vmor %vm1320_vm7, %vm1321_vm5  ;;  %v1327_v36 = vor.u32 1.1754944e-38, %v1326_v39 }
 0x351   : > { %v1317_v27 = vsub.f32 1.0, %v1316_v15 }
 0x352   : > { %v1303_v10 = vmul.f32 %v2172_v55, %v1302_v32 }
 0x353   : > { %v1318_v35 = vmul.f32 %v2174_v29, %v1317_v27 }
 0x354   : > { %v2176_v24 = vpop.eup %2175  ;;  %v1304_v0 = vadd.f32 %v2172_v55, %v1303_v10  ;;  %v1341_v10 = vand.u32 2147483648, %v1299_v53 }
 0x355   : > { %v1331_v9 = vmul.f32 %v2176_v24, %v1299_v53  ;;  %v1319_v60 = vadd.f32 %v2174_v29, %v1318_v35  ;;  %v2178_v8 = vpop.eup %2177  ;;  %vm1336_vm12 = vweird.f32 %v2176_v24  ;;  %v3507_v35 = vld [vmem:[#allocation19_spill] sm:$0xff] }
 0x356   : > { %v1308_v15 = vsel %vm1307_vm8, %v2172_v55, %v1304_v0  ;;  %v1339_v55 = vand.u32 2147483647, %v1299_v53  ;;  %vm1337_vm14 = vmor %vm1335_vm13, %vm1336_vm12  ;;  %v1342_v54 = vor.u32 1.1754944e-38, %v1341_v10  ;;  %v3505_v53 = vld [vmem:[#allocation17_spill] sm:$0xff]  ;;  %v3508_v0 = vld [vmem:[#allocation20_spill] sm:$0xff] }
 0x357   : > { %v1332_v41 = vsub.f32 1.0, %v1331_v9  ;;  %v1313_v32 = vsel %vm1310_vm10, %v1312_v19, %v1308_v15  ;;  %v1323_v33 = vsel %vm1322_vm9, %v2174_v29, %v1319_v60  ;;  %v3506_v29 = vld [vmem:[#allocation18_spill] sm:$0xff]  ;;  %v3509_v9 = vld [vmem:[#allocation21_spill] sm:$0xff]  ;;  %v3512_v15 = vld [vmem:[#allocation24_spill] sm:$0xff] }
 0x358   : > { %v1328_v27 = vsel %vm1325_vm11, %v1327_v36, %v1323_v33  ;;  %v1347_v50 = vmul.f32 %v2178_v8, %v1313_v32  ;;  %vm1340_vm15 = vcmp.eq.f32.partialorder %v1339_v55, 8.507059e+37  ;;  %v3510_v19 = vld [vmem:[#allocation22_spill] sm:$0xff]  ;;  %v3511_v36 = vld [vmem:[#allocation23_spill] sm:$0xff]  ;;  %v3513_v8 = vld [vmem:[#allocation25_spill] sm:$0xff] }
 0x359   : > { %v1333_v5 = vmul.f32 %v2176_v24, %v1332_v41  ;;  %v1346_v13 = vmul.f32 %v1328_v27, %v3052_v28  ;;  %v3500_v28 = vld [vmem:[#allocation12_spill] sm:$0xff]  ;;  %v3503_v41 = vld [vmem:[#allocation15_spill] sm:$0xff]  ;;  %v3514_v32 = vld [vmem:[#allocation26_spill] sm:$0xff] }
 0x35a   : > { %v3515_v27 = vld [vmem:[#allocation27_spill] sm:$0xff]  ;;  %v3518_v10 = vld [vmem:[#allocation30_spill] sm:$0xff] }
 0x35b   : > { %v3125_v45 = vadd.f32 %v1347_v50, %v1346_v13  ;;  %v1334_v34 = vadd.f32 %v2176_v24, %v1333_v5  ;;  %v3501_v5 = vld [vmem:[#allocation13_spill] sm:$0xff]  ;;  %v3502_v50 = vld [vmem:[#allocation14_spill] sm:$0xff]  ;;  %v3516_v13 = vld [vmem:[#allocation28_spill] sm:$0xff] }
 0x35c   : > { %v3519_v55 = vld [vmem:[#allocation31_spill] sm:$0xff] }
 0x35d   : > { %2179 = vtanh.f32 %v3125_v45  ;;  %v1338_v39 = vsel %vm1337_vm14, %v2176_v24, %v1334_v34  ;;  %v3504_v24 = vld [vmem:[#allocation16_spill] sm:$0xff]  ;;  %v3517_v34 = vld [vmem:[#allocation29_spill] sm:$0xff] }
 0x35e   : > { %v1343_v33 = vsel %vm1340_vm15, %v1342_v54, %v1338_v39  ;;  %v3520_v39 = vld [vmem:[#allocation32_spill] sm:$0xff]  ;;  %v3521_v54 = vld [vmem:[#allocation33_spill] sm:$0xff] }
 0x363   : > { %v2180_v60 = vpop.eup %2179 }
 0x364   : > { %v1350_v58 = vmul.f32 %v2180_v60, %v1343_v33  ;;  %v3522_v60 = vld [vmem:[#allocation34_spill] sm:$0xff]  ;;  %v3523_v33 = vld [vmem:[#allocation35_spill] sm:$0xff] }
 0x366   : > { %2087 = vst [vmem:[%s2299_s24 + $0x18] sm:$0xff] %v1350_v58  ;;  %1376 = vmatmul.f32.vlgmr.msrb.gmra.mxu0 %v1350_v58  ;;  %1396 = vmatmul.f32.vlgmr.msrb.gmra.mxu1 %v1350_v58 }
 0x367   : > { %1416 = vmatmul.f32.vlgmr.msrb.gmra.mxu2 %v1350_v58  ;;  %1436 = vmatmul.f32.vlgmr.msrb.gmra.mxu3 %v1350_v58  ;;  %v3524_v58 = vld [vmem:[#allocation36_spill] sm:$0xff] }
 0x368   : > { %1672 = vmatpush.msrb.mxu0 %v2494_v37  ;;  %1692 = vmatpush.msrb.mxu1 %v2496_v38 }
 0x369   : > { %1712 = vmatpush.msrb.mxu2 %v2498_v40  ;;  %1732 = vmatpush.msrb.mxu3 %v2500_v42 }
 0x36a   : > { %1673 = vmatpush.msrb.mxu0 %v2502_v43  ;;  %1693 = vmatpush.msrb.mxu1 %v2504_v44 }
 0x36b   : > { %1713 = vmatpush.msrb.mxu2 %v2506_v46  ;;  %1733 = vmatpush.msrb.mxu3 %v2508_v47 }
 0x36c   : > { %1674 = vmatpush.msrb.mxu0 %v2512_v48  ;;  %1694 = vmatpush.msrb.mxu1 %v2514_v49 }
 0x36d   : > { %1714 = vmatpush.msrb.mxu2 %v2517_v51  ;;  %1734 = vmatpush.msrb.mxu3 %v2520_v52 }
 0x36e   : > { %1675 = vmatpush.msrb.mxu0 %v2529_v56  ;;  %1695 = vmatpush.msrb.mxu1 %v2531_v57 }
 0x36f   : > { %1715 = vmatpush.msrb.mxu2 %v2534_v59  ;;  %1735 = vmatpush.msrb.mxu3 %v2537_v61 }
 0x370   : > { %1676 = vmatpush.msrb.mxu0 %v2539_v62  ;;  %1696 = vmatpush.msrb.mxu1 %v2541_v63 }
 0x371   : > { %1716 = vmatpush.msrb.mxu2 %v2543_v1  ;;  %1736 = vmatpush.msrb.mxu3 %v2545_v2 }
 0x372   : > { %1677 = vmatpush.msrb.mxu0 %v2549_v3  ;;  %1697 = vmatpush.msrb.mxu1 %v2551_v4 }
 0x373   : > { %1717 = vmatpush.msrb.mxu2 %v2554_v6  ;;  %1737 = vmatpush.msrb.mxu3 %v2557_v7 }
 0x374   : > { %1678 = vmatpush.msrb.mxu0 %v2566_v11  ;;  %1698 = vmatpush.msrb.mxu1 %v2568_v12 }
 0x375   : > { %1718 = vmatpush.msrb.mxu2 %v2571_v14  ;;  %1738 = vmatpush.msrb.mxu3 %v2574_v16 }
 0x376   : > { %1679 = vmatpush.msrb.mxu0 %v2576_v17  ;;  %1699 = vmatpush.msrb.mxu1 %v2578_v18 }
 0x377   : > { %1719 = vmatpush.msrb.mxu2 %v2580_v20  ;;  %1739 = vmatpush.msrb.mxu3 %v2582_v21 }
 0x378   : > { %1680 = vmatpush.msrb.mxu0 %v2586_v22  ;;  %1700 = vmatpush.msrb.mxu1 %v2588_v23 }
 0x379   : > { %1720 = vmatpush.msrb.mxu2 %v2591_v25  ;;  %1740 = vmatpush.msrb.mxu3 %v2594_v26 }
 0x37a   : > { %1681 = vmatpush.msrb.mxu0 %v2603_v30  ;;  %1701 = vmatpush.msrb.mxu1 %v2605_v31 }
 0x37b   : > { %1721 = vmatpush.msrb.mxu2 %v3500_v28  ;;  %1741 = vmatpush.msrb.mxu3 %v3501_v5 }
 0x37c   : > { %1682 = vmatpush.msrb.mxu0 %v3502_v50  ;;  %1702 = vmatpush.msrb.mxu1 %v3503_v41 }
 0x37d   : > { %1722 = vmatpush.msrb.mxu2 %v3504_v24  ;;  %1742 = vmatpush.msrb.mxu3 %v3505_v53 }
 0x37e   : > { %1683 = vmatpush.msrb.mxu0 %v3506_v29  ;;  %1703 = vmatpush.msrb.mxu1 %v3507_v35 }
 0x37f   : > { %1723 = vmatpush.msrb.mxu2 %v3508_v0  ;;  %1743 = vmatpush.msrb.mxu3 %v3509_v9 }
 0x380   : > { %1684 = vmatpush.msrb.mxu0 %v3510_v19  ;;  %1704 = vmatpush.msrb.mxu1 %v3511_v36 }
 0x381   : > { %1724 = vmatpush.msrb.mxu2 %v3512_v15  ;;  %1744 = vmatpush.msrb.mxu3 %v3513_v8  ;;  %v3526_v8 = vld [vmem:[#allocation50_spill] sm:$0xff]  ;;  %v3527_v15 = vld [vmem:[#allocation51_spill] sm:$0xff] }
 0x382   : > { %1685 = vmatpush.msrb.mxu0 %v3514_v32  ;;  %1705 = vmatpush.msrb.mxu1 %v3515_v27  ;;  %v3525_v32 = vld [vmem:[#allocation37_spill] sm:$0xff] }
 0x383   : > { %1725 = vmatpush.msrb.mxu2 %v3516_v13  ;;  %1745 = vmatpush.msrb.mxu3 %v3517_v34 }
 0x384   : > { %1686 = vmatpush.msrb.mxu0 %v3518_v10  ;;  %1706 = vmatpush.msrb.mxu1 %v3519_v55 }
 0x385   : > { %1726 = vmatpush.msrb.mxu2 %v3520_v39  ;;  %1746 = vmatpush.msrb.mxu3 %v3521_v54  ;;  %v3528_v54 = vld [vmem:[#allocation52_spill] sm:$0xff] }
 0x386   : > { %1687 = vmatpush.msrb.mxu0 %v3522_v60  ;;  %1707 = vmatpush.msrb.mxu1 %v3523_v33 }
 0x387   : > { %1727 = vmatpush.msrb.mxu2 %v3524_v58  ;;  %1747 = vmatpush.msrb.mxu3 %v3525_v32 }
 0x3e3   : > { %v1377_v27 = vpop.f32.mrf.mxu0  ;;  %v1397_v13 = vpop.f32.mrf.mxu1 }
 0x3e4   : > { %v1440_v34 = vadd.f32 %v1377_v27, %v3526_v8  ;;  %v1441_v10 = vadd.f32 %v1397_v13, %v3527_v15  ;;  %v3529_v15 = vld [vmem:[#allocation53_spill] sm:$0xff] }
 0x3e6   : > { %v2088_v36 = vmul.f32 -1.442695, %v1440_v34  ;;  %v2089_v55 = vmul.f32 -1.442695, %v1441_v10 }
 0x3e8   : > { %2181 = vpow2.f32 %v2088_v36 }
 0x3e9   : > { %2183 = vpow2.f32 %v2089_v55 }
 0x3ea   : > { %v1417_v39 = vpop.f32.mrf.mxu2  ;;  %v1437_v32 = vpop.f32.mrf.mxu3 }
 0x3eb   : > { %v1442_v19 = vadd.f32 %v1417_v39, %v3528_v54  ;;  %v1443_v13 = vadd.f32 %v1437_v32, %v3529_v15 }
 0x3ed   : > { %v2090_v60 = vmul.f32 -1.442695, %v1442_v19 }
 0x3ee   : > { %v2182_v9 = vpop.eup %2181 }
 0x3ef   : > { %v2184_v33 = vpop.eup %2183  ;;  %v1453_v0 = vadd.f32 1.0, %v2182_v9  ;;  %2185 = vpow2.f32 %v2090_v60 }
 0x3f0   : > { %v1454_v58 = vadd.f32 1.0, %v2184_v33 }
 0x3f1   : > { %2187 = vrcp.f32 %v1453_v0  ;;  %v1467_v19 = vand.u32 2147483648, %v1453_v0  ;;  %v1465_v60 = vand.u32 2147483647, %v1453_v0  ;;  %vm1461_vm2 = vweird.f32 %v1453_v0 }
 0x3f2   : > { %2189 = vrcp.f32 %v1454_v58  ;;  %v1482_v54 = vand.u32 2147483648, %v1454_v58  ;;  %v1480_v29 = vand.u32 2147483647, %v1454_v58  ;;  %vm1476_vm3 = vweird.f32 %v1454_v58 }
 0x3f3   : > { %v1468_v15 = vor.u32 1.1754944e-38, %v1467_v19  ;;  %vm1466_vm6 = vcmp.eq.f32.partialorder %v1465_v60, 8.507059e+37 }
 0x3f4   : > { %vm1481_vm7 = vcmp.eq.f32.partialorder %v1480_v29, 8.507059e+37 }
 0x3f5   : > { %v2186_v35 = vpop.eup %2185 }
 0x3f6   : > { %v1455_v8 = vadd.f32 1.0, %v2186_v35 }
 0x3f7   : > { %v2188_v27 = vpop.eup %2187 }
 0x3f8   : > { %v2190_v34 = vpop.eup %2189  ;;  %v1457_v36 = vmul.f32 %v2188_v27, %v1453_v0  ;;  %2191 = vrcp.f32 %v1455_v8  ;;  %vm1462_vm0 = vweird.f32 %v2188_v27  ;;  %vm1491_vm9 = vweird.f32 %v1455_v8 }
 0x3f9   : > { %v1472_v10 = vmul.f32 %v2190_v34, %v1454_v58  ;;  %2193 = vtanh.f32 %v1443_v13  ;;  %vm1477_vm1 = vweird.f32 %v2190_v34  ;;  %vm1463_vm4 = vmor %vm1461_vm2, %vm1462_vm0 }
 0x3fa   : > { %v1458_v55 = vsub.f32 1.0, %v1457_v36  ;;  %vm1478_vm5 = vmor %vm1476_vm3, %vm1477_vm1  ;;  %v1483_v36 = vor.u32 1.1754944e-38, %v1482_v54 }
 0x3fb   : > { %v1473_v39 = vsub.f32 1.0, %v1472_v10 }
 0x3fc   : > { %v1459_v9 = vmul.f32 %v2188_v27, %v1458_v55 }
 0x3fd   : > { %v1474_v33 = vmul.f32 %v2190_v34, %v1473_v39 }
 0x3fe   : > { %v2192_v53 = vpop.eup %2191  ;;  %v1460_v35 = vadd.f32 %v2188_v27, %v1459_v9  ;;  %v1497_v9 = vand.u32 2147483648, %v1455_v8 }
 0x3ff   : > { %v1487_v32 = vmul.f32 %v2192_v53, %v1455_v8  ;;  %v1475_v24 = vadd.f32 %v2190_v34, %v1474_v33  ;;  %v2194_v13 = vpop.eup %2193  ;;  %vm1492_vm8 = vweird.f32 %v2192_v53 }
 0x400   : > { %v1464_v10 = vsel %vm1463_vm4, %v2188_v27, %v1460_v35  ;;  %v1495_v27 = vand.u32 2147483647, %v1455_v8  ;;  %vm1493_vm10 = vmor %vm1491_vm9, %vm1492_vm8  ;;  %v1498_v60 = vor.u32 1.1754944e-38, %v1497_v9  ;;  %v3559_v35 = vld [vmem:[#allocation57_spill] sm:$0xff] }
 0x401   : > { %v1488_v41 = vsub.f32 1.0, %v1487_v32  ;;  %v1469_v55 = vsel %vm1466_vm6, %v1468_v15, %v1464_v10  ;;  %v1479_v50 = vsel %vm1478_vm5, %v2190_v34, %v1475_v24 }
 0x402   : > { %v1484_v39 = vsel %vm1481_vm7, %v1483_v36, %v1479_v50  ;;  %v1503_v5 = vmul.f32 %v2194_v13, %v1469_v55  ;;  %vm1496_vm11 = vcmp.eq.f32.partialorder %v1495_v27, 8.507059e+37 }
 0x403   : > { %v1489_v28 = vmul.f32 %v2192_v53, %v1488_v41  ;;  %v1502_v0 = vmul.f32 %v1484_v39, %v3125_v45 }
 0x405   : > { %v3198_v58 = vadd.f32 %v1503_v5, %v1502_v0  ;;  %v1490_v19 = vadd.f32 %v2192_v53, %v1489_v28 }
 0x407   : > { %2195 = vtanh.f32 %v3198_v58  ;;  %v1494_v54 = vsel %vm1493_vm10, %v2192_v53, %v1490_v19 }
 0x408   : > { %v1499_v50 = vsel %vm1496_vm11, %v1498_v60, %v1494_v54 }
 0x40d   : > { %v2196_v24 = vpop.eup %2195 }
 0x40e   : > { %v1506_v29 = vmul.f32 %v2196_v24, %v1499_v50 }
 0x410   : > { %2091 = vst [vmem:[%s2299_s24 + $0x20] sm:$0xff] %v1506_v29  ;;  %1532 = vmatmul.f32.vlgmr.msra.gmra.mxu0 %v1506_v29  ;;  %1552 = vmatmul.f32.vlgmr.msra.gmra.mxu1 %v1506_v29 }
 0x411   : > { %1572 = vmatmul.f32.vlgmr.msra.gmra.mxu2 %v1506_v29  ;;  %1592 = vmatmul.f32.vlgmr.msra.gmra.mxu3 %v1506_v29 }
 0x412   : > { %1828 = vmatpush.msra.mxu0 %v2494_v37  ;;  %1848 = vmatpush.msra.mxu1 %v2496_v38  ;;  %v3530_v37 = vld [vmem:[#allocation12_spill] sm:$0xff]  ;;  %v3531_v38 = vld [vmem:[#allocation13_spill] sm:$0xff] }
 0x413   : > { %1868 = vmatpush.msra.mxu2 %v2498_v40  ;;  %1888 = vmatpush.msra.mxu3 %v2500_v42  ;;  %v3532_v40 = vld [vmem:[#allocation14_spill] sm:$0xff]  ;;  %v3533_v42 = vld [vmem:[#allocation15_spill] sm:$0xff] }
 0x414   : > { %1829 = vmatpush.msra.mxu0 %v2502_v43  ;;  %1849 = vmatpush.msra.mxu1 %v2504_v44  ;;  %v3534_v43 = vld [vmem:[#allocation16_spill] sm:$0xff]  ;;  %v3535_v44 = vld [vmem:[#allocation17_spill] sm:$0xff] }
 0x415   : > { %1869 = vmatpush.msra.mxu2 %v2506_v46  ;;  %1889 = vmatpush.msra.mxu3 %v2508_v47  ;;  %v3536_v46 = vld [vmem:[#allocation18_spill] sm:$0xff]  ;;  %v3537_v47 = vld [vmem:[#allocation19_spill] sm:$0xff] }
 0x416   : > { %1830 = vmatpush.msra.mxu0 %v2512_v48  ;;  %1850 = vmatpush.msra.mxu1 %v2514_v49  ;;  %v3538_v48 = vld [vmem:[#allocation20_spill] sm:$0xff]  ;;  %v3539_v49 = vld [vmem:[#allocation21_spill] sm:$0xff] }
 0x417   : > { %1870 = vmatpush.msra.mxu2 %v2517_v51  ;;  %1890 = vmatpush.msra.mxu3 %v2520_v52  ;;  %v3540_v51 = vld [vmem:[#allocation22_spill] sm:$0xff]  ;;  %v3541_v52 = vld [vmem:[#allocation23_spill] sm:$0xff] }
 0x418   : > { %1831 = vmatpush.msra.mxu0 %v2529_v56  ;;  %1851 = vmatpush.msra.mxu1 %v2531_v57  ;;  %v3542_v56 = vld [vmem:[#allocation24_spill] sm:$0xff]  ;;  %v3543_v57 = vld [vmem:[#allocation25_spill] sm:$0xff] }
 0x419   : > { %1871 = vmatpush.msra.mxu2 %v2534_v59  ;;  %1891 = vmatpush.msra.mxu3 %v2537_v61  ;;  %v3544_v59 = vld [vmem:[#allocation26_spill] sm:$0xff]  ;;  %v3545_v61 = vld [vmem:[#allocation27_spill] sm:$0xff] }
 0x41a   : > { %1832 = vmatpush.msra.mxu0 %v2539_v62  ;;  %1852 = vmatpush.msra.mxu1 %v2541_v63  ;;  %v3546_v62 = vld [vmem:[#allocation28_spill] sm:$0xff]  ;;  %v3547_v63 = vld [vmem:[#allocation29_spill] sm:$0xff] }
 0x41b   : > { %1872 = vmatpush.msra.mxu2 %v2543_v1  ;;  %1892 = vmatpush.msra.mxu3 %v2545_v2  ;;  %v3548_v1 = vld [vmem:[#allocation30_spill] sm:$0xff]  ;;  %v3549_v2 = vld [vmem:[#allocation31_spill] sm:$0xff] }
 0x41c   : > { %1833 = vmatpush.msra.mxu0 %v2549_v3  ;;  %1853 = vmatpush.msra.mxu1 %v2551_v4  ;;  %v3550_v3 = vld [vmem:[#allocation32_spill] sm:$0xff]  ;;  %v3551_v4 = vld [vmem:[#allocation33_spill] sm:$0xff] }
 0x41d   : > { %1873 = vmatpush.msra.mxu2 %v2554_v6  ;;  %1893 = vmatpush.msra.mxu3 %v2557_v7  ;;  %v3552_v6 = vld [vmem:[#allocation34_spill] sm:$0xff]  ;;  %v3553_v7 = vld [vmem:[#allocation35_spill] sm:$0xff] }
 0x41e   : > { %1834 = vmatpush.msra.mxu0 %v2566_v11  ;;  %1854 = vmatpush.msra.mxu1 %v2568_v12  ;;  %v3554_v11 = vld [vmem:[#allocation36_spill] sm:$0xff]  ;;  %v3555_v12 = vld [vmem:[#allocation37_spill] sm:$0xff] }
 0x41f   : > { %1874 = vmatpush.msra.mxu2 %v2571_v14  ;;  %1894 = vmatpush.msra.mxu3 %v2574_v16 }
 0x420   : > { %1835 = vmatpush.msra.mxu0 %v2576_v17  ;;  %1855 = vmatpush.msra.mxu1 %v2578_v18  ;;  %v3556_v17 = vld [vmem:[#allocation54_spill] sm:$0xff] }
 0x421   : > { %1875 = vmatpush.msra.mxu2 %v2580_v20  ;;  %1895 = vmatpush.msra.mxu3 %v2582_v21  ;;  %v3557_v20 = vld [vmem:[#allocation55_spill] sm:$0xff] }
 0x422   : > { %1836 = vmatpush.msra.mxu0 %v2586_v22  ;;  %1856 = vmatpush.msra.mxu1 %v2588_v23 }
 0x423   : > { %1876 = vmatpush.msra.mxu2 %v2591_v25  ;;  %1896 = vmatpush.msra.mxu3 %v2594_v26  ;;  %v3558_v26 = vld [vmem:[#allocation56_spill] sm:$0xff] }
 0x424   : > { %1837 = vmatpush.msra.mxu0 %v2603_v30  ;;  %1857 = vmatpush.msra.mxu1 %v2605_v31 }
 0x425   : > { %1877 = vmatpush.msra.mxu2 %v3530_v37  ;;  %1897 = vmatpush.msra.mxu3 %v3531_v38 }
 0x426   : > { %1838 = vmatpush.msra.mxu0 %v3532_v40  ;;  %1858 = vmatpush.msra.mxu1 %v3533_v42 }
 0x427   : > { %1878 = vmatpush.msra.mxu2 %v3534_v43  ;;  %1898 = vmatpush.msra.mxu3 %v3535_v44 }
 0x428   : > { %1839 = vmatpush.msra.mxu0 %v3536_v46  ;;  %1859 = vmatpush.msra.mxu1 %v3537_v47 }
 0x429   : > { %1879 = vmatpush.msra.mxu2 %v3538_v48  ;;  %1899 = vmatpush.msra.mxu3 %v3539_v49 }
 0x42a   : > { %1840 = vmatpush.msra.mxu0 %v3540_v51  ;;  %1860 = vmatpush.msra.mxu1 %v3541_v52 }
 0x42b   : > { %1880 = vmatpush.msra.mxu2 %v3542_v56  ;;  %1900 = vmatpush.msra.mxu3 %v3543_v57 }
 0x42c   : > { %1841 = vmatpush.msra.mxu0 %v3544_v59  ;;  %1861 = vmatpush.msra.mxu1 %v3545_v61 }
 0x42d   : > { %1881 = vmatpush.msra.mxu2 %v3546_v62  ;;  %1901 = vmatpush.msra.mxu3 %v3547_v63 }
 0x42e   : > { %1842 = vmatpush.msra.mxu0 %v3548_v1  ;;  %1862 = vmatpush.msra.mxu1 %v3549_v2 }
 0x42f   : > { %1882 = vmatpush.msra.mxu2 %v3550_v3  ;;  %1902 = vmatpush.msra.mxu3 %v3551_v4  ;;  %v3560_v4 = vld [vmem:[#allocation58_spill] sm:$0xff] }
 0x430   : > { %1843 = vmatpush.msra.mxu0 %v3552_v6  ;;  %1863 = vmatpush.msra.mxu1 %v3553_v7  ;;  %v3561_v7 = vld [vmem:[#allocation59_spill] sm:$0xff] }
 0x431   : > { %1883 = vmatpush.msra.mxu2 %v3554_v11  ;;  %1903 = vmatpush.msra.mxu3 %v3555_v12 }
 0x48d   : > { %v1533_v14 = vpop.f32.mrf.mxu0  ;;  %v1553_v16 = vpop.f32.mrf.mxu1 }
 0x48e   : > { %v1596_v18 = vadd.f32 %v1533_v14, %v3556_v17  ;;  %v1597_v21 = vadd.f32 %v1553_v16, %v3557_v20  ;;  %v3562_v17 = vld [vmem:[#allocation60_spill] sm:$0xff] }
 0x490   : > { %v2092_v22 = vmul.f32 -1.442695, %v1596_v18  ;;  %v2093_v23 = vmul.f32 -1.442695, %v1597_v21 }
 0x492   : > { %2197 = vpow2.f32 %v2092_v22 }
 0x493   : > { %2199 = vpow2.f32 %v2093_v23 }
 0x494   : > { %v1573_v25 = vpop.f32.mrf.mxu2  ;;  %v1593_v53 = vpop.f32.mrf.mxu3 }
 0x495   : > { %v1598_v30 = vadd.f32 %v1573_v25, %v3558_v26  ;;  %v1599_v32 = vadd.f32 %v1593_v53, %v3559_v35 }
 0x497   : > { %v2094_v31 = vmul.f32 -1.442695, %v1598_v30 }
 0x498   : > { %v2198_v45 = vpop.eup %2197 }
 0x499   : > { %v2200_v28 = vpop.eup %2199  ;;  %v1609_v5 = vadd.f32 1.0, %v2198_v45  ;;  %2201 = vpow2.f32 %v2094_v31 }
 0x49a   : > { %v1610_v41 = vadd.f32 1.0, %v2200_v28  ;;  %v3563_v28 = vld [vmem:[#allocation61_spill] sm:$0xff] }
 0x49b   : > { %2203 = vrcp.f32 %v1609_v5  ;;  %v1623_v39 = vand.u32 2147483648, %v1609_v5  ;;  %v1621_v9 = vand.u32 2147483647, %v1609_v5  ;;  %vm1617_vm14 = vweird.f32 %v1609_v5 }
 0x49c   : > { %2205 = vrcp.f32 %v1610_v41  ;;  %v1638_v0 = vand.u32 2147483648, %v1610_v41  ;;  %v1636_v54 = vand.u32 2147483647, %v1610_v41  ;;  %vm1632_vm15 = vweird.f32 %v1610_v41 }
 0x49d   : > { %v1624_v29 = vor.u32 1.1754944e-38, %v1623_v39  ;;  %vm1622_vm2 = vcmp.eq.f32.partialorder %v1621_v9, 8.507059e+37 }
 0x49e   : > { %v1639_v38 = vor.u32 1.1754944e-38, %v1638_v0  ;;  %vm1637_vm3 = vcmp.eq.f32.partialorder %v1636_v54, 8.507059e+37 }
 0x49f   : > { %v2202_v8 = vpop.eup %2201 }
 0x4a0   : > { %v1611_v34 = vadd.f32 1.0, %v2202_v8 }
 0x4a1   : > { %v2204_v33 = vpop.eup %2203 }
 0x4a2   : > { %v2206_v15 = vpop.eup %2205  ;;  %v1613_v36 = vmul.f32 %v2204_v33, %v1609_v5  ;;  %2207 = vrcp.f32 %v1611_v34  ;;  %vm1618_vm12 = vweird.f32 %v2204_v33  ;;  %v1653_v57 = vand.u32 2147483648, %v1611_v34 }
 0x4a3   : > { %v1628_v10 = vmul.f32 %v2206_v15, %v1610_v41  ;;  %2209 = vtanh.f32 %v1599_v32  ;;  %vm1633_vm13 = vweird.f32 %v2206_v15  ;;  %vm1619_vm0 = vmor %vm1617_vm14, %vm1618_vm12  ;;  %vm1647_vm5 = vweird.f32 %v1611_v34 }
 0x4a4   : > { %v1614_v13 = vsub.f32 1.0, %v1613_v36  ;;  %vm1634_vm1 = vmor %vm1632_vm15, %vm1633_vm13  ;;  %v1651_v59 = vand.u32 2147483647, %v1611_v34  ;;  %v1654_v62 = vor.u32 1.1754944e-38, %v1653_v57 }
 0x4a5   : > { %v1629_v55 = vsub.f32 1.0, %v1628_v10 }
 0x4a6   : > { %v1615_v19 = vmul.f32 %v2204_v33, %v1614_v13  ;;  %vm1652_vm7 = vcmp.eq.f32.partialorder %v1651_v59, 8.507059e+37 }
 0x4a7   : > { %v1630_v27 = vmul.f32 %v2206_v15, %v1629_v55 }
 0x4a8   : > { %v2208_v60 = vpop.eup %2207  ;;  %v1616_v24 = vadd.f32 %v2204_v33, %v1615_v19 }
 0x4a9   : > { %v1643_v50 = vmul.f32 %v2208_v60, %v1611_v34  ;;  %v1631_v37 = vadd.f32 %v2206_v15, %v1630_v27  ;;  %v2210_v42 = vpop.eup %2209  ;;  %vm1648_vm4 = vweird.f32 %v2208_v60 }
 0x4aa   : > { %v1620_v40 = vsel %vm1619_vm0, %v2204_v33, %v1616_v24  ;;  %vm1649_vm6 = vmor %vm1647_vm5, %vm1648_vm4 }
 0x4ab   : > { %v1644_v43 = vsub.f32 1.0, %v1643_v50  ;;  %v1625_v44 = vsel %vm1622_vm2, %v1624_v29, %v1620_v40  ;;  %v1635_v46 = vsel %vm1634_vm1, %v2206_v15, %v1631_v37 }
 0x4ac   : > { %v1640_v47 = vsel %vm1637_vm3, %v1639_v38, %v1635_v46  ;;  %v1659_v48 = vmul.f32 %v2210_v42, %v1625_v44 }
 0x4ad   : > { %v1645_v49 = vmul.f32 %v2208_v60, %v1644_v43  ;;  %v1658_v51 = vmul.f32 %v1640_v47, %v3198_v58 }
 0x4af   : > { %v3271_v52 = vadd.f32 %v1659_v48, %v1658_v51  ;;  %v1646_v56 = vadd.f32 %v2208_v60, %v1645_v49 }
 0x4b1   : > { %2211 = vtanh.f32 %v3271_v52  ;;  %v1650_v61 = vsel %vm1649_vm6, %v2208_v60, %v1646_v56 }
 0x4b2   : > { %v1655_v1 = vsel %vm1652_vm7, %v1654_v62, %v1650_v61  ;;  %v3564_v61 = vld [vmem:[#allocation62_spill] sm:$0xff] }
 0x4b7   : > { %v2212_v63 = vpop.eup %2211 }
 0x4b8   : > { %v1662_v2 = vmul.f32 %v2212_v63, %v1655_v1  ;;  %v3565_v63 = vld [vmem:[#allocation63_spill] sm:$0xff] }
 0x4ba   : > { %2095 = vst [vmem:[%s2299_s24 + $0x28] sm:$0xff] %v1662_v2  ;;  %1688 = vmatmul.f32.vlgmr.msrb.gmra.mxu0 %v1662_v2  ;;  %1708 = vmatmul.f32.vlgmr.msrb.gmra.mxu1 %v1662_v2 }
 0x4bb   : > { %1728 = vmatmul.f32.vlgmr.msrb.gmra.mxu2 %v1662_v2  ;;  %1748 = vmatmul.f32.vlgmr.msrb.gmra.mxu3 %v1662_v2 }
 0x537   : > { %v1689_v58 = vpop.f32.mrf.mxu0  ;;  %v1709_v3 = vpop.f32.mrf.mxu1 }
 0x538   : > { %v1752_v6 = vadd.f32 %v1689_v58, %v3560_v4  ;;  %v1753_v11 = vadd.f32 %v1709_v3, %v3561_v7  ;;  %v3566_v4 = vld [vmem:[#allocation64_spill] sm:$0xff] }
 0x53a   : > { %v2096_v12 = vmul.f32 -1.442695, %v1752_v6  ;;  %v2097_v14 = vmul.f32 -1.442695, %v1753_v11 }
 0x53c   : > { %2213 = vpow2.f32 %v2096_v12 }
 0x53d   : > { %2215 = vpow2.f32 %v2097_v14 }
 0x53e   : > { %v1729_v16 = vpop.f32.mrf.mxu2  ;;  %v1749_v26 = vpop.f32.mrf.mxu3 }
 0x53f   : > { %v1754_v18 = vadd.f32 %v1729_v16, %v3562_v17  ;;  %v1755_v5 = vadd.f32 %v1749_v26, %v3563_v28 }
 0x541   : > { %v2098_v20 = vmul.f32 -1.442695, %v1754_v18 }
 0x542   : > { %v2214_v21 = vpop.eup %2213 }
 0x543   : > { %v2216_v22 = vpop.eup %2215  ;;  %v1765_v23 = vadd.f32 1.0, %v2214_v21  ;;  %2217 = vpow2.f32 %v2098_v20 }
 0x544   : > { %v1766_v25 = vadd.f32 1.0, %v2216_v22  ;;  %v3567_v22 = vld [vmem:[#allocation65_spill] sm:$0xff] }
 0x545   : > { %2219 = vrcp.f32 %v1765_v23  ;;  %v1779_v35 = vand.u32 2147483648, %v1765_v23  ;;  %v1777_v36 = vand.u32 2147483647, %v1765_v23  ;;  %vm1773_vm10 = vweird.f32 %v1765_v23 }
 0x546   : > { %2221 = vrcp.f32 %v1766_v25  ;;  %v1794_v32 = vand.u32 2147483648, %v1766_v25  ;;  %v1792_v13 = vand.u32 2147483647, %v1766_v25  ;;  %vm1788_vm11 = vweird.f32 %v1766_v25 }
 0x547   : > { %v1780_v19 = vor.u32 1.1754944e-38, %v1779_v35  ;;  %vm1778_vm14 = vcmp.eq.f32.partialorder %v1777_v36, 8.507059e+37 }
 0x548   : > { %v1795_v27 = vor.u32 1.1754944e-38, %v1794_v32  ;;  %vm1793_vm15 = vcmp.eq.f32.partialorder %v1792_v13, 8.507059e+37 }
 0x549   : > { %v2218_v30 = vpop.eup %2217 }
 0x54a   : > { %v1767_v31 = vadd.f32 1.0, %v2218_v30 }
 0x54b   : > { %v2220_v45 = vpop.eup %2219 }
 0x54c   : > { %v2222_v41 = vpop.eup %2221  ;;  %v1769_v53 = vmul.f32 %v2220_v45, %v1765_v23  ;;  %2223 = vrcp.f32 %v1767_v31  ;;  %vm1774_vm8 = vweird.f32 %v2220_v45  ;;  %v1809_v46 = vand.u32 2147483648, %v1767_v31 }
 0x54d   : > { %v1784_v8 = vmul.f32 %v2222_v41, %v1766_v25  ;;  %2225 = vtanh.f32 %v1755_v5  ;;  %vm1789_vm9 = vweird.f32 %v2222_v41  ;;  %vm1775_vm12 = vmor %vm1773_vm10, %vm1774_vm8  ;;  %vm1803_vm1 = vweird.f32 %v1767_v31 }
 0x54e   : > { %v1770_v34 = vsub.f32 1.0, %v1769_v53  ;;  %vm1790_vm13 = vmor %vm1788_vm11, %vm1789_vm9  ;;  %v1807_v47 = vand.u32 2147483647, %v1767_v31  ;;  %v1810_v49 = vor.u32 1.1754944e-38, %v1809_v46 }
 0x54f   : > { %v1785_v33 = vsub.f32 1.0, %v1784_v8 }
 0x550   : > { %v1771_v15 = vmul.f32 %v2220_v45, %v1770_v34  ;;  %vm1808_vm3 = vcmp.eq.f32.partialorder %v1807_v47, 8.507059e+37 }
 0x551   : > { %v1786_v10 = vmul.f32 %v2222_v41, %v1785_v33 }
 0x552   : > { %v2224_v55 = vpop.eup %2223  ;;  %v1772_v39 = vadd.f32 %v2220_v45, %v1771_v15 }
 0x553   : > { %v1799_v0 = vmul.f32 %v2224_v55, %v1767_v31  ;;  %v1787_v9 = vadd.f32 %v2222_v41, %v1786_v10  ;;  %v2226_v60 = vpop.eup %2225  ;;  %vm1804_vm0 = vweird.f32 %v2224_v55 }
 0x554   : > { %v1776_v54 = vsel %vm1775_vm12, %v2220_v45, %v1772_v39  ;;  %vm1805_vm2 = vmor %vm1803_vm1, %vm1804_vm0 }
 0x555   : > { %v1800_v24 = vsub.f32 1.0, %v1799_v0  ;;  %v1781_v50 = vsel %vm1778_vm14, %v1780_v19, %v1776_v54  ;;  %v1791_v29 = vsel %vm1790_vm13, %v2222_v41, %v1787_v9 }
 0x556   : > { %v1796_v37 = vsel %vm1793_vm15, %v1795_v27, %v1791_v29  ;;  %v1815_v38 = vmul.f32 %v2226_v60, %v1781_v50 }
 0x557   : > { %v1801_v40 = vmul.f32 %v2224_v55, %v1800_v24  ;;  %v1814_v42 = vmul.f32 %v1796_v37, %v3271_v52 }
 0x559   : > { %v3280_v43 = vadd.f32 %v1815_v38, %v1814_v42  ;;  %v1802_v44 = vadd.f32 %v2224_v55, %v1801_v40 }
 0x55b   : > { %2227 = vtanh.f32 %v3280_v43  ;;  %v1806_v48 = vsel %vm1805_vm2, %v2224_v55, %v1802_v44 }
 0x55c   : > { %v1811_v56 = vsel %vm1808_vm3, %v1810_v49, %v1806_v48 }
 0x561   : > { %v2228_v51 = vpop.eup %2227 }
 0x562   : > { %v1818_v57 = vmul.f32 %v2228_v51, %v1811_v56 }
 0x564   : > { %2099 = vst [vmem:[%s2299_s24 + $0x30] sm:$0xff] %v1818_v57  ;;  %1844 = vmatmul.f32.vlgmr.msra.gmra.mxu0 %v1818_v57  ;;  %1864 = vmatmul.f32.vlgmr.msra.gmra.mxu1 %v1818_v57 }
 0x565   : > { %1884 = vmatmul.f32.vlgmr.msra.gmra.mxu2 %v1818_v57  ;;  %1904 = vmatmul.f32.vlgmr.msra.gmra.mxu3 %v1818_v57 }
 0x5e1   : > { %v1845_v52 = vpop.f32.mrf.mxu0  ;;  %v1865_v59 = vpop.f32.mrf.mxu1 }
 0x5e2   : > { %v1908_v62 = vadd.f32 %v1845_v52, %v3564_v61  ;;  %v1909_v1 = vadd.f32 %v1865_v59, %v3565_v63 }
 0x5e4   : > { %v2100_v2 = vmul.f32 -1.442695, %v1908_v62  ;;  %v2101_v58 = vmul.f32 -1.442695, %v1909_v1 }
 0x5e6   : > { %2229 = vpow2.f32 %v2100_v2 }
 0x5e7   : > { %2231 = vpow2.f32 %v2101_v58 }
 0x5e8   : > { %v1885_v3 = vpop.f32.mrf.mxu2  ;;  %v1905_v17 = vpop.f32.mrf.mxu3 }
 0x5e9   : > { %v1910_v6 = vadd.f32 %v1885_v3, %v3566_v4  ;;  %v1911_v23 = vadd.f32 %v1905_v17, %v3567_v22 }
 0x5eb   : > { %v2102_v7 = vmul.f32 -1.442695, %v1910_v6 }
 0x5ec   : > { %v2230_v11 = vpop.eup %2229 }
 0x5ed   : > { %v2232_v12 = vpop.eup %2231  ;;  %v1921_v14 = vadd.f32 1.0, %v2230_v11  ;;  %2233 = vpow2.f32 %v2102_v7 }
 0x5ee   : > { %v1922_v16 = vadd.f32 1.0, %v2232_v12 }
 0x5ef   : > { %2235 = vrcp.f32 %v1921_v14  ;;  %v1935_v28 = vand.u32 2147483648, %v1921_v14  ;;  %v1933_v53 = vand.u32 2147483647, %v1921_v14  ;;  %vm1929_vm6 = vweird.f32 %v1921_v14 }
 0x5f0   : > { %2237 = vrcp.f32 %v1922_v16  ;;  %v1950_v5 = vand.u32 2147483648, %v1922_v16  ;;  %v1948_v34 = vand.u32 2147483647, %v1922_v16  ;;  %vm1944_vm7 = vweird.f32 %v1922_v16 }
 0x5f1   : > { %v1936_v15 = vor.u32 1.1754944e-38, %v1935_v28  ;;  %vm1934_vm10 = vcmp.eq.f32.partialorder %v1933_v53, 8.507059e+37 }
 0x5f2   : > { %v1951_v10 = vor.u32 1.1754944e-38, %v1950_v5  ;;  %vm1949_vm11 = vcmp.eq.f32.partialorder %v1948_v34, 8.507059e+37 }
 0x5f3   : > { %v2234_v18 = vpop.eup %2233 }
 0x5f4   : > { %v1923_v20 = vadd.f32 1.0, %v2234_v18 }
 0x5f5   : > { %v2236_v21 = vpop.eup %2235 }
 0x5f6   : > { %v2238_v25 = vpop.eup %2237  ;;  %v1925_v26 = vmul.f32 %v2236_v21, %v1921_v14  ;;  %2239 = vrcp.f32 %v1923_v20  ;;  %vm1930_vm4 = vweird.f32 %v2236_v21  ;;  %v1965_v29 = vand.u32 2147483648, %v1923_v20 }
 0x5f7   : > { %v1940_v30 = vmul.f32 %v2238_v25, %v1922_v16  ;;  %2241 = vtanh.f32 %v1911_v23  ;;  %vm1945_vm5 = vweird.f32 %v2238_v25  ;;  %vm1931_vm8 = vmor %vm1929_vm6, %vm1930_vm4  ;;  %vm1959_vm13 = vweird.f32 %v1923_v20 }
 0x5f8   : > { %v1926_v31 = vsub.f32 1.0, %v1925_v26  ;;  %vm1946_vm9 = vmor %vm1944_vm7, %vm1945_vm5  ;;  %v1963_v37 = vand.u32 2147483647, %v1923_v20  ;;  %v1966_v40 = vor.u32 1.1754944e-38, %v1965_v29 }
 0x5f9   : > { %v1941_v45 = vsub.f32 1.0, %v1940_v30 }
 0x5fa   : > { %v1927_v41 = vmul.f32 %v2236_v21, %v1926_v31  ;;  %vm1964_vm15 = vcmp.eq.f32.partialorder %v1963_v37, 8.507059e+37 }
 0x5fb   : > { %v1942_v8 = vmul.f32 %v2238_v25, %v1941_v45 }
 0x5fc   : > { %v2240_v33 = vpop.eup %2239  ;;  %v1928_v35 = vadd.f32 %v2236_v21, %v1927_v41 }
 0x5fd   : > { %v1955_v32 = vmul.f32 %v2240_v33, %v1923_v20  ;;  %v1943_v36 = vadd.f32 %v2238_v25, %v1942_v8  ;;  %v2242_v55 = vpop.eup %2241  ;;  %vm1960_vm12 = vweird.f32 %v2240_v33 }
 0x5fe   : > { %v1932_v13 = vsel %vm1931_vm8, %v2236_v21, %v1928_v35  ;;  %vm1961_vm14 = vmor %vm1959_vm13, %vm1960_vm12 }
 0x5ff   : > { %v1956_v39 = vsub.f32 1.0, %v1955_v32  ;;  %v1937_v0 = vsel %vm1934_vm10, %v1936_v15, %v1932_v13  ;;  %v1947_v19 = vsel %vm1946_vm9, %v2238_v25, %v1943_v36 }
 0x600   : > { %v1952_v9 = vsel %vm1949_vm11, %v1951_v10, %v1947_v19  ;;  %v1971_v27 = vmul.f32 %v2242_v55, %v1937_v0 }
 0x601   : > { %v1957_v54 = vmul.f32 %v2240_v33, %v1956_v39  ;;  %v1970_v60 = vmul.f32 %v1952_v9, %v3280_v43 }
 0x603   : > { %v1972_v24 = vadd.f32 %v1971_v27, %v1970_v60  ;;  %v1958_v50 = vadd.f32 %v2240_v33, %v1957_v54 }
 0x605   : > { %2243 = vtanh.f32 %v1972_v24  ;;  %1978 = vst [vmem:[#allocation3] sm:$0xff] %v1972_v24  ;;  %v1962_v38 = vsel %vm1961_vm14, %v2240_v33, %v1958_v50 }
 0x606   : > { %v1967_v44 = vsel %vm1964_vm15, %v1966_v40, %v1962_v38 }
 0x60b   : > { %v2244_v42 = vpop.eup %2243 }
 0x60c   : > { %v1974_v46 = vmul.f32 %v2244_v42, %v1967_v44 }
 0x60e   : > { %2103 = vst [vmem:[%s2299_s24 + $0x38] sm:$0xff] %v1974_v46 }
 0x60f   : > { %1977 = vst [vmem:[#allocation2] sm:$0xff] %v1974_v46 }
 0x610 PF: > { %s14_s15 = sadd.s32 1, %s2255_s15  }
 0x611   : > { %p11_p5 = scmp.ge.s32.totalorder %s14_s15, 4  }
 0x613   :  { %13 = sbr.rel (!%p11_p5) target bundleno = 1 (0x1), region = 125 }
 0x618   :  { %2001 = vsyncmov [#allocation7] }
 0x61b   :  { %s2002_s13 = vpop.sfrf %2001 }
 0x61c   :  { %p2106_p6 = scmp.ne.s32.totalorder %s2002_s13, 0 }
 0x61e   :  { %2006 = shalt.err (%p2106_p6)  }
 0x61f   :  { %2008 = vsyncmov [#allocation7 + $0x1] }
 0x622   :  { %s2009_s14 = vpop.sfrf %2008 }
 0x623   :  { %p2107_p7 = scmp.ne.s32.totalorder %s2009_s14, 0 }
 0x625   :  { %2013 = shalt.err (%p2107_p7)  }

</bundles_post_ra>
